<compile_context>
chip_gen: v6e
topology: v6e:2x2x1
jax: 0.10.0
libtpu: 0.0.40
codegen_flags: <defaults>
</compile_context>

<pallas_src>
import functools

import jax
import jax.numpy as jnp
from jax import lax
from jax.experimental import pallas as pl
from jax.experimental.pallas import tpu as pltpu

_EPS = 1e-5


def _round_up(x, m):
    return ((x + m - 1) // m) * m


def _vmem_limit_bytes():
    """Generation-aware scoped-VMEM budget (v7x: 64 MiB phys, v5e/v6e: 128 MiB)."""
    try:
        cap = int(pltpu.get_tpu_info().vmem_capacity_bytes)
    except Exception:
        cap = 64 * 1024 * 1024  # assume the smallest (v7x) part if query fails
    return max(32 * 1024 * 1024, min(int(cap * 0.7), 96 * 1024 * 1024))


@functools.partial(jax.jit, static_argnames=("kernel_size", "stride"))
def conv_bn_relu(x_nchw, weight_oihw, gamma, beta, *, kernel_size, stride):
    """Forward of ConvBatchNormReLU: (N, Cin, H, W) f32 -> (N, Cout, OH, OW) f32."""
    n, cin, h, w = x_nchw.shape
    cout = weight_oihw.shape[0]
    k, s = kernel_size, stride
    pad = k // 2
    oh = (h + 2 * pad - k) // s + 1
    ow = (w + 2 * pad - k) // s + 1
    m_img = oh * ow

    cin_p = _round_up(cin, 128)              # input channels on the lane axis
    cout_p = _round_up(cout, 128)            # lane-dense output channels
    ct = 256 if cout_p % 256 == 0 else 128   # Cout tile (v6e/v7x MXU width)
    n_ct = cout_p // ct
    s2, k2 = s * s, k * k

    # ------------------------------------------------------------------
    # Wrapper-side layout glue (each a single cheap relayout, no K*K blowup).
    # ------------------------------------------------------------------
    hp = _round_up(h + 2 * pad, s)
    wp = _round_up(w + 2 * pad, s)
    hq, wq = hp // s, wp // s
    x_nhwc = jnp.transpose(x_nchw, (0, 2, 3, 1)).astype(jnp.bfloat16)
    x_pad = jnp.pad(x_nhwc, ((0, 0), (pad, hp - h - pad), (pad, wp - w - pad),
                             (0, cin_p - cin)))
    # Stride phase split (space-to-depth): tap (ki, kj) then reads phase
    # (ki%s, kj%s) at unit-stride offset (ki//s, kj//s); identity for s == 1.
    x_ph = (x_pad.reshape(n, hq, s, wq, s, cin_p)
            .transpose(0, 2, 4, 1, 3, 5)
            .reshape(n * s2, hq, wq, cin_p))

    # Weights as KH*KW taps of (Cin_p, Cout_p), zero padded (conv stays exact).
    w_taps = jnp.transpose(weight_oihw, (2, 3, 1, 0)).reshape(k2, cin, cout)
    w_taps = jnp.pad(w_taps, ((0, 0), (0, cin_p - cin), (0, cout_p - cout)))
    w_taps = w_taps.astype(jnp.bfloat16)

    gamma_p = jnp.pad(gamma.astype(jnp.float32), (0, cout_p - cout))
    beta_p = jnp.pad(beta.astype(jnp.float32), (0, cout_p - cout))

    vmem_limit = _vmem_limit_bytes()

    # ------------------------------------------------------------------
    # Pass 1: fused in-kernel im2col conv (bf16 MXU, f32 acc) + per-channel
    # sum / sumsq.  Stats blocks stay VMEM-resident across the batch axis
    # (same block index -> "arbitrary" reduction, init gated with pl.when).
    # ------------------------------------------------------------------
    def conv_stats_kernel(x_ref, w_ref, conv_ref, sum_ref, sumsq_ref):
        b_idx = pl.program_id(1)
        acc = None
        for ki in range(k):
            for kj in range(k):
                ph = (ki % s) * s + (kj % s)
                r0, q0 = ki // s, kj // s
                lhs = x_ref[ph, r0:r0 + oh, q0:q0 + ow, :].reshape(m_img, cin_p)
                part = jnp.dot(lhs, w_ref[ki * k + kj],
                               preferred_element_type=jnp.float32)
                acc = part if acc is None else acc + part
        conv_ref[0] = acc.astype(conv_ref.dtype)
        t_sum = jnp.sum(acc, axis=0, keepdims=True)
        t_sumsq = jnp.sum(acc * acc, axis=0, keepdims=True)

        @pl.when(b_idx == 0)
        def _():
            sum_ref[...] = t_sum
            sumsq_ref[...] = t_sumsq

        @pl.when(b_idx > 0)
        def _():
            sum_ref[...] += t_sum
            sumsq_ref[...] += t_sumsq

    conv_raw, stat_sum, stat_sumsq = pl.pallas_call(
        conv_stats_kernel,
        out_shape=(jax.ShapeDtypeStruct((n, m_img, cout_p), jnp.bfloat16),
                   jax.ShapeDtypeStruct((1, cout_p), jnp.float32),
                   jax.ShapeDtypeStruct((1, cout_p), jnp.float32)),
        grid=(n_ct, n),
        in_specs=[
            pl.BlockSpec((s2, hq, wq, cin_p), lambda c, b: (b, 0, 0, 0)),
            pl.BlockSpec((k2, cin_p, ct), lambda c, b: (0, 0, c)),
        ],
        out_specs=(
            pl.BlockSpec((1, m_img, ct), lambda c, b: (b, 0, c)),
            pl.BlockSpec((1, ct), lambda c, b: (0, c)),
            pl.BlockSpec((1, ct), lambda c, b: (0, c)),
        ),
        compiler_params=pltpu.CompilerParams(
            dimension_semantics=("parallel", "arbitrary"),
            vmem_limit_bytes=vmem_limit),
    )(x_ph, w_taps)

    # Fold BN (training-mode batch stats, biased variance, eps=1e-5 like
    # PyTorch) into one per-channel scale/shift — tiny (1, cout_p) XLA math.
    count = jnp.float32(n * m_img)
    mean = stat_sum / count
    # TODO(synk): E[x^2]-E[x]^2 can cancel for large-mean activations; switch to
    #             per-tile mean-shifted accumulation if that ever matters.
    var = jnp.maximum(stat_sumsq / count - mean * mean, 0.0)
    inv_std = lax.rsqrt(var + _EPS)
    scale = gamma_p[None, :] * inv_std           # padded lanes: gamma=0 -> 0
    shift = beta_p[None, :] - mean * scale

    # ------------------------------------------------------------------
    # Pass 2: pure elementwise y = max(conv * scale + shift, 0) (f32 epilogue).
    # ------------------------------------------------------------------
    def bn_relu_kernel(conv_ref, scale_ref, shift_ref, o_ref):
        xv = conv_ref[...].astype(jnp.float32)
        o_ref[...] = jnp.maximum(xv * scale_ref[...] + shift_ref[...], 0.0)

    out_nhwc = pl.pallas_call(
        bn_relu_kernel,
        out_shape=jax.ShapeDtypeStruct((n, m_img, cout_p), jnp.float32),
        grid=(n_ct, n),
        in_specs=[
            pl.BlockSpec((1, m_img, ct), lambda c, b: (b, 0, c)),
            pl.BlockSpec((1, ct), lambda c, b: (0, c)),
            pl.BlockSpec((1, ct), lambda c, b: (0, c)),
        ],
        out_specs=pl.BlockSpec((1, m_img, ct), lambda c, b: (b, 0, c)),
        compiler_params=pltpu.CompilerParams(
            dimension_semantics=("parallel", "parallel"),
            vmem_limit_bytes=vmem_limit),
    )(conv_raw, scale, shift)

    # Crop padded channels, restore PyTorch NCHW layout (parity-only transpose).
    out = out_nhwc[:, :, :cout].reshape(n, oh, ow, cout).transpose(0, 3, 1, 2)
    return out


def _reference(x, weight, gamma, beta, kernel_size, stride):
    padding = kernel_size // 2
    conv = lax.conv_general_dilated(
        x, weight, window_strides=(stride, stride),
        padding=[(padding, padding), (padding, padding)],
        dimension_numbers=("NCHW", "OIHW", "NCHW"))
    mean = conv.mean(axis=(0, 2, 3), keepdims=True)
    var = ((conv - mean) ** 2).mean(axis=(0, 2, 3), keepdims=True)
    y = (conv - mean) / jnp.sqrt(var + _EPS)
    y = y * gamma[None, :, None, None] + beta[None, :, None, None]
    return jnp.maximum(y, 0.0)


if __name__ == "__main__":
    # ConvBatchNormReLU(in_channels=4, out_channels=8, kernel_size=3, stride=1)
    N, CIN, H, W = 2, 4, 16, 16
    COUT, K, S = 8, 3, 1

    key = jax.random.PRNGKey(0)
    kx, kw, kg, kb = jax.random.split(key, 4)
    x = jax.random.normal(kx, (N, CIN, H, W), dtype=jnp.float32)
    weight = jax.random.normal(kw, (COUT, CIN, K, K), dtype=jnp.float32) * 0.1
    gamma = 1.0 + 0.1 * jax.random.normal(kg, (COUT,), dtype=jnp.float32)
    beta = 0.1 * jax.random.normal(kb, (COUT,), dtype=jnp.float32)

    out = conv_bn_relu(x, weight, gamma, beta, kernel_size=K, stride=S)
    out = jax.block_until_ready(out)

    ref = _reference(x, weight, gamma, beta, K, S)
    assert out.shape == ref.shape == (N, COUT, H, W)
    # MXU operands and the stored conv are bf16 (f32 accumulation); reference is
    # pure f32, so compare at bf16-level tolerance.
    max_err = jnp.max(jnp.abs(out - ref))
    assert jnp.allclose(out, ref, atol=5e-2, rtol=5e-2), f"max err = {max_err}"
    assert jnp.all(jnp.isfinite(out))

    print("KERNEL_OK")
</pallas_src>

<mosaic_0001>
module attributes {stable_mosaic.version = 11 : i64} {
  func.func @conv_stats_kernel(%arg0: i32, %arg1: i32, %arg2: memref<1x18x18x128xbf16, #tpu.memory_space<vmem>>, %arg3: memref<9x128x128xbf16, #tpu.memory_space<vmem>>, %arg4: memref<1x256x128xbf16, #tpu.memory_space<vmem>>, %arg5: memref<1x128xf32, #tpu.memory_space<vmem>>, %arg6: memref<1x128xf32, #tpu.memory_space<vmem>>) attributes {dimension_semantics = [#tpu.dimension_semantics<parallel>, #tpu.dimension_semantics<arbitrary>], iteration_bounds = array<i64: 1, 2>, scalar_prefetch = 0 : i64, scratch_operands = 0 : i64, tpu.core_type = #tpu.core_type<tc>, window_params = [{transform_indices = @transform_0, window_bounds = array<i64: 1, 18, 18, 128>}, {transform_indices = @transform_1, window_bounds = array<i64: 9, 128, 128>}, {transform_indices = @transform_2, window_bounds = array<i64: 1, 256, 128>}, {transform_indices = @transform_3, window_bounds = array<i64: 1, 128>}, {transform_indices = @transform_4, window_bounds = array<i64: 1, 128>}]} {
    %c0 = arith.constant 0 : index
    %c0_0 = arith.constant 0 : index
    %c0_1 = arith.constant 0 : index
    %c0_2 = arith.constant 0 : index
    %0 = vector.load %arg2[%c0, %c0_0, %c0_1, %c0_2] : memref<1x18x18x128xbf16, #tpu.memory_space<vmem>>, vector<1x16x16x128xbf16>
    %1 = vector.shape_cast %0 : vector<1x16x16x128xbf16> to vector<16x16x128xbf16>
    %2 = vector.shape_cast %1 : vector<16x16x128xbf16> to vector<256x128xbf16>
    %c0_3 = arith.constant 0 : index
    %c0_4 = arith.constant 0 : index
    %c0_5 = arith.constant 0 : index
    %3 = vector.load %arg3[%c0_3, %c0_4, %c0_5] : memref<9x128x128xbf16, #tpu.memory_space<vmem>>, vector<1x128x128xbf16>
    %4 = vector.shape_cast %3 : vector<1x128x128xbf16> to vector<128x128xbf16>
    %cst = arith.constant dense<0.000000e+00> : vector<256x128xf32>
    %5 = tpu.matmul %2, %4, %cst {dimension_numbers = #tpu.dot_dimension_numbers<[1], [0], [0], [1], [0, 0, 1, 1], [], []>} : vector<256x128xbf16>, vector<128x128xbf16>, vector<256x128xf32> -> vector<256x128xf32>
    %c0_6 = arith.constant 0 : index
    %c0_7 = arith.constant 0 : index
    %c1 = arith.constant 1 : index
    %c0_8 = arith.constant 0 : index
    %6 = vector.load %arg2[%c0_6, %c0_7, %c1, %c0_8] : memref<1x18x18x128xbf16, #tpu.memory_space<vmem>>, vector<1x16x16x128xbf16>
    %7 = vector.shape_cast %6 : vector<1x16x16x128xbf16> to vector<16x16x128xbf16>
    %8 = vector.shape_cast %7 : vector<16x16x128xbf16> to vector<256x128xbf16>
    %c1_9 = arith.constant 1 : index
    %c0_10 = arith.constant 0 : index
    %c0_11 = arith.constant 0 : index
    %9 = vector.load %arg3[%c1_9, %c0_10, %c0_11] : memref<9x128x128xbf16, #tpu.memory_space<vmem>>, vector<1x128x128xbf16>
    %10 = vector.shape_cast %9 : vector<1x128x128xbf16> to vector<128x128xbf16>
    %cst_12 = arith.constant dense<0.000000e+00> : vector<256x128xf32>
    %11 = tpu.matmul %8, %10, %cst_12 {dimension_numbers = #tpu.dot_dimension_numbers<[1], [0], [0], [1], [0, 0, 1, 1], [], []>} : vector<256x128xbf16>, vector<128x128xbf16>, vector<256x128xf32> -> vector<256x128xf32>
    %12 = arith.addf %5, %11 : vector<256x128xf32>
    %c0_13 = arith.constant 0 : index
    %c0_14 = arith.constant 0 : index
    %c2 = arith.constant 2 : index
    %c0_15 = arith.constant 0 : index
    %13 = vector.load %arg2[%c0_13, %c0_14, %c2, %c0_15] : memref<1x18x18x128xbf16, #tpu.memory_space<vmem>>, vector<1x16x16x128xbf16>
    %14 = vector.shape_cast %13 : vector<1x16x16x128xbf16> to vector<16x16x128xbf16>
    %15 = vector.shape_cast %14 : vector<16x16x128xbf16> to vector<256x128xbf16>
    %c2_16 = arith.constant 2 : index
    %c0_17 = arith.constant 0 : index
    %c0_18 = arith.constant 0 : index
    %16 = vector.load %arg3[%c2_16, %c0_17, %c0_18] : memref<9x128x128xbf16, #tpu.memory_space<vmem>>, vector<1x128x128xbf16>
    %17 = vector.shape_cast %16 : vector<1x128x128xbf16> to vector<128x128xbf16>
    %cst_19 = arith.constant dense<0.000000e+00> : vector<256x128xf32>
    %18 = tpu.matmul %15, %17, %cst_19 {dimension_numbers = #tpu.dot_dimension_numbers<[1], [0], [0], [1], [0, 0, 1, 1], [], []>} : vector<256x128xbf16>, vector<128x128xbf16>, vector<256x128xf32> -> vector<256x128xf32>
    %19 = arith.addf %12, %18 : vector<256x128xf32>
    %c0_20 = arith.constant 0 : index
    %c1_21 = arith.constant 1 : index
    %c0_22 = arith.constant 0 : index
    %c0_23 = arith.constant 0 : index
    %20 = vector.load %arg2[%c0_20, %c1_21, %c0_22, %c0_23] : memref<1x18x18x128xbf16, #tpu.memory_space<vmem>>, vector<1x16x16x128xbf16>
    %21 = vector.shape_cast %20 : vector<1x16x16x128xbf16> to vector<16x16x128xbf16>
    %22 = vector.shape_cast %21 : vector<16x16x128xbf16> to vector<256x128xbf16>
    %c3 = arith.constant 3 : index
    %c0_24 = arith.constant 0 : index
    %c0_25 = arith.constant 0 : index
    %23 = vector.load %arg3[%c3, %c0_24, %c0_25] : memref<9x128x128xbf16, #tpu.memory_space<vmem>>, vector<1x128x128xbf16>
    %24 = vector.shape_cast %23 : vector<1x128x128xbf16> to vector<128x128xbf16>
    %cst_26 = arith.constant dense<0.000000e+00> : vector<256x128xf32>
    %25 = tpu.matmul %22, %24, %cst_26 {dimension_numbers = #tpu.dot_dimension_numbers<[1], [0], [0], [1], [0, 0, 1, 1], [], []>} : vector<256x128xbf16>, vector<128x128xbf16>, vector<256x128xf32> -> vector<256x128xf32>
    %26 = arith.addf %19, %25 : vector<256x128xf32>
    %c0_27 = arith.constant 0 : index
    %c1_28 = arith.constant 1 : index
    %c1_29 = arith.constant 1 : index
    %c0_30 = arith.constant 0 : index
    %27 = vector.load %arg2[%c0_27, %c1_28, %c1_29, %c0_30] : memref<1x18x18x128xbf16, #tpu.memory_space<vmem>>, vector<1x16x16x128xbf16>
    %28 = vector.shape_cast %27 : vector<1x16x16x128xbf16> to vector<16x16x128xbf16>
    %29 = vector.shape_cast %28 : vector<16x16x128xbf16> to vector<256x128xbf16>
    %c4 = arith.constant 4 : index
    %c0_31 = arith.constant 0 : index
    %c0_32 = arith.constant 0 : index
    %30 = vector.load %arg3[%c4, %c0_31, %c0_32] : memref<9x128x128xbf16, #tpu.memory_space<vmem>>, vector<1x128x128xbf16>
    %31 = vector.shape_cast %30 : vector<1x128x128xbf16> to vector<128x128xbf16>
    %cst_33 = arith.constant dense<0.000000e+00> : vector<256x128xf32>
    %32 = tpu.matmul %29, %31, %cst_33 {dimension_numbers = #tpu.dot_dimension_numbers<[1], [0], [0], [1], [0, 0, 1, 1], [], []>} : vector<256x128xbf16>, vector<128x128xbf16>, vector<256x128xf32> -> vector<256x128xf32>
    %33 = arith.addf %26, %32 : vector<256x128xf32>
    %c0_34 = arith.constant 0 : index
    %c1_35 = arith.constant 1 : index
    %c2_36 = arith.constant 2 : index
    %c0_37 = arith.constant 0 : index
    %34 = vector.load %arg2[%c0_34, %c1_35, %c2_36, %c0_37] : memref<1x18x18x128xbf16, #tpu.memory_space<vmem>>, vector<1x16x16x128xbf16>
    %35 = vector.shape_cast %34 : vector<1x16x16x128xbf16> to vector<16x16x128xbf16>
    %36 = vector.shape_cast %35 : vector<16x16x128xbf16> to vector<256x128xbf16>
    %c5 = arith.constant 5 : index
    %c0_38 = arith.constant 0 : index
    %c0_39 = arith.constant 0 : index
    %37 = vector.load %arg3[%c5, %c0_38, %c0_39] : memref<9x128x128xbf16, #tpu.memory_space<vmem>>, vector<1x128x128xbf16>
    %38 = vector.shape_cast %37 : vector<1x128x128xbf16> to vector<128x128xbf16>
    %cst_40 = arith.constant dense<0.000000e+00> : vector<256x128xf32>
    %39 = tpu.matmul %36, %38, %cst_40 {dimension_numbers = #tpu.dot_dimension_numbers<[1], [0], [0], [1], [0, 0, 1, 1], [], []>} : vector<256x128xbf16>, vector<128x128xbf16>, vector<256x128xf32> -> vector<256x128xf32>
    %40 = arith.addf %33, %39 : vector<256x128xf32>
    %c0_41 = arith.constant 0 : index
    %c2_42 = arith.constant 2 : index
    %c0_43 = arith.constant 0 : index
    %c0_44 = arith.constant 0 : index
    %41 = vector.load %arg2[%c0_41, %c2_42, %c0_43, %c0_44] : memref<1x18x18x128xbf16, #tpu.memory_space<vmem>>, vector<1x16x16x128xbf16>
    %42 = vector.shape_cast %41 : vector<1x16x16x128xbf16> to vector<16x16x128xbf16>
    %43 = vector.shape_cast %42 : vector<16x16x128xbf16> to vector<256x128xbf16>
    %c6 = arith.constant 6 : index
    %c0_45 = arith.constant 0 : index
    %c0_46 = arith.constant 0 : index
    %44 = vector.load %arg3[%c6, %c0_45, %c0_46] : memref<9x128x128xbf16, #tpu.memory_space<vmem>>, vector<1x128x128xbf16>
    %45 = vector.shape_cast %44 : vector<1x128x128xbf16> to vector<128x128xbf16>
    %cst_47 = arith.constant dense<0.000000e+00> : vector<256x128xf32>
    %46 = tpu.matmul %43, %45, %cst_47 {dimension_numbers = #tpu.dot_dimension_numbers<[1], [0], [0], [1], [0, 0, 1, 1], [], []>} : vector<256x128xbf16>, vector<128x128xbf16>, vector<256x128xf32> -> vector<256x128xf32>
    %47 = arith.addf %40, %46 : vector<256x128xf32>
    %c0_48 = arith.constant 0 : index
    %c2_49 = arith.constant 2 : index
    %c1_50 = arith.constant 1 : index
    %c0_51 = arith.constant 0 : index
    %48 = vector.load %arg2[%c0_48, %c2_49, %c1_50, %c0_51] : memref<1x18x18x128xbf16, #tpu.memory_space<vmem>>, vector<1x16x16x128xbf16>
    %49 = vector.shape_cast %48 : vector<1x16x16x128xbf16> to vector<16x16x128xbf16>
    %50 = vector.shape_cast %49 : vector<16x16x128xbf16> to vector<256x128xbf16>
    %c7 = arith.constant 7 : index
    %c0_52 = arith.constant 0 : index
    %c0_53 = arith.constant 0 : index
    %51 = vector.load %arg3[%c7, %c0_52, %c0_53] : memref<9x128x128xbf16, #tpu.memory_space<vmem>>, vector<1x128x128xbf16>
    %52 = vector.shape_cast %51 : vector<1x128x128xbf16> to vector<128x128xbf16>
    %cst_54 = arith.constant dense<0.000000e+00> : vector<256x128xf32>
    %53 = tpu.matmul %50, %52, %cst_54 {dimension_numbers = #tpu.dot_dimension_numbers<[1], [0], [0], [1], [0, 0, 1, 1], [], []>} : vector<256x128xbf16>, vector<128x128xbf16>, vector<256x128xf32> -> vector<256x128xf32>
    %54 = arith.addf %47, %53 : vector<256x128xf32>
    %c0_55 = arith.constant 0 : index
    %c2_56 = arith.constant 2 : index
    %c2_57 = arith.constant 2 : index
    %c0_58 = arith.constant 0 : index
    %55 = vector.load %arg2[%c0_55, %c2_56, %c2_57, %c0_58] : memref<1x18x18x128xbf16, #tpu.memory_space<vmem>>, vector<1x16x16x128xbf16>
    %56 = vector.shape_cast %55 : vector<1x16x16x128xbf16> to vector<16x16x128xbf16>
    %57 = vector.shape_cast %56 : vector<16x16x128xbf16> to vector<256x128xbf16>
    %c8 = arith.constant 8 : index
    %c0_59 = arith.constant 0 : index
    %c0_60 = arith.constant 0 : index
    %58 = vector.load %arg3[%c8, %c0_59, %c0_60] : memref<9x128x128xbf16, #tpu.memory_space<vmem>>, vector<1x128x128xbf16>
    %59 = vector.shape_cast %58 : vector<1x128x128xbf16> to vector<128x128xbf16>
    %cst_61 = arith.constant dense<0.000000e+00> : vector<256x128xf32>
    %60 = tpu.matmul %57, %59, %cst_61 {dimension_numbers = #tpu.dot_dimension_numbers<[1], [0], [0], [1], [0, 0, 1, 1], [], []>} : vector<256x128xbf16>, vector<128x128xbf16>, vector<256x128xf32> -> vector<256x128xf32>
    %61 = arith.addf %54, %60 : vector<256x128xf32>
    %62 = arith.truncf %61 : vector<256x128xf32> to vector<256x128xbf16>
    %c0_62 = arith.constant 0 : index
    %c0_63 = arith.constant 0 : index
    %c0_64 = arith.constant 0 : index
    %63 = vector.load %arg4[%c0_62, %c0_63, %c0_64] : memref<1x256x128xbf16, #tpu.memory_space<vmem>>, vector<1x256x128xbf16>
    %64 = vector.shape_cast %63 : vector<1x256x128xbf16> to vector<256x128xbf16>
    %65 = vector.shape_cast %62 : vector<256x128xbf16> to vector<1x256x128xbf16>
    tpu.vector_store %arg4[%c0_62, %c0_63, %c0_64], %65 {strides = array<i32>} : memref<1x256x128xbf16, #tpu.memory_space<vmem>>, vector<1x256x128xbf16>,
    %cst_65 = arith.constant dense<0.000000e+00> : vector<128xf32>
    %66 = vector.multi_reduction <add>, %61, %cst_65 [0] : vector<256x128xf32> to vector<128xf32>
    %67 = vector.shape_cast %66 : vector<128xf32> to vector<1x128xf32>
    %68 = arith.mulf %61, %61 : vector<256x128xf32>
    %cst_66 = arith.constant dense<0.000000e+00> : vector<128xf32>
    %69 = vector.multi_reduction <add>, %68, %cst_66 [0] : vector<256x128xf32> to vector<128xf32>
    %70 = vector.shape_cast %69 : vector<128xf32> to vector<1x128xf32>
    %c0_i32 = arith.constant 0 : i32
    %71 = arith.cmpi eq, %arg1, %c0_i32 : i32
    %72 = arith.extui %71 : i1 to i32
    %c0_i32_67 = arith.constant 0 : i32
    %73 = arith.cmpi ne, %72, %c0_i32_67 : i32
    scf.if %73 {
      %c0_70 = arith.constant 0 : index
      %c0_71 = arith.constant 0 : index
      %77 = vector.load %arg5[%c0_70, %c0_71] : memref<1x128xf32, #tpu.memory_space<vmem>>, vector<1x128xf32>
      tpu.vector_store %arg5[%c0_70, %c0_71], %67 {strides = array<i32>} : memref<1x128xf32, #tpu.memory_space<vmem>>, vector<1x128xf32>,
      %c0_72 = arith.constant 0 : index
      %c0_73 = arith.constant 0 : index
      %78 = vector.load %arg6[%c0_72, %c0_73] : memref<1x128xf32, #tpu.memory_space<vmem>>, vector<1x128xf32>
      tpu.vector_store %arg6[%c0_72, %c0_73], %70 {strides = array<i32>} : memref<1x128xf32, #tpu.memory_space<vmem>>, vector<1x128xf32>,
    } else {
    }
    %c0_i32_68 = arith.constant 0 : i32
    %74 = arith.cmpi sgt, %arg1, %c0_i32_68 : i32
    %75 = arith.extui %74 : i1 to i32
    %c0_i32_69 = arith.constant 0 : i32
    %76 = arith.cmpi ne, %75, %c0_i32_69 : i32
    scf.if %76 {
      %c0_70 = arith.constant 0 : index
      %c0_71 = arith.constant 0 : index
      %77 = vector.load %arg5[%c0_70, %c0_71] : memref<1x128xf32, #tpu.memory_space<vmem>>, vector<1x128xf32>
      %78 = arith.addf %77, %67 : vector<1x128xf32>
      %c0_72 = arith.constant 0 : index
      %c0_73 = arith.constant 0 : index
      %79 = vector.load %arg5[%c0_72, %c0_73] : memref<1x128xf32, #tpu.memory_space<vmem>>, vector<1x128xf32>
      tpu.vector_store %arg5[%c0_72, %c0_73], %78 {strides = array<i32>} : memref<1x128xf32, #tpu.memory_space<vmem>>, vector<1x128xf32>,
      %c0_74 = arith.constant 0 : index
      %c0_75 = arith.constant 0 : index
      %80 = vector.load %arg6[%c0_74, %c0_75] : memref<1x128xf32, #tpu.memory_space<vmem>>, vector<1x128xf32>
      %81 = arith.addf %80, %70 : vector<1x128xf32>
      %c0_76 = arith.constant 0 : index
      %c0_77 = arith.constant 0 : index
      %82 = vector.load %arg6[%c0_76, %c0_77] : memref<1x128xf32, #tpu.memory_space<vmem>>, vector<1x128xf32>
      tpu.vector_store %arg6[%c0_76, %c0_77], %81 {strides = array<i32>} : memref<1x128xf32, #tpu.memory_space<vmem>>, vector<1x128xf32>,
    } else {
    }
    return
  }
  func.func @transform_0(%arg0: i32, %arg1: i32) -> (i32, i32, i32, i32) {
    %c0_i32 = arith.constant 0 : i32
    %c0_i32_0 = arith.constant 0 : i32
    %c0_i32_1 = arith.constant 0 : i32
    %c0_i32_2 = arith.constant 0 : i32
    return %arg1, %c0_i32, %c0_i32_0, %c0_i32_1 : i32, i32, i32, i32
  }
  func.func @transform_1(%arg0: i32, %arg1: i32) -> (i32, i32, i32) {
    %c0_i32 = arith.constant 0 : i32
    %c0_i32_0 = arith.constant 0 : i32
    %c0_i32_1 = arith.constant 0 : i32
    return %c0_i32, %c0_i32_0, %arg0 : i32, i32, i32
  }
  func.func @transform_2(%arg0: i32, %arg1: i32) -> (i32, i32, i32) {
    %c0_i32 = arith.constant 0 : i32
    %c0_i32_0 = arith.constant 0 : i32
    return %arg1, %c0_i32, %arg0 : i32, i32, i32
  }
  func.func @transform_3(%arg0: i32, %arg1: i32) -> (i32, i32) {
    %c0_i32 = arith.constant 0 : i32
    %c0_i32_0 = arith.constant 0 : i32
    return %c0_i32, %arg0 : i32, i32
  }
  func.func @transform_4(%arg0: i32, %arg1: i32) -> (i32, i32) {
    %c0_i32 = arith.constant 0 : i32
    %c0_i32_0 = arith.constant 0 : i32
    return %c0_i32, %arg0 : i32, i32
  }
}

module attributes {stable_mosaic.version = 11 : i64} {
  func.func @bn_relu_kernel(%arg0: i32, %arg1: i32, %arg2: memref<1x256x128xbf16, #tpu.memory_space<vmem>>, %arg3: memref<1x128xf32, #tpu.memory_space<vmem>>, %arg4: memref<1x128xf32, #tpu.memory_space<vmem>>, %arg5: memref<1x256x128xf32, #tpu.memory_space<vmem>>) attributes {dimension_semantics = [#tpu.dimension_semantics<parallel>, #tpu.dimension_semantics<parallel>], iteration_bounds = array<i64: 1, 2>, scalar_prefetch = 0 : i64, scratch_operands = 0 : i64, tpu.core_type = #tpu.core_type<tc>, window_params = [{transform_indices = @transform_0, window_bounds = array<i64: 1, 256, 128>}, {transform_indices = @transform_1, window_bounds = array<i64: 1, 128>}, {transform_indices = @transform_2, window_bounds = array<i64: 1, 128>}, {transform_indices = @transform_3, window_bounds = array<i64: 1, 256, 128>}]} {
    %c0 = arith.constant 0 : index
    %c0_0 = arith.constant 0 : index
    %c0_1 = arith.constant 0 : index
    %0 = vector.load %arg2[%c0, %c0_0, %c0_1] : memref<1x256x128xbf16, #tpu.memory_space<vmem>>, vector<1x256x128xbf16>
    %1 = arith.extf %0 : vector<1x256x128xbf16> to vector<1x256x128xf32>
    %c0_2 = arith.constant 0 : index
    %c0_3 = arith.constant 0 : index
    %2 = vector.load %arg3[%c0_2, %c0_3] : memref<1x128xf32, #tpu.memory_space<vmem>>, vector<1x128xf32>
    %3 = vector.shape_cast %2 : vector<1x128xf32> to vector<1x1x128xf32>
    %4 = vector.broadcast %3 : vector<1x1x128xf32> to vector<1x256x128xf32>
    %5 = arith.mulf %1, %4 : vector<1x256x128xf32>
    %c0_4 = arith.constant 0 : index
    %c0_5 = arith.constant 0 : index
    %6 = vector.load %arg4[%c0_4, %c0_5] : memref<1x128xf32, #tpu.memory_space<vmem>>, vector<1x128xf32>
    %7 = vector.shape_cast %6 : vector<1x128xf32> to vector<1x1x128xf32>
    %8 = vector.broadcast %7 : vector<1x1x128xf32> to vector<1x256x128xf32>
    %9 = arith.addf %5, %8 : vector<1x256x128xf32>
    %cst = arith.constant 0.000000e+00 : f32
    %10 = vector.broadcast %cst : f32 to vector<1x256x128xf32>
    %11 = arith.maximumf %9, %10 : vector<1x256x128xf32>
    %c0_6 = arith.constant 0 : index
    %c0_7 = arith.constant 0 : index
    %c0_8 = arith.constant 0 : index
    %12 = vector.load %arg5[%c0_6, %c0_7, %c0_8] : memref<1x256x128xf32, #tpu.memory_space<vmem>>, vector<1x256x128xf32>
    tpu.vector_store %arg5[%c0_6, %c0_7, %c0_8], %11 {strides = array<i32>} : memref<1x256x128xf32, #tpu.memory_space<vmem>>, vector<1x256x128xf32>,
    return
  }
  func.func @transform_0(%arg0: i32, %arg1: i32) -> (i32, i32, i32) {
    %c0_i32 = arith.constant 0 : i32
    %c0_i32_0 = arith.constant 0 : i32
    return %arg1, %c0_i32, %arg0 : i32, i32, i32
  }
  func.func @transform_1(%arg0: i32, %arg1: i32) -> (i32, i32) {
    %c0_i32 = arith.constant 0 : i32
    %c0_i32_0 = arith.constant 0 : i32
    return %c0_i32, %arg0 : i32, i32
  }
  func.func @transform_2(%arg0: i32, %arg1: i32) -> (i32, i32) {
    %c0_i32 = arith.constant 0 : i32
    %c0_i32_0 = arith.constant 0 : i32
    return %c0_i32, %arg0 : i32, i32
  }
  func.func @transform_3(%arg0: i32, %arg1: i32) -> (i32, i32, i32) {
    %c0_i32 = arith.constant 0 : i32
    %c0_i32_0 = arith.constant 0 : i32
    return %arg1, %c0_i32, %arg0 : i32, i32, i32
  }
}

</mosaic_0001>

<bundles_post_ra>
// kernel: conv_bn_relu.3
= control target key start
LH: loop header
LB: loop body
LE: loop exit
PB: predicated region body
PF: predicated region fallthrough
CT: control target
= control target key end

     0   :  { %s708_s12 = smov 0   ;;  %s710_s13 = smov 0   ;;  %s871_s0 = inlined_call_operand.vmem [shape: bf16[2,256,128], index: 0, kind: input, shape index: {}]   ;;  %s872_s1 = inlined_call_operand.vmem [shape: f32[1,128], index: 1, kind: input, shape index: {}]   ;;  %s873_s2 = inlined_call_operand.vmem [shape: f32[1,128], index: 2, kind: input, shape index: {}]   ;;  %s874_s3 = inlined_call_operand.vmem [shape: f32[2,256,128], index: 3, kind: output, shape index: {}]  }
   0x1   :  { %s712_s14 = smov 0  }
   0x2 LB: > { %s22_s15 = sadd.s32 1, %s682_s13  ;;  %p550_p0 = scmp.ge.s32.totalorder %s686_s14, 1  ;;  %s686_s14 = sphi %s712_s14, %s13_s14   ;;  %s682_s13 = sphi %s710_s13, %s876_s13   ;;  %s678_s12 = sphi %s708_s12, %s875_s12  }
   0x3   : > { %p23_p1 = scmp.ge.s32.totalorder %s22_s15, 2  ;;  %p172_p2 = scmp.lt.s32.totalorder %s686_s14, 3 }
   0x5   : > { %s878_s15 = smov (%p23_p1, %s22_s15), 0  ;;  %p173_p3 = pnand %p550_p0, %p172_p2 }
   0x6   : > { %p208_p4 = scmp.lt.s32.totalorder (!%p173_p3), %s678_s12, 1 }
   0x7   : > { %176 = sbr.rel (%p173_p3) target bundleno = 52 (0x34), region = 32 }
   0xc   : > { %s880_s12 = smov (!%p208_p4, %s678_s12), 1  ;;  %v737_v0 = vld [vmem:[%s872_s1] ss:$0 sm:$0xff] }
   0xd   : > { %s559_s16 = sshll.u32 %s880_s12, 7  ;;  %v746_v9 = vld [vmem:[%s873_s2] ss:$0 sm:$0xff]  ;;  %s560_s24 = sshll.u32 %s880_s12, 8 }
   0xe   : > { %s732_s19 = scalar_lea.vmem %s871_s0, %s559_s16  ;;  %s764_s27 = scalar_lea.vmem %s874_s3, %s560_s24 }
   0xf   : > { %v562_v1 = vld [vmem:[%s732_s19] sm:$0xff]   ;;  %v625_v2 = vld [vmem:[%s732_s19 + $0x8] sm:$0xff]   ;;  %v626_v3 = vld [vmem:[%s732_s19 + $0x10] sm:$0xff]  }
  0x10   : > { %v563_v4 = vunpack.c.l.bf16 %v562_v1  ;;  %v564_v5 = vunpack.c.h.bf16 %v562_v1  ;;  %v567_v6 = vunpack.c.l.bf16 %v625_v2  ;;  %v568_v7 = vunpack.c.h.bf16 %v625_v2  ;;  %v627_v8 = vld [vmem:[%s732_s19 + $0x18] sm:$0xff]   ;;  %v628_v30 = vld [vmem:[%s732_s19 + $0x20] sm:$0xff]   ;;  %v629_v31 = vld [vmem:[%s732_s19 + $0x28] sm:$0xff]  }
  0x11   : > { %v571_v10 = vunpack.c.l.bf16 %v626_v3  ;;  %v572_v11 = vunpack.c.h.bf16 %v626_v3  ;;  %v575_v12 = vunpack.c.l.bf16 %v627_v8  ;;  %v576_v13 = vunpack.c.h.bf16 %v627_v8  ;;  %v630_v36 = vld [vmem:[%s732_s19 + $0x30] sm:$0xff]   ;;  %v631_v37 = vld [vmem:[%s732_s19 + $0x38] sm:$0xff]   ;;  %v632_v3 = vld [vmem:[%s732_s19 + $0x40] sm:$0xff]  }
  0x12   : > { %v301_v14 = vmul.f32 %v563_v4, %v737_v0  ;;  %v302_v15 = vmul.f32 %v564_v5, %v737_v0  ;;  %v303_v16 = vmul.f32 %v567_v6, %v737_v0  ;;  %v304_v17 = vmul.f32 %v568_v7, %v737_v0  ;;  %v633_v4 = vld [vmem:[%s732_s19 + $0x48] sm:$0xff]  }
  0x13   : > { %v305_v18 = vmul.f32 %v571_v10, %v737_v0  ;;  %v306_v19 = vmul.f32 %v572_v11, %v737_v0  ;;  %v307_v20 = vmul.f32 %v575_v12, %v737_v0  ;;  %v308_v21 = vmul.f32 %v576_v13, %v737_v0  ;;  %v634_v10 = vld [vmem:[%s732_s19 + $0x50] sm:$0xff]   ;;  %v635_v11 = vld [vmem:[%s732_s19 + $0x58] sm:$0xff]  }
  0x14   : > { %v340_v22 = vadd.f32 %v746_v9, %v301_v14  ;;  %v341_v23 = vadd.f32 %v746_v9, %v302_v15  ;;  %v342_v24 = vadd.f32 %v746_v9, %v303_v16  ;;  %v343_v25 = vadd.f32 %v746_v9, %v304_v17 }
  0x15   : > { %v344_v26 = vadd.f32 %v746_v9, %v305_v18  ;;  %v345_v27 = vadd.f32 %v746_v9, %v306_v19  ;;  %v346_v28 = vadd.f32 %v746_v9, %v307_v20  ;;  %v347_v29 = vadd.f32 %v746_v9, %v308_v21 }
  0x16   : > { %v372_v32 = vmax.f32 %v340_v22, 0.0  ;;  %v373_v33 = vmax.f32 %v341_v23, 0.0  ;;  %v374_v34 = vmax.f32 %v342_v24, 0.0  ;;  %v375_v35 = vmax.f32 %v343_v25, 0.0 }
  0x17   : > { %v376_v38 = vmax.f32 %v344_v26, 0.0  ;;  %v377_v39 = vmax.f32 %v345_v27, 0.0  ;;  %v378_v40 = vmax.f32 %v346_v28, 0.0  ;;  %v379_v41 = vmax.f32 %v347_v29, 0.0 }
  0x18   : > { %404 = vst [vmem:[%s764_s27] sm:$0xff] %v372_v32  ;;  %405 = vst [vmem:[%s764_s27 + $0x8] sm:$0xff] %v373_v33  ;;  %v579_v42 = vunpack.c.l.bf16 %v628_v30  ;;  %v580_v43 = vunpack.c.h.bf16 %v628_v30  ;;  %v583_v44 = vunpack.c.l.bf16 %v629_v31  ;;  %v584_v45 = vunpack.c.h.bf16 %v629_v31 }
  0x19   : > { %406 = vst [vmem:[%s764_s27 + $0x10] sm:$0xff] %v374_v34  ;;  %407 = vst [vmem:[%s764_s27 + $0x18] sm:$0xff] %v375_v35  ;;  %v587_v46 = vunpack.c.l.bf16 %v630_v36  ;;  %v588_v47 = vunpack.c.h.bf16 %v630_v36  ;;  %v591_v48 = vunpack.c.l.bf16 %v631_v37  ;;  %v592_v49 = vunpack.c.h.bf16 %v631_v37 }
  0x1a   : > { %408 = vst [vmem:[%s764_s27 + $0x20] sm:$0xff] %v376_v38  ;;  %409 = vst [vmem:[%s764_s27 + $0x28] sm:$0xff] %v377_v39  ;;  %v309_v50 = vmul.f32 %v579_v42, %v737_v0  ;;  %v310_v51 = vmul.f32 %v580_v43, %v737_v0  ;;  %v311_v52 = vmul.f32 %v583_v44, %v737_v0  ;;  %v595_v16 = vunpack.c.l.bf16 %v632_v3 }
  0x1b   : > { %410 = vst [vmem:[%s764_s27 + $0x30] sm:$0xff] %v378_v40  ;;  %411 = vst [vmem:[%s764_s27 + $0x38] sm:$0xff] %v379_v41  ;;  %v312_v53 = vmul.f32 %v584_v45, %v737_v0  ;;  %v313_v54 = vmul.f32 %v587_v46, %v737_v0  ;;  %v314_v55 = vmul.f32 %v588_v47, %v737_v0  ;;  %v596_v17 = vunpack.c.h.bf16 %v632_v3  ;;  %v636_v40 = vld [vmem:[%s732_s19 + $0x60] sm:$0xff]   ;;  %v637_v41 = vld [vmem:[%s732_s19 + $0x68] sm:$0xff]  }
  0x1c   : > { %v315_v56 = vmul.f32 %v591_v48, %v737_v0  ;;  %v316_v57 = vmul.f32 %v592_v49, %v737_v0  ;;  %v348_v58 = vadd.f32 %v746_v9, %v309_v50  ;;  %v349_v59 = vadd.f32 %v746_v9, %v310_v51  ;;  %v638_v46 = vld [vmem:[%s732_s19 + $0x70] sm:$0xff]   ;;  %v639_v47 = vld [vmem:[%s732_s19 + $0x78] sm:$0xff]  }
  0x1d   : > { %v350_v60 = vadd.f32 %v746_v9, %v311_v52  ;;  %v351_v61 = vadd.f32 %v746_v9, %v312_v53  ;;  %v352_v62 = vadd.f32 %v746_v9, %v313_v54  ;;  %v353_v63 = vadd.f32 %v746_v9, %v314_v55 }
  0x1e   : > { %v354_v1 = vadd.f32 %v746_v9, %v315_v56  ;;  %v355_v2 = vadd.f32 %v746_v9, %v316_v57  ;;  %v380_v5 = vmax.f32 %v348_v58, 0.0  ;;  %v381_v6 = vmax.f32 %v349_v59, 0.0 }
  0x1f   : > { %v382_v7 = vmax.f32 %v350_v60, 0.0  ;;  %v383_v8 = vmax.f32 %v351_v61, 0.0  ;;  %v384_v12 = vmax.f32 %v352_v62, 0.0  ;;  %v385_v13 = vmax.f32 %v353_v63, 0.0 }
  0x20   : > { %v386_v14 = vmax.f32 %v354_v1, 0.0  ;;  %v387_v15 = vmax.f32 %v355_v2, 0.0  ;;  %412 = vst [vmem:[%s764_s27 + $0x40] sm:$0xff] %v380_v5  ;;  %413 = vst [vmem:[%s764_s27 + $0x48] sm:$0xff] %v381_v6  ;;  %v599_v18 = vunpack.c.l.bf16 %v633_v4  ;;  %v600_v19 = vunpack.c.h.bf16 %v633_v4 }
  0x21   : > { %414 = vst [vmem:[%s764_s27 + $0x50] sm:$0xff] %v382_v7  ;;  %415 = vst [vmem:[%s764_s27 + $0x58] sm:$0xff] %v383_v8  ;;  %v603_v20 = vunpack.c.l.bf16 %v634_v10  ;;  %v604_v21 = vunpack.c.h.bf16 %v634_v10  ;;  %v607_v22 = vunpack.c.l.bf16 %v635_v11  ;;  %v608_v23 = vunpack.c.h.bf16 %v635_v11 }
  0x22   : > { %416 = vst [vmem:[%s764_s27 + $0x60] sm:$0xff] %v384_v12  ;;  %417 = vst [vmem:[%s764_s27 + $0x68] sm:$0xff] %v385_v13  ;;  %v317_v24 = vmul.f32 %v595_v16, %v737_v0  ;;  %v318_v25 = vmul.f32 %v596_v17, %v737_v0  ;;  %v319_v26 = vmul.f32 %v599_v18, %v737_v0  ;;  %v611_v52 = vunpack.c.l.bf16 %v636_v40 }
  0x23   : > { %418 = vst [vmem:[%s764_s27 + $0x70] sm:$0xff] %v386_v14  ;;  %419 = vst [vmem:[%s764_s27 + $0x78] sm:$0xff] %v387_v15  ;;  %v320_v27 = vmul.f32 %v600_v19, %v737_v0  ;;  %v321_v28 = vmul.f32 %v603_v20, %v737_v0  ;;  %v322_v29 = vmul.f32 %v604_v21, %v737_v0  ;;  %v612_v53 = vunpack.c.h.bf16 %v636_v40 }
  0x24   : > { %v323_v30 = vmul.f32 %v607_v22, %v737_v0  ;;  %v324_v31 = vmul.f32 %v608_v23, %v737_v0  ;;  %v356_v32 = vadd.f32 %v746_v9, %v317_v24  ;;  %v357_v33 = vadd.f32 %v746_v9, %v318_v25 }
  0x25   : > { %v358_v34 = vadd.f32 %v746_v9, %v319_v26  ;;  %v359_v35 = vadd.f32 %v746_v9, %v320_v27  ;;  %v360_v36 = vadd.f32 %v746_v9, %v321_v28  ;;  %v361_v37 = vadd.f32 %v746_v9, %v322_v29 }
  0x26   : > { %v362_v38 = vadd.f32 %v746_v9, %v323_v30  ;;  %v363_v39 = vadd.f32 %v746_v9, %v324_v31  ;;  %v388_v42 = vmax.f32 %v356_v32, 0.0  ;;  %v389_v43 = vmax.f32 %v357_v33, 0.0 }
  0x27   : > { %v390_v44 = vmax.f32 %v358_v34, 0.0  ;;  %v391_v45 = vmax.f32 %v359_v35, 0.0  ;;  %v392_v48 = vmax.f32 %v360_v36, 0.0  ;;  %v393_v49 = vmax.f32 %v361_v37, 0.0 }
  0x28   : > { %v394_v50 = vmax.f32 %v362_v38, 0.0  ;;  %v395_v51 = vmax.f32 %v363_v39, 0.0  ;;  %420 = vst [vmem:[%s764_s27 + $0x80] sm:$0xff] %v388_v42  ;;  %421 = vst [vmem:[%s764_s27 + $0x88] sm:$0xff] %v389_v43  ;;  %v615_v54 = vunpack.c.l.bf16 %v637_v41  ;;  %v616_v55 = vunpack.c.h.bf16 %v637_v41 }
  0x29   : > { %422 = vst [vmem:[%s764_s27 + $0x90] sm:$0xff] %v390_v44  ;;  %423 = vst [vmem:[%s764_s27 + $0x98] sm:$0xff] %v391_v45  ;;  %v619_v56 = vunpack.c.l.bf16 %v638_v46  ;;  %v620_v57 = vunpack.c.h.bf16 %v638_v46  ;;  %v623_v58 = vunpack.c.l.bf16 %v639_v47  ;;  %v624_v59 = vunpack.c.h.bf16 %v639_v47 }
  0x2a   : > { %424 = vst [vmem:[%s764_s27 + $0xa0] sm:$0xff] %v392_v48  ;;  %425 = vst [vmem:[%s764_s27 + $0xa8] sm:$0xff] %v393_v49  ;;  %v325_v60 = vmul.f32 %v611_v52, %v737_v0  ;;  %v326_v61 = vmul.f32 %v612_v53, %v737_v0  ;;  %v327_v62 = vmul.f32 %v615_v54, %v737_v0 }
  0x2b   : > { %426 = vst [vmem:[%s764_s27 + $0xb0] sm:$0xff] %v394_v50  ;;  %427 = vst [vmem:[%s764_s27 + $0xb8] sm:$0xff] %v395_v51  ;;  %v328_v63 = vmul.f32 %v616_v55, %v737_v0  ;;  %v329_v1 = vmul.f32 %v619_v56, %v737_v0  ;;  %v330_v2 = vmul.f32 %v620_v57, %v737_v0 }
  0x2c   : > { %v331_v3 = vmul.f32 %v623_v58, %v737_v0  ;;  %v332_v4 = vmul.f32 %v624_v59, %v737_v0  ;;  %v364_v5 = vadd.f32 %v746_v9, %v325_v60  ;;  %v365_v6 = vadd.f32 %v746_v9, %v326_v61 }
  0x2d   : > { %v366_v7 = vadd.f32 %v746_v9, %v327_v62  ;;  %v367_v8 = vadd.f32 %v746_v9, %v328_v63  ;;  %v368_v10 = vadd.f32 %v746_v9, %v329_v1  ;;  %v369_v11 = vadd.f32 %v746_v9, %v330_v2 }
  0x2e   : > { %v370_v0 = vadd.f32 %v746_v9, %v331_v3  ;;  %v371_v12 = vadd.f32 %v746_v9, %v332_v4  ;;  %v396_v13 = vmax.f32 %v364_v5, 0.0  ;;  %v397_v14 = vmax.f32 %v365_v6, 0.0 }
  0x2f   : > { %v398_v15 = vmax.f32 %v366_v7, 0.0  ;;  %v399_v16 = vmax.f32 %v367_v8, 0.0  ;;  %v400_v17 = vmax.f32 %v368_v10, 0.0  ;;  %v401_v18 = vmax.f32 %v369_v11, 0.0 }
  0x30   : > { %v402_v19 = vmax.f32 %v370_v0, 0.0  ;;  %v403_v20 = vmax.f32 %v371_v12, 0.0  ;;  %428 = vst [vmem:[%s764_s27 + $0xc0] sm:$0xff] %v396_v13  ;;  %429 = vst [vmem:[%s764_s27 + $0xc8] sm:$0xff] %v397_v14 }
  0x31   : > { %430 = vst [vmem:[%s764_s27 + $0xd0] sm:$0xff] %v398_v15  ;;  %431 = vst [vmem:[%s764_s27 + $0xd8] sm:$0xff] %v399_v16 }
  0x32   : > { %432 = vst [vmem:[%s764_s27 + $0xe0] sm:$0xff] %v400_v17  ;;  %433 = vst [vmem:[%s764_s27 + $0xe8] sm:$0xff] %v401_v18 }
  0x33   : > { %434 = vst [vmem:[%s764_s27 + $0xf0] sm:$0xff] %v402_v19  ;;  %435 = vst [vmem:[%s764_s27 + $0xf8] sm:$0xff] %v403_v20 }
  0x34 PF: > { %s13_s14 = sadd.s32 1, %s686_s14   ;;  %s875_s12 = smov %s682_s13 }
  0x35   : > { %p10_p5 = scmp.ge.s32.totalorder %s13_s14, 4   ;;  %s876_s13 = smov %s878_s15 }
  0x37   :  { %12 = sbr.rel (!%p10_p5) target bundleno = 2 (0x2), region = 68 }

// kernel: conv_bn_relu.2
= control target key start
LH: loop header
LB: loop body
LE: loop exit
PB: predicated region body
PF: predicated region fallthrough
CT: control target
= control target key end

     0   :  { %s7107_s15 = smov 0   ;;  %s7109_s16 = smov 0   ;;  %s9798_s0 = inlined_call_operand.vmem [shape: bf16[2,18,18,128], index: 0, kind: input, shape index: {}]   ;;  %s9799_s1 = inlined_call_operand.vmem [shape: bf16[9,128,128], index: 1, kind: input, shape index: {}]   ;;  %s9800_s2 = inlined_call_operand.vmem [shape: bf16[2,256,128], index: 2, kind: output, shape index: {0}]   ;;  %s9801_s3 = inlined_call_operand.vmem [shape: f32[1,128], index: 3, kind: output, shape index: {1}]   ;;  %s9802_s4 = inlined_call_operand.vmem [shape: f32[1,128], index: 4, kind: output, shape index: {2}]  }
   0x1   :  { %s7111_s17 = smov 0  }
   0x2 LB: > { %s24_s18 = sadd.s32 1, %s7076_s16  ;;  %p5486_p0 = scmp.ge.s32.totalorder %s7080_s17, 1  ;;  %s7080_s17 = sphi %s7111_s17, %s15_s17   ;;  %s7076_s16 = sphi %s7109_s16, %s10023_s16   ;;  %s7072_s15 = sphi %s7107_s15, %s10022_s15  }
   0x3   : > { %p25_p1 = scmp.ge.s32.totalorder %s24_s18, 2  ;;  %p190_p2 = scmp.lt.s32.totalorder %s7080_s17, 3 }
   0x5   : > { %s10025_s18 = smov (%p25_p1, %s24_s18), 0  ;;  %p191_p3 = pnand %p5486_p0, %p190_p2 }
   0x7   : > { %194 = sbr.rel (%p191_p3) target bundleno = 587 (0x24b), region = 28 }
   0xc   : > { %v6929_v0 = vld [vmem:[%s9799_s1 + $0x78] sm:$0xff]   ;;  %p229_p4 = scmp.lt.s32.totalorder %s7072_s15, 1  ;;  %v6930_v1 = vld [vmem:[%s9799_s1 + $0x70] sm:$0xff]   ;;  %v6931_v2 = vld [vmem:[%s9799_s1 + $0x68] sm:$0xff]   ;;  %vm317_vm0 = vsmask.f32 3328 }
   0xd   : > { %6456 = vmatprep.subr.bf16.mxu0 %v6929_v0  ;;  %6888 = vmatprep.subr.bf16.mxu1 %v6929_v0  ;;  %v6932_v3 = vld [vmem:[%s9799_s1 + $0x60] sm:$0xff]   ;;  %vm318_vm1 = vsmask.f32 7440  ;;  %v6933_v17 = vld [vmem:[%s9799_s1 + $0x58] sm:$0xff]   ;;  %v6934_v33 = vld [vmem:[%s9799_s1 + $0x50] sm:$0xff]   ;;  %vm1347_vm3 = vcmask 1042432  }
   0xe   : > { %s7135_s23 = scalar_select %p229_p4, %s7072_s15, 1  ;;  %6457 = vmatpush3.bf16.msra.mxu0 %v6929_v0  ;;  %6896 = vmatpush3.bf16.msra.mxu1 %v6929_v0  ;;  %vm7175_vm2 = vmor %vm317_vm0, %vm318_vm1  ;;  %v6935_v58 = vld [vmem:[%s9799_s1 + $0x48] sm:$0xff]   ;;  %vm1348_vm4 = vcmask 1046532  }
   0xf   : > { %6458 = vmatprep.subr.bf16.mxu0 %v6930_v1  ;;  %6889 = vmatprep.subr.bf16.mxu1 %v6930_v1  ;;  %vm7486_vm5 = vmor %vm1347_vm3, %vm1348_vm4  ;;  %p6106_p5 = scmp.ne.s32.totalorder %s7072_s15, 0 }
  0x10   : > { %s6904_s26 = smul.u32 216, %s7135_s23 }
  0x12   : > { %s7144_s29 = scalar_lea.vmem %s9798_s0, %s6904_s26  ;;  %6459 = vmatpush3.bf16.msra.mxu0 %v6930_v1  ;;  %6897 = vmatpush3.bf16.msra.mxu1 %v6930_v1 }
  0x13   : > { %6460 = vmatprep.subr.bf16.mxu0 %v6931_v2  ;;  %6890 = vmatprep.subr.bf16.mxu1 %v6931_v2  ;;  %v7150_v4 = vld [vmem:[%s7144_s29] sm:$0xf]  ;;  %v7153_v5 = vld [vmem:[%s7144_s29 + $0x4] sm:$0xf]  ;;  %v7156_v6 = vld [vmem:[%s7144_s29 + $0x8] sm:$0x1] }
  0x14   : > { %v321_v7 = vshrl.u32 %v7150_v4, 16  ;;  %v324_v8 = vshll.u32 %v7150_v4, 16  ;;  %v330_v9 = vshll.u32 %v7153_v5, 16  ;;  %v334_v10 = vshrl.u32 %v7153_v5, 16  ;;  %v269_v12 = vld [vmem:[%s7144_s29 + $0x60] sm:$0xf] }
  0x15   : > { %v340_v11 = vshll.u32 %v7156_v6, 16  ;;  %v270_v15 = vld [vmem:[%s7144_s29 + $0x64] sm:$0xf]  ;;  %v309_v16 = vld [vmem:[%s7144_s29 + $0x68] sm:$0x1]  ;;  %v513_v21 = vshrl.u32 %v269_v12, 16 }
  0x16   : > { %6461 = vmatpush3.bf16.msra.mxu0 %v6931_v2  ;;  %6898 = vmatpush3.bf16.msra.mxu1 %v6931_v2  ;;  %v323_v13 = vrot.slane %v321_v7, 4  ;;  %v326_v14 = vrot.slane %v324_v8, 5  ;;  %v332_v18 = vrot.slane %v330_v9, 5  ;;  %v336_v19 = vrot.slane %v334_v10, 4  ;;  %v7171_v26 = vld [vmem:[%s7144_s29 + $0xc] sm:$0xf] }
  0x17   : > { %6462 = vmatprep.subr.bf16.mxu0 %v6932_v3  ;;  %6891 = vmatprep.subr.bf16.mxu1 %v6932_v3  ;;  %v516_v23 = vshll.u32 %v269_v12, 16  ;;  %v522_v24 = vshll.u32 %v270_v15, 16  ;;  %v526_v25 = vshrl.u32 %v270_v15, 16  ;;  %v342_v29 = vrot.slane %v340_v11, 5  ;;  %v7180_v32 = vld [vmem:[%s7144_s29 + $0x10] sm:$0xf] }
  0x18   : > { %v327_v22 = vor.u32 %v326_v14, %v323_v13  ;;  %v337_v28 = vor.u32 %v336_v19, %v332_v18  ;;  %v515_v30 = vrot.slane %v513_v21, 4  ;;  %v532_v31 = vshll.u32 %v309_v16, 16  ;;  %v7186_v40 = vld [vmem:[%s7144_s29 + $0x14] sm:$0x1]  ;;  %v271_v47 = vld [vmem:[%s7144_s29 + $0x6c] sm:$0xf] }
  0x19   : > { %v518_v35 = vrot.slane %v516_v23, 5  ;;  %v524_v36 = vrot.slane %v522_v24, 5  ;;  %v528_v37 = vrot.slane %v526_v25, 4  ;;  %v345_v41 = vshrl.u32 %v7171_v26, 16  ;;  %v272_v52 = vld [vmem:[%s7144_s29 + $0x70] sm:$0xf] }
  0x1a   : > { %6463 = vmatpush3.bf16.msra.mxu0 %v6932_v3  ;;  %6899 = vmatpush3.bf16.msra.mxu1 %v6932_v3  ;;  %v328_v34 = vrot.slane %v327_v22, 4  ;;  %v338_v38 = vrot.slane %v337_v28, 4  ;;  %v534_v39 = vrot.slane %v532_v31, 5  ;;  %v348_v42 = vshll.u32 %v7171_v26, 16  ;;  %v310_v57 = vld [vmem:[%s7144_s29 + $0x74] sm:$0x1] }
  0x1b   : > { %6464 = vmatprep.subr.bf16.mxu0 %v6933_v17  ;;  %6892 = vmatprep.subr.bf16.mxu1 %v6933_v17  ;;  %v519_v44 = vor.u32 %v518_v35, %v515_v30  ;;  %v529_v45 = vor.u32 %v528_v37, %v524_v36  ;;  %v354_v46 = vshll.u32 %v7180_v32, 16  ;;  %v347_v49 = vrot.slane %v345_v41, 4  ;;  %v7209_v14 = vld [vmem:[%s7144_s29 + $0x18] sm:$0xf]  ;;  %v6936_v15 = vld [vmem:[%s9799_s1 + $0x40] sm:$0xff]  }
  0x1c   : > { %v333_v43 = vsel %vm7175_vm2, %v328_v34, %v332_v18  ;;  %v343_v48 = vsel %vm7175_vm2, %v338_v38, %v342_v29  ;;  %v350_v50 = vrot.slane %v348_v42, 5  ;;  %v358_v51 = vshrl.u32 %v7180_v32, 16  ;;  %v7217_v19 = vld [vmem:[%s7144_s29 + $0x1c] sm:$0xf]  ;;  %v7222_v25 = vld [vmem:[%s7144_s29 + $0x20] sm:$0x1] }
  0x1d   : > { %v5506_v53 = vcombine.low %v333_v43, %v343_v48  ;;  %v520_v54 = vrot.slane %v519_v44, 4  ;;  %v530_v55 = vrot.slane %v529_v45, 4  ;;  %v356_v56 = vrot.slane %v354_v46, 5  ;;  %v273_v34 = vld [vmem:[%s7144_s29 + $0x78] sm:$0xf] }
  0x1e   : > { %6465 = vmatpush3.bf16.msra.mxu0 %v6933_v17  ;;  %6900 = vmatpush3.bf16.msra.mxu1 %v6933_v17  ;;  %v351_v59 = vor.u32 %v350_v50, %v347_v49  ;;  %v360_v60 = vrot.slane %v358_v51, 4  ;;  %v364_v61 = vshll.u32 %v7186_v40, 16  ;;  %v537_v1 = vshrl.u32 %v271_v47, 16  ;;  %v6937_v41 = vld [vmem:[%s9799_s1 + $0x38] sm:$0xff]   ;;  %v311_v49 = vld [vmem:[%s7144_s29 + $0x80] sm:$0x1] }
  0x1f   : > { %6466 = vmatprep.subr.bf16.mxu0 %v6934_v33  ;;  %6893 = vmatprep.subr.bf16.mxu1 %v6934_v33  ;;  %v525_v63 = vsel %vm7175_vm2, %v520_v54, %v524_v36  ;;  %v535_v0 = vsel %vm7175_vm2, %v530_v55, %v534_v39  ;;  %v540_v2 = vshll.u32 %v271_v47, 16  ;;  %v546_v12 = vshll.u32 %v272_v52, 16  ;;  %v7231_v39 = vld [vmem:[%s7144_s29 + $0x7c] sm:$0xf] }
  0x20   : > { %6472 = vmatprep.mubr.bf16.mxu0 %v5506_v53  ;;  %v5514_v3 = vcombine.low %v525_v63, %v535_v0  ;;  %v352_v7 = vrot.slane %v351_v59, 4  ;;  %v361_v8 = vor.u32 %v360_v60, %v356_v56  ;;  %v366_v9 = vrot.slane %v364_v61, 5  ;;  %v6938_v42 = vld [vmem:[%s9799_s1 + $0xb8] sm:$0xff]   ;;  %v6940_v59 = vld [vmem:[%s9799_s1 + $0xb0] sm:$0xff]   ;;  %v7258_v0 = vld [vmem:[%s7144_s29 + $0x28] sm:$0xf] }
  0x21   : > { %v539_v10 = vrot.slane %v537_v1, 4  ;;  %v542_v11 = vrot.slane %v540_v2, 5  ;;  %v550_v13 = vshrl.u32 %v272_v52, 16  ;;  %v556_v18 = vshll.u32 %v310_v57, 16  ;;  %v6939_v52 = vld [vmem:[%s9799_s1 + $0x30] sm:$0xff]  }
  0x22   : > { %6467 = vmatpush3.bf16.msra.mxu0 %v6934_v33  ;;  %6901 = vmatpush3.bf16.msra.mxu1 %v6934_v33  ;;  %v357_v16 = vsel %vm7175_vm2, %v352_v7, %v356_v56  ;;  %v362_v17 = vrot.slane %v361_v8, 4  ;;  %v548_v23 = vrot.slane %v546_v12, 5  ;;  %v369_v28 = vshrl.u32 %v7209_v14, 16  ;;  %v7249_v57 = vld [vmem:[%s7144_s29 + $0x24] sm:$0xf] }
  0x23   : > { %6468 = vmatprep.subr.bf16.mxu0 %v6935_v58  ;;  %6894 = vmatprep.subr.bf16.mxu1 %v6935_v58  ;;  %v543_v22 = vor.u32 %v542_v11, %v539_v10  ;;  %v552_v24 = vrot.slane %v550_v13, 4  ;;  %v558_v30 = vrot.slane %v556_v18, 5  ;;  %v372_v31 = vshll.u32 %v7209_v14, 16  ;;  %v7261_v8 = vld [vmem:[%s7144_s29 + $0x2c] sm:$0x1] }
  0x24   : > { %6488 = vmatprep.mubr.bf16.mxu1 %v5514_v3  ;;  %v367_v29 = vsel %vm7175_vm2, %v362_v17, %v366_v9  ;;  %v378_v33 = vshll.u32 %v7217_v19, 16  ;;  %v371_v38 = vrot.slane %v369_v28, 4  ;;  %v382_v45 = vshrl.u32 %v7217_v19, 16  ;;  %v7265_v13 = vld [vmem:[%s7144_s29 + $0x84] sm:$0xf] }
  0x25   : > { %v5507_v35 = vcombine.low %v357_v16, %v367_v29  ;;  %v544_v36 = vrot.slane %v543_v22, 4  ;;  %v553_v37 = vor.u32 %v552_v24, %v548_v23  ;;  %v374_v43 = vrot.slane %v372_v31, 5  ;;  %v7272_v22 = vld [vmem:[%s7144_s29 + $0x88] sm:$0xf] }
  0x26   : > { %6469 = vmatpush3.bf16.msra.mxu0 %v6935_v58  ;;  %6902 = vmatpush3.bf16.msra.mxu1 %v6935_v58  ;;  %v380_v44 = vrot.slane %v378_v33, 5  ;;  %v388_v46 = vshll.u32 %v7222_v25, 16  ;;  %v561_v50 = vshrl.u32 %v273_v34, 16  ;;  %v564_v51 = vshll.u32 %v273_v34, 16 }
  0x27   : > { %6470 = vmatprep.subr.bf16.mxu0 %v6936_v15  ;;  %6895 = vmatprep.subr.bf16.mxu1 %v6936_v15  ;;  %v549_v47 = vsel %vm7175_vm2, %v544_v36, %v548_v23  ;;  %v554_v48 = vrot.slane %v553_v37, 4  ;;  %v375_v53 = vor.u32 %v374_v43, %v371_v38  ;;  %v384_v54 = vrot.slane %v382_v45, 4  ;;  %v7281_v36 = vld [vmem:[%s7144_s29 + $0x8c] sm:$0x1] }
  0x28   : > { %v390_v55 = vrot.slane %v388_v46, 5  ;;  %v570_v56 = vshll.u32 %v7231_v39, 16  ;;  %v563_v60 = vrot.slane %v561_v50, 4  ;;  %v566_v61 = vrot.slane %v564_v51, 5  ;;  %v6942_v37 = vld [vmem:[%s9799_s1 + $0xa8] sm:$0xff]  }
  0x29   : > { %v559_v58 = vsel %vm7175_vm2, %v554_v48, %v558_v30  ;;  %v574_v63 = vshrl.u32 %v7231_v39, 16  ;;  %v376_v2 = vrot.slane %v375_v53, 4  ;;  %v385_v3 = vor.u32 %v384_v54, %v380_v44  ;;  %v6941_v30 = vld [vmem:[%s9799_s1 + $0x28] sm:$0xff]   ;;  %v7296_v53 = vld [vmem:[%s7144_s29 + $0x30] sm:$0xf] }
  0x2a   : > { %6471 = vmatpush3.bf16.msra.mxu0 %v6936_v15  ;;  %6903 = vmatpush3.bf16.msra.mxu1 %v6936_v15  ;;  %v5515_v1 = vcombine.low %v549_v47, %v559_v58  ;;  %v572_v7 = vrot.slane %v570_v56, 5  ;;  %v567_v9 = vor.u32 %v566_v61, %v563_v60  ;;  %v580_v11 = vshll.u32 %v311_v49, 16  ;;  %v7305_v60 = vld [vmem:[%s7144_s29 + $0x34] sm:$0xf] }
  0x2b   : > { %6504 = vmatprep.subr.bf16.mxu1 %v6937_v41  ;;  %6552 = vmatprep.subr.bf16.mxu0 %v6938_v42  ;;  %v576_v10 = vrot.slane %v574_v63, 4  ;;  %v393_v12 = vshrl.u32 %v7249_v57, 16  ;;  %v381_v15 = vsel %vm7175_vm2, %v376_v2, %v380_v44  ;;  %v386_v16 = vrot.slane %v385_v3, 4 }
  0x2c   : > { %v396_v17 = vshll.u32 %v7249_v57, 16  ;;  %v402_v18 = vshll.u32 %v7258_v0, 16  ;;  %v568_v23 = vrot.slane %v567_v9, 4  ;;  %v582_v28 = vrot.slane %v580_v11, 5 }
  0x2d   : > { %6473 = vmatmul.mubr.bf16.vlgmr.msra.gmra.mxu0 %v5507_v35  ;;  %6489 = vmatmul.mubr.bf16.vlgmr.msra.gmra.mxu1 %v5515_v1  ;;  %v577_v24 = vor.u32 %v576_v10, %v572_v7  ;;  %v395_v29 = vrot.slane %v393_v12, 4  ;;  %v391_v31 = vsel %vm7175_vm2, %v386_v16, %v390_v55  ;;  %v406_v35 = vshrl.u32 %v7258_v0, 16  ;;  %v7313_v16 = vld [vmem:[%s7144_s29 + $0x38] sm:$0x1] }
  0x2e   : > { %6505 = vmatpush3.bf16.msra.mxu1 %v6937_v41  ;;  %6553 = vmatpush3.bf16.msra.mxu0 %v6938_v42  ;;  %v398_v33 = vrot.slane %v396_v17, 5  ;;  %v404_v34 = vrot.slane %v402_v18, 5  ;;  %v5508_v38 = vcombine.low %v381_v15, %v391_v31  ;;  %v573_v41 = vsel %vm7175_vm2, %v568_v23, %v572_v7  ;;  %v7317_v18 = vld [vmem:[%s7144_s29 + $0x90] sm:$0xf]  ;;  %v7323_v31 = vld [vmem:[%s7144_s29 + $0x94] sm:$0xf] }
  0x2f   : > { %6506 = vmatprep.subr.bf16.mxu1 %v6939_v52  ;;  %6554 = vmatprep.subr.bf16.mxu0 %v6940_v59  ;;  %v578_v42 = vrot.slane %v577_v24, 4  ;;  %v412_v43 = vshll.u32 %v7261_v8, 16  ;;  %v408_v45 = vrot.slane %v406_v35, 4  ;;  %v585_v46 = vshrl.u32 %v7265_v13, 16 }
  0x30   : > { %v399_v44 = vor.u32 %v398_v33, %v395_v29  ;;  %v588_v47 = vshll.u32 %v7265_v13, 16  ;;  %v594_v50 = vshll.u32 %v7272_v22, 16  ;;  %v598_v51 = vshrl.u32 %v7272_v22, 16  ;;  %6476 = vmatprep.mubr.bf16.mxu0 %v5508_v38  ;;  %v6946_v38 = vld [vmem:[%s9799_s1 + $0x98] sm:$0xff]  }
  0x31   : > { %v583_v48 = vsel %vm7175_vm2, %v578_v42, %v582_v28  ;;  %v414_v49 = vrot.slane %v412_v43, 5  ;;  %v409_v56 = vor.u32 %v408_v45, %v404_v34  ;;  %v587_v58 = vrot.slane %v585_v46, 4  ;;  %v6947_v46 = vld [vmem:[%s9799_s1 + $0x10] sm:$0xff]  }
  0x32   : > { %6507 = vmatpush3.bf16.msra.mxu1 %v6939_v52  ;;  %6555 = vmatpush3.bf16.msra.mxu0 %v6940_v59  ;;  %v5516_v54 = vcombine.low %v573_v41, %v583_v48  ;;  %v400_v55 = vrot.slane %v399_v44, 4  ;;  %v6943_v52 = vld [vmem:[%s9799_s1 + $0x20] sm:$0xff]   ;;  %v590_v61 = vrot.slane %v588_v47, 5  ;;  %v596_v63 = vrot.slane %v594_v50, 5  ;;  %v7333_v44 = vld [vmem:[%s7144_s29 + $0x98] sm:$0x1] }
  0x33   : > { %6508 = vmatprep.subr.bf16.mxu1 %v6941_v30  ;;  %v6944_v59 = vld [vmem:[%s9799_s1 + $0xa0] sm:$0xff]   ;;  %v600_v1 = vrot.slane %v598_v51, 4  ;;  %v604_v2 = vshll.u32 %v7281_v36, 16  ;;  %6556 = vmatprep.subr.bf16.mxu0 %v6942_v37  ;;  %v410_v7 = vrot.slane %v409_v56, 4  ;;  %v417_v9 = vshrl.u32 %v7296_v53, 16 }
  0x34   : > { %6492 = vmatprep.mubr.bf16.mxu1 %v5516_v54  ;;  %v405_v3 = vsel %vm7175_vm2, %v400_v55, %v404_v34  ;;  %v420_v10 = vshll.u32 %v7296_v53, 16  ;;  %v591_v11 = vor.u32 %v590_v61, %v587_v58  ;;  %v426_v17 = vshll.u32 %v7305_v60, 16  ;;  %v7346_v51 = vld [vmem:[%s7144_s29 + $0x3c] sm:$0xf]  ;;  %v7349_v54 = vld [vmem:[%s7144_s29 + $0x40] sm:$0xf] }
  0x35   : > { %v601_v12 = vor.u32 %v600_v1, %v596_v63  ;;  %v606_v15 = vrot.slane %v604_v2, 5  ;;  %v415_v23 = vsel %vm7175_vm2, %v410_v7, %v414_v49  ;;  %v419_v24 = vrot.slane %v417_v9, 4  ;;  %v6948_v55 = vld [vmem:[%s9799_s1 + $0x90] sm:$0xff]   ;;  %v7356_v7 = vld [vmem:[%s7144_s29 + $0x44] sm:$0x1] }
  0x36   : > { %6509 = vmatpush3.bf16.msra.mxu1 %v6941_v30  ;;  %6557 = vmatpush3.bf16.msra.mxu0 %v6942_v37  ;;  %v422_v28 = vrot.slane %v420_v10, 5  ;;  %v430_v29 = vshrl.u32 %v7305_v60, 16  ;;  %v6945_v30 = vld [vmem:[%s9799_s1 + $0x18] sm:$0xff]   ;;  %v5509_v33 = vcombine.low %v405_v3, %v415_v23  ;;  %v592_v34 = vrot.slane %v591_v11, 4 }
  0x37   : > { %6510 = vmatprep.subr.bf16.mxu1 %v6943_v52  ;;  %6558 = vmatprep.subr.bf16.mxu0 %v6944_v59  ;;  %v602_v35 = vrot.slane %v601_v12, 4  ;;  %v428_v37 = vrot.slane %v426_v17, 5  ;;  %v436_v43 = vshll.u32 %v7313_v16, 16  ;;  %v609_v45 = vshrl.u32 %v7317_v18, 16  ;;  %v7359_v9 = vld [vmem:[%s7144_s29 + $0x9c] sm:$0xf] }
  0x38   : > { %v423_v41 = vor.u32 %v422_v28, %v419_v24  ;;  %v432_v42 = vrot.slane %v430_v29, 4  ;;  %6477 = vmatmul.mubr.bf16.gmra.mxu0 %v5509_v33  ;;  %v597_v47 = vsel %vm7175_vm2, %v592_v34, %v596_v63  ;;  %v612_v49 = vshll.u32 %v7317_v18, 16  ;;  %v7368_v28 = vld [vmem:[%s7144_s29 + $0xa0] sm:$0xf]  ;;  %v6949_v29 = vld [vmem:[%s9799_s1 + $0x8] sm:$0xff]  }
  0x39   : > { %v607_v48 = vsel %vm7175_vm2, %v602_v35, %v606_v15  ;;  %v618_v50 = vshll.u32 %v7323_v31, 16  ;;  %v438_v63 = vrot.slane %v436_v43, 5  ;;  %v622_v3 = vshrl.u32 %v7323_v31, 16 }
  0x3a   : > { %6511 = vmatpush3.bf16.msra.mxu1 %v6943_v52  ;;  %v5517_v56 = vcombine.low %v597_v47, %v607_v48  ;;  %6559 = vmatpush3.bf16.msra.mxu0 %v6944_v59  ;;  %v424_v58 = vrot.slane %v423_v41, 4  ;;  %v433_v61 = vor.u32 %v432_v42, %v428_v37  ;;  %v611_v52 = vrot.slane %v609_v45, 4  ;;  %v6950_v41 = vld [vmem:[%s9799_s1 + $0x88] sm:$0xff]  }
  0x3b   : > { %6512 = vmatprep.subr.bf16.mxu1 %v6945_v30  ;;  %v614_v1 = vrot.slane %v612_v49, 5  ;;  %v620_v2 = vrot.slane %v618_v50, 5  ;;  %6560 = vmatprep.subr.bf16.mxu0 %v6946_v38  ;;  %v628_v11 = vshll.u32 %v7333_v44, 16  ;;  %v441_v12 = vshrl.u32 %v7346_v51, 16 }
  0x3c   : > { %6493 = vmatmul.mubr.bf16.gmra.mxu1 %v5517_v56  ;;  %v429_v10 = vsel %vm7175_vm2, %v424_v58, %v428_v37  ;;  %v434_v59 = vrot.slane %v433_v61, 4  ;;  %v624_v17 = vrot.slane %v622_v3, 4  ;;  %v444_v23 = vshll.u32 %v7346_v51, 16  ;;  %v7384_v61 = vld [vmem:[%s7144_s29 + $0xa4] sm:$0x1] }
  0x3d   : > { %v615_v15 = vor.u32 %v614_v1, %v611_v52  ;;  %v450_v24 = vshll.u32 %v7349_v54, 16  ;;  %v630_v34 = vrot.slane %v628_v11, 5  ;;  %v443_v35 = vrot.slane %v441_v12, 4 }
  0x3e   : > { %6513 = vmatpush3.bf16.msra.mxu1 %v6945_v30  ;;  %v439_v33 = vsel %vm7175_vm2, %v434_v59, %v438_v63  ;;  %v454_v37 = vshrl.u32 %v7349_v54, 16  ;;  %6561 = vmatpush3.bf16.msra.mxu0 %v6946_v38  ;;  %v625_v43 = vor.u32 %v624_v17, %v620_v2  ;;  %v446_v45 = vrot.slane %v444_v23, 5  ;;  %v7389_v59 = vld [vmem:[%s7144_s29 + $0x48] sm:$0xf]  ;;  %v7398_v17 = vld [vmem:[%s7144_s29 + $0x4c] sm:$0xf] }
  0x3f   : > { %6514 = vmatprep.subr.bf16.mxu1 %v6947_v46  ;;  %v5510_v42 = vcombine.low %v429_v10, %v439_v33  ;;  %v616_v30 = vrot.slane %v615_v15, 4  ;;  %6562 = vmatprep.subr.bf16.mxu0 %v6948_v55  ;;  %v452_v47 = vrot.slane %v450_v24, 5  ;;  %v460_v49 = vshll.u32 %v7356_v7, 16 }
  0x40   : > { %v456_v48 = vrot.slane %v454_v37, 4  ;;  %v633_v50 = vshrl.u32 %v7359_v9, 16  ;;  %v626_v56 = vrot.slane %v625_v43, 4  ;;  %v447_v58 = vor.u32 %v446_v45, %v443_v35 }
  0x41   : > { %6480 = vmatprep.mubr.bf16.mxu0 %v5510_v42  ;;  %v621_v38 = vsel %vm7175_vm2, %v616_v30, %v620_v2  ;;  %v636_v63 = vshll.u32 %v7359_v9, 16  ;;  %v462_v1 = vrot.slane %v460_v49, 5  ;;  %v642_v10 = vshll.u32 %v7368_v28, 16  ;;  %v6951_v2 = vld [vmem:[%s9799_s1] sm:$0xff]   ;;  %v7407_v30 = vld [vmem:[%s7144_s29 + $0x50] sm:$0x1] }
  0x42   : > { %6515 = vmatpush3.bf16.msra.mxu1 %v6947_v46  ;;  %v457_v52 = vor.u32 %v456_v48, %v452_v47  ;;  %v635_v3 = vrot.slane %v633_v50, 4  ;;  %6563 = vmatpush3.bf16.msra.mxu0 %v6948_v55  ;;  %v631_v11 = vsel %vm7175_vm2, %v626_v56, %v630_v34  ;;  %v448_v12 = vrot.slane %v447_v58, 4  ;;  %v6952_v55 = vld [vmem:[%s9799_s1 + $0x80] sm:$0xff]  }
  0x43   : > { %6516 = vmatprep.subr.bf16.mxu1 %v6949_v29  ;;  %v638_v15 = vrot.slane %v636_v63, 5  ;;  %v646_v46 = vshrl.u32 %v7368_v28, 16  ;;  %6564 = vmatprep.subr.bf16.mxu0 %v6950_v41  ;;  %v5518_v23 = vcombine.low %v621_v38, %v631_v11  ;;  %v644_v33 = vrot.slane %v642_v10, 5  ;;  %v7415_v38 = vld [vmem:[%s7144_s29 + $0xa8] sm:$0xf] }
  0x44   : > { %v458_v24 = vrot.slane %v457_v52, 4  ;;  %v652_v35 = vshll.u32 %v7384_v61, 16  ;;  %v453_v34 = vsel %vm7175_vm2, %v448_v12, %v452_v47  ;;  %v465_v43 = vshrl.u32 %v7389_v59, 16  ;;  %9829 = vst [vmem:[#allocation2_spill] sm:$0xff] %v7415_v38  ;;  %v7420_v47 = vld [vmem:[%s9799_s1 + $0xf8] sm:$0xff]  }
  0x45   : > { %v639_v37 = vor.u32 %v638_v15, %v635_v3  ;;  %v648_v42 = vrot.slane %v646_v46, 4  ;;  %6496 = vmatprep.mubr.bf16.mxu1 %v5518_v23  ;;  %v468_v49 = vshll.u32 %v7389_v59, 16  ;;  %v474_v50 = vshll.u32 %v7398_v17, 16  ;;  %v7423_v52 = vld [vmem:[%s7144_s29 + $0xac] sm:$0xf] }
  0x46   : > { %6517 = vmatpush3.bf16.msra.mxu1 %v6949_v29  ;;  %v463_v45 = vsel %vm7175_vm2, %v458_v24, %v462_v1  ;;  %v654_v48 = vrot.slane %v652_v35, 5  ;;  %6565 = vmatpush3.bf16.msra.mxu0 %v6950_v41  ;;  %v467_v63 = vrot.slane %v465_v43, 4  ;;  %v7428_v1 = vld [vmem:[%s9799_s1 + $0x138] sm:$0xff]   ;;  %v478_v10 = vshrl.u32 %v7398_v17, 16  ;;  %v7433_v12 = vld [vmem:[%s7144_s29 + $0xb0] sm:$0x1] }
  0x47   : > { %v5511_v29 = vcombine.low %v453_v34, %v463_v45  ;;  %v640_v56 = vrot.slane %v639_v37, 4  ;;  %v649_v58 = vor.u32 %v648_v42, %v644_v33  ;;  %6518 = vmatprep.subr.bf16.mxu1 %v6951_v2  ;;  %6566 = vmatprep.subr.bf16.mxu0 %v6952_v55  ;;  %v470_v41 = vrot.slane %v468_v49, 5  ;;  %9830 = vst [vmem:[#allocation3_spill] sm:$0xff] %v7433_v12  ;;  %v7436_v15 = vld [vmem:[%s7144_s29 + $0x54] sm:$0xf] }
  0x48   : > { %v476_v3 = vrot.slane %v474_v50, 5  ;;  %v484_v11 = vshll.u32 %v7407_v30, 16  ;;  %v657_v24 = vshrl.u32 %v7415_v38, 16  ;;  %v660_v35 = vshll.u32 %v7415_v38, 16  ;;  %v7443_v34 = vld [vmem:[%s7144_s29 + $0x58] sm:$0xf] }
  0x49   : > { %6481 = vmatmul.mubr.bf16.gmra.mxu0 %v5511_v29  ;;  %v645_v46 = vsel %vm7175_vm2, %v640_v56, %v644_v33  ;;  %v650_v23 = vrot.slane %v649_v58, 4  ;;  %v471_v37 = vor.u32 %v470_v41, %v467_v63  ;;  %v480_v42 = vrot.slane %v478_v10, 4 }
  0x4a   : > { %6519 = vmatpush3.bf16.msra.mxu1 %v6951_v2  ;;  %v486_v43 = vrot.slane %v484_v11, 5  ;;  %v666_v45 = vshll.u32 %v7423_v52, 16  ;;  %6567 = vmatpush3.bf16.msra.mxu0 %v6952_v55  ;;  %v659_v49 = vrot.slane %v657_v24, 4  ;;  %v662_v50 = vrot.slane %v660_v35, 5  ;;  %v7452_v55 = vld [vmem:[%s7144_s29 + $0x5c] sm:$0x1] }
  0x4b   : > { %6600 = vmatprep.subr.bf16.mxu1 %v7420_v47  ;;  %v655_v33 = vsel %vm7175_vm2, %v650_v23, %v654_v48  ;;  %v670_v29 = vshrl.u32 %v7423_v52, 16  ;;  %6648 = vmatprep.subr.bf16.mxu0 %v7428_v1  ;;  %v472_v56 = vrot.slane %v471_v37, 4  ;;  %v481_v58 = vor.u32 %v480_v42, %v476_v3  ;;  %v7457_v48 = vld [vmem:[%s7144_s29 + $0xb4] sm:$0xf]  ;;  %v7464_v37 = vld [vmem:[%s7144_s29 + $0xb8] sm:$0xf] }
  0x4c   : > { %v5519_v2 = vcombine.low %v645_v46, %v655_v33  ;;  %v668_v63 = vrot.slane %v666_v45, 5  ;;  %v663_v41 = vor.u32 %v662_v50, %v659_v49  ;;  %v676_v11 = vshll.u32 %v7433_v12, 16  ;;  %9831 = vst [vmem:[#allocation4_spill] sm:$0xff] %v7457_v48  ;;  %9832 = vst [vmem:[#allocation5_spill] sm:$0xff] %v7464_v37 }
  0x4d   : > { %v672_v10 = vrot.slane %v670_v29, 4  ;;  %v489_v21 = vshrl.u32 %v7436_v15, 16  ;;  %v477_v23 = vsel %vm7175_vm2, %v472_v56, %v476_v3  ;;  %v482_v24 = vrot.slane %v481_v58, 4  ;;  %v7470_v3 = vld [vmem:[%s7144_s29 + $0xbc] sm:$0x1] }
  0x4e   : > { %6497 = vmatmul.mubr.bf16.gmra.mxu1 %v5519_v2  ;;  %v492_v46 = vshll.u32 %v7436_v15, 16  ;;  %v498_v35 = vshll.u32 %v7443_v34, 16  ;;  %v664_v42 = vrot.slane %v663_v41, 4  ;;  %v678_v33 = vrot.slane %v676_v11, 5  ;;  %9833 = vst [vmem:[#allocation6_spill] sm:$0xff] %v7470_v3 }
  0x4f   : > { %v673_v45 = vor.u32 %v672_v10, %v668_v63  ;;  %v491_v49 = vrot.slane %v489_v21, 4  ;;  %v487_v50 = vsel %vm7175_vm2, %v482_v24, %v486_v43  ;;  %v502_v62 = vshrl.u32 %v7443_v34, 16  ;;  %v1299_v10 = vld [vmem:[%s7144_s29] sm:$0xe] }
  0x50   : > { %v494_v29 = vrot.slane %v492_v46, 5  ;;  %v500_v2 = vrot.slane %v498_v35, 5  ;;  %v5512_v56 = vcombine.low %v477_v23, %v487_v50  ;;  %v669_v58 = vsel %vm7175_vm2, %v664_v42, %v668_v63 }
  0x51   : > { %v674_v20 = vrot.slane %v673_v45, 4  ;;  %v508_v41 = vshll.u32 %v7452_v55, 16  ;;  %v504_v21 = vrot.slane %v502_v62, 4  ;;  %v681_v12 = vshrl.u32 %v7457_v48, 16 }
  0x52   : > { %v495_v11 = vor.u32 %v494_v29, %v491_v49  ;;  %v684_v43 = vshll.u32 %v7457_v48, 16  ;;  %6484 = vmatprep.mubr.bf16.mxu0 %v5512_v56  ;;  %v690_v46 = vshll.u32 %v7464_v37, 16  ;;  %v694_v63 = vshrl.u32 %v7464_v37, 16  ;;  %v1300_v49 = vld [vmem:[%s7144_s29 + $0xc] sm:$0xe] }
  0x53   : > { %v679_v24 = vsel %vm7175_vm2, %v674_v20, %v678_v33  ;;  %v510_v23 = vrot.slane %v508_v41, 5  ;;  %v505_v45 = vor.u32 %v504_v21, %v500_v2  ;;  %v683_v50 = vrot.slane %v681_v12, 4  ;;  %v1301_v20 = vld [vmem:[%s7144_s29 + $0x18] sm:$0xe] }
  0x54   : > { %v5520_v35 = vcombine.low %v669_v58, %v679_v24  ;;  %v496_v42 = vrot.slane %v495_v11, 4  ;;  %v686_v62 = vrot.slane %v684_v43, 5  ;;  %v692_v29 = vrot.slane %v690_v46, 5 }
  0x55   : > { %v696_v38 = vrot.slane %v694_v63, 4  ;;  %v700_v48 = vshll.u32 %v7470_v3, 16  ;;  %v506_v58 = vrot.slane %v505_v45, 4  ;;  %v5554_v41 = vrot.slane %v1299_v10, 9 }
  0x56   : > { %6500 = vmatprep.mubr.bf16.mxu1 %v5520_v35  ;;  %v501_v33 = vsel %vm7175_vm2, %v496_v42, %v500_v2  ;;  %v1352_v12 = vrot.slane %v7153_v5, 5  ;;  %v687_v11 = vor.u32 %v686_v62, %v683_v50  ;;  %v5555_v24 = vrot.slane %v1300_v49, 9 }
  0x57   : > { %v697_v21 = vor.u32 %v696_v38, %v692_v29  ;;  %v702_v43 = vrot.slane %v700_v48, 5  ;;  %v511_v46 = vsel %vm7175_vm2, %v506_v58, %v510_v23  ;;  %v1359_v35 = vrot.slane %v7180_v32, 5 }
  0x58   : > { %v1353_v63 = vsel %vm7486_vm5, %v5554_v41, %v1352_v12  ;;  %v1354_v3 = vrot.slane %v1352_v12, 4  ;;  %v5513_v37 = vcombine.low %v501_v33, %v511_v46  ;;  %v688_v2 = vrot.slane %v687_v11, 4  ;;  %v1303_v12 = vld [vmem:[%s7144_s29 + $0x30] sm:$0xe]  ;;  %v1305_v46 = vld [vmem:[%s7144_s29 + $0x48] sm:$0xe] }
  0x59   : > { %v698_v42 = vrot.slane %v697_v21, 4  ;;  %v5530_v10 = vcombine.low %v7150_v4, %v7153_v5  ;;  %v9836_v38 = vrot.slane %v7156_v6, 5  ;;  %v1361_v45 = vrot.slane %v1359_v35, 4 }
  0x5a   : > { %v5556_v23 = vrot.slane %v1301_v20, 9  ;;  %6485 = vmatmul.mubr.bf16.gmra.mxu0 %v5513_v37  ;;  %v693_v50 = vsel %vm7175_vm2, %v688_v2, %v692_v29  ;;  %v1366_v33 = vrot.slane %v7217_v19, 5  ;;  %v1360_v4 = vsel %vm7486_vm5, %v5555_v24, %v1359_v35  ;;  %v1304_v24 = vld [vmem:[%s7144_s29 + $0x3c] sm:$0xe] }
  0x5b   : > { %v1356_v48 = vsel %vm7486_vm5, %v1354_v3, %v9836_v38  ;;  %v703_v49 = vsel %vm7175_vm2, %v698_v42, %v702_v43  ;;  %v9837_v5 = vrot.slane %v7186_v40, 5  ;;  %v1369_v37 = vrot.slane %v7222_v25, 5  ;;  %v1302_v3 = vld [vmem:[%s7144_s29 + $0x24] sm:$0xe]  ;;  %v6960_v25 = vld [vmem:[%s9799_s1 + $0x130] sm:$0xff]  }
  0x5c   : > { %v5586_v62 = vcombine.low %v1353_v63, %v1356_v48  ;;  %v5521_v58 = vcombine.low %v693_v50, %v703_v49  ;;  %v1367_v29 = vsel %vm7486_vm5, %v5556_v23, %v1366_v33  ;;  %v1368_v20 = vrot.slane %v1366_v33, 4  ;;  %v6959_v23 = vld [vmem:[%s9799_s1 + $0xf0] sm:$0xff]  }
  0x5d   : > { %v1363_v6 = vsel %vm7486_vm5, %v1361_v45, %v9837_v5  ;;  %v1373_v41 = vrot.slane %v7258_v0, 5  ;;  %v5557_v21 = vrot.slane %v1302_v3, 9  ;;  %v1380_v43 = vrot.slane %v7305_v60, 5  ;;  %v7561_v3 = vld [vmem:[%s7144_s29 + $0x68] sm:$0x1] }
  0x5e   : > { %6568 = vmatprep.mubr.bf16.mxu0 %v5586_v62  ;;  %6501 = vmatmul.mubr.bf16.gmra.mxu1 %v5521_v58  ;;  %v5587_v11 = vcombine.low %v1360_v4, %v1363_v6  ;;  %v1370_v40 = vsel %vm7486_vm5, %v1368_v20, %v1369_v37  ;;  %v1376_v2 = vrot.slane %v7261_v8, 5  ;;  %v5558_v42 = vrot.slane %v1303_v12, 9  ;;  %v1306_v37 = vld [vmem:[%s7144_s29 + $0x54] sm:$0xe]  ;;  %v7585_v12 = vld [vmem:[%s7144_s29 + $0x60] sm:$0xe] }
  0x5f   : > { %6520 = vmatprep.mubr.bf16.mxu1 %v5530_v10  ;;  %v5588_v63 = vcombine.low %v1367_v29, %v1370_v40  ;;  %v1375_v35 = vrot.slane %v1373_v41, 4  ;;  %v1382_v38 = vrot.slane %v1380_v43, 4  ;;  %v1383_v10 = vrot.slane %v7313_v16, 5 }
  0x60   : > { %v1387_v48 = vrot.slane %v7349_v54, 5  ;;  %v5532_v45 = vcombine.low %v7209_v14, %v7217_v19  ;;  %v1394_v50 = vrot.slane %v7398_v17, 5  ;;  %v5559_v49 = vrot.slane %v1304_v24, 9  ;;  %v6968_v24 = vld [vmem:[%s9799_s1 + $0x120] sm:$0xff]  }
  0x61   : > { %v1390_v8 = vrot.slane %v7356_v7, 5  ;;  %v5560_v33 = vrot.slane %v1305_v46, 9  ;;  %v1374_v14 = vsel %vm7486_vm5, %v5557_v21, %v1373_v41  ;;  %v1377_v19 = vsel %vm7486_vm5, %v1375_v35, %v1376_v2  ;;  %v7597_v46 = vld [vmem:[%s7144_s29 + $0x78] sm:$0xe]  ;;  %v6967_v2 = vld [vmem:[%s9799_s1 + $0xe0] sm:$0xff]  }
  0x62   : > { %6569 = vmatmul.mubr.bf16.vlgmr.msra.gmra.mxu0 %v5587_v11  ;;  %v1389_v62 = vrot.slane %v1387_v48, 4  ;;  %v1396_v16 = vrot.slane %v1394_v50, 4  ;;  %v1397_v58 = vrot.slane %v7407_v30, 5  ;;  %v1381_v4 = vsel %vm7486_vm5, %v5558_v42, %v1380_v43  ;;  %v7588_v11 = vld [vmem:[%s7144_s29 + $0x6c] sm:$0xe] }
  0x63   : > { %6649 = vmatpush3.bf16.msra.mxu0 %v7428_v1  ;;  %6572 = vmatprep.mubr.bf16.mxu0 %v5588_v63  ;;  %v1384_v7 = vsel %vm7486_vm5, %v1382_v38, %v1383_v10  ;;  %v6964_v1 = vld [vmem:[%s9799_s1 + $0x128] sm:$0xff]   ;;  %v1401_v5 = vrot.slane %v7443_v34, 5  ;;  %v9838_v6 = vcombine.low %v7171_v26, %v7180_v32  ;;  %v5533_v30 = vcombine.low %v7249_v57, %v7258_v0  ;;  %v1310_v63 = vld [vmem:[%s7144_s29 + $0x84] sm:$0xe]  ;;  %v1311_v42 = vld [vmem:[%s7144_s29 + $0x90] sm:$0xe] }
  0x64   : > { %6650 = vmatprep.subr.bf16.mxu0 %v6960_v25  ;;  %v1411_v29 = vrot.slane %v7561_v3, 5  ;;  %v5589_v20 = vcombine.low %v1374_v14, %v1377_v19  ;;  %v7567_v41 = vsel %vm7486_vm5, %v5559_v49, %v1387_v48  ;;  %v7571_v26 = vsel %vm7486_vm5, %v1389_v62, %v1390_v8  ;;  %v6963_v32 = vld [vmem:[%s9799_s1 + $0xe8] sm:$0xff]   ;;  %v7616_v48 = vld [vmem:[%s7144_s29 + $0x64] sm:$0xf]  ;;  %v1312_v49 = vld [vmem:[%s7144_s29 + $0x9c] sm:$0xe] }
  0x65   : > { %v5590_v57 = vcombine.low %v1381_v4, %v1384_v7  ;;  %v7578_v0 = vsel %vm7486_vm5, %v5560_v33, %v1394_v50  ;;  %v5534_v40 = vcombine.low %v7296_v53, %v7305_v60  ;;  %v5561_v21 = vrot.slane %v1306_v37, 9  ;;  %v7638_v4 = vld [vmem:[%s7144_s29 + $0x74] sm:$0x1] }
  0x66   : > { %6521 = vmatmul.mubr.bf16.vlgmr.msra.gmra.mxu1 %v9838_v6  ;;  %v1404_v43 = vrot.slane %v7452_v55, 5  ;;  %v5535_v35 = vcombine.low %v7346_v51, %v7349_v54  ;;  %v5591_v53 = vcombine.low %v7567_v41, %v7571_v26  ;;  %v5536_v60 = vcombine.low %v7389_v59, %v7398_v17  ;;  %v7053_v54 = vld [vmem:[%s7144_s29 + $0x80] sm:$0x1] }
  0x67   : > { %6601 = vmatpush3.bf16.msra.mxu1 %v7420_v47  ;;  %6524 = vmatprep.mubr.bf16.mxu1 %v5532_v45  ;;  %v7582_v47 = vsel %vm7486_vm5, %v1396_v16, %v1397_v58  ;;  %v5537_v55 = vcombine.low %v7436_v15, %v7443_v34  ;;  %v5562_v10 = vrot.slane %v7585_v12, 9  ;;  %v1408_v45 = vrot.slane %v7616_v48, 5  ;;  %v7634_v16 = vld [vmem:[%s7144_s29 + $0x70] sm:$0xf]  ;;  %v7054_v17 = vld [vmem:[%s7144_s29 + $0x60] sm:$0xf] }
  0x68   : > { %6602 = vmatprep.subr.bf16.mxu1 %v6959_v23  ;;  %6651 = vmatpush3.bf16.msra.mxu0 %v6960_v25  ;;  %v1403_v25 = vrot.slane %v1401_v5, 4  ;;  %v5592_v38 = vcombine.low %v7578_v0, %v7582_v47  ;;  %v5563_v62 = vrot.slane %v7588_v11, 9  ;;  %v1429_v8 = vrot.slane %v7272_v22, 5  ;;  %v1313_v0 = vld [vmem:[%s7144_s29 + $0xa8] sm:$0xe]  ;;  %v7818_v15 = vld [vmem:[%s9799_s1 + $0x1b8] sm:$0xff]  }
  0x69   : > { %6652 = vmatprep.subr.bf16.mxu0 %v6964_v1  ;;  %v1432_v33 = vrot.slane %v7281_v36, 5  ;;  %v7627_v14 = vsel %vm7486_vm5, %v5561_v21, %v1401_v5  ;;  %v1415_v58 = vrot.slane %v7634_v16, 5  ;;  %v1418_v7 = vrot.slane %v7638_v4, 5  ;;  %v6971_v36 = vld [vmem:[%s9799_s1 + $0xd8] sm:$0xff]  }
  0x6a   : > { %6573 = vmatmul.mubr.bf16.gmra.mxu0 %v5589_v20  ;;  %v7631_v19 = vsel %vm7486_vm5, %v1403_v25, %v1404_v43  ;;  %v5564_v5 = vrot.slane %v7597_v46, 9  ;;  %v1431_v37 = vrot.slane %v1429_v8, 4  ;;  %v5566_v41 = vrot.slane %v1311_v42, 9  ;;  %v5682_v42 = vld [vmem:[%s7144_s29 + $0xc] sm:$0xf] }
  0x6b   : > { %6603 = vmatpush3.bf16.msra.mxu1 %v6959_v23  ;;  %6576 = vmatprep.mubr.bf16.mxu0 %v5590_v57  ;;  %v5565_v23 = vrot.slane %v1310_v63, 9  ;;  %v1436_v26 = vrot.slane %v7323_v31, 5  ;;  %v1439_v57 = vrot.slane %v7333_v44, 5  ;;  %v1422_v47 = vrot.slane %v7231_v39, 5 }
  0x6c   : > { %6604 = vmatprep.subr.bf16.mxu1 %v6963_v32  ;;  %6653 = vmatpush3.bf16.msra.mxu0 %v6964_v1  ;;  %v6972_v1 = vld [vmem:[%s9799_s1 + $0x118] sm:$0xff]   ;;  %v7662_v21 = vsel %vm7486_vm5, %v1431_v37, %v1432_v33  ;;  %v1443_v63 = vrot.slane %v7368_v28, 5  ;;  %v5568_v33 = vrot.slane %v1313_v0, 9  ;;  %v1450_v37 = vrot.slane %v7423_v52, 5  ;;  %v6975_v0 = vld [vmem:[%s9799_s1 + $0xd0] sm:$0xff]  }
  0x6d   : > { %6654 = vmatprep.subr.bf16.mxu0 %v6968_v24  ;;  %v7650_v6 = vsel %vm7486_vm5, %v5565_v23, %v1429_v8  ;;  %v7670_v44 = vsel %vm7486_vm5, %v5566_v41, %v1436_v26  ;;  %v1438_v43 = vrot.slane %v1436_v26, 4  ;;  %v6976_v23 = vld [vmem:[%s9799_s1 + $0x110] sm:$0xff]   ;;  %v1446_v8 = vrot.slane %v7384_v61, 5  ;;  %v9840_v61 = vld [vmem:[#allocation3_spill] sm:$0xff] }
  0x6e   : > { %6525 = vmatmul.mubr.bf16.gmra.mxu1 %v5533_v30  ;;  %v1410_v30 = vrot.slane %v1408_v45, 4  ;;  %v1445_v20 = vrot.slane %v1443_v63, 4  ;;  %v1453_v50 = vrot.slane %v9840_v61, 5  ;;  %v1409_v61 = vsel %vm7486_vm5, %v5562_v10, %v1408_v45  ;;  %v5685_v45 = vld [vmem:[%s7144_s29 + $0x18] sm:$0xf] }
  0x6f   : > { %6528 = vmatprep.mubr.bf16.mxu1 %v5534_v40  ;;  %6605 = vmatpush3.bf16.msra.mxu1 %v6963_v32  ;;  %v5567_v40 = vrot.slane %v1312_v49, 9  ;;  %v7682_v32 = vld [vmem:[%s7144_s29 + $0x10] sm:$0xf]  ;;  %v7686_v41 = vsel %vm7486_vm5, %v1438_v43, %v1439_v57  ;;  %v1452_v57 = vrot.slane %v1450_v37, 4  ;;  %v2220_v12 = vshrl.u32 %v5682_v42, 16 }
  0x70   : > { %6606 = vmatprep.subr.bf16.mxu1 %v6967_v2  ;;  %6655 = vmatpush3.bf16.msra.mxu0 %v6968_v24  ;;  %v9839_v24 = vld [vmem:[#allocation2_spill] sm:$0xff]  ;;  %v9842_v43 = vld [vmem:[#allocation4_spill] sm:$0xff]  ;;  %v2223_v10 = vshll.u32 %v5682_v42, 16  ;;  %v1417_v51 = vrot.slane %v1415_v58, 4  ;;  %v2229_v59 = vshll.u32 %v7682_v32, 16  ;;  %v1423_v4 = vsel %vm7486_vm5, %v5564_v5, %v1422_v47 }
  0x71   : > { %6656 = vmatprep.subr.bf16.mxu0 %v6972_v1  ;;  %v7690_v26 = vsel %vm7486_vm5, %v5567_v40, %v1443_v63  ;;  %v9841_v40 = vld [vmem:[#allocation5_spill] sm:$0xff]  ;;  %v7756_v42 = vld [vmem:[%s7144_s29 + $0x14] sm:$0x1]  ;;  %v2222_v63 = vrot.slane %v2220_v12, 4  ;;  %v9844_v5 = vld [vmem:[#allocation6_spill] sm:$0xff] }
  0x72   : > { %6577 = vmatmul.mubr.bf16.gmra.mxu0 %v5591_v53  ;;  %v2225_v49 = vrot.slane %v2223_v10, 5  ;;  %v5688_v53 = vld [vmem:[%s7144_s29 + $0x24] sm:$0xf]  ;;  %v1419_v11 = vsel %vm7486_vm5, %v1417_v51, %v1418_v7 }
  0x73   : > { %6607 = vmatpush3.bf16.msra.mxu1 %v6967_v2  ;;  %6580 = vmatprep.mubr.bf16.mxu0 %v5592_v38  ;;  %v7700_v2 = vsel %vm7486_vm5, %v5568_v33, %v1450_v37  ;;  %v5593_v38 = vcombine.low %v7627_v14, %v7631_v19  ;;  %v1412_v33 = vsel %vm7486_vm5, %v1410_v30, %v1411_v29  ;;  %v6980_v14 = vld [vmem:[%s9799_s1 + $0x108] sm:$0xff]   ;;  %v6984_v30 = vld [vmem:[%s9799_s1 + $0x100] sm:$0xff]   ;;  %v7775_v19 = vrot.slane %v2229_v59, 5 }
  0x74   : > { %6608 = vmatprep.subr.bf16.mxu1 %v6971_v36  ;;  %6657 = vmatpush3.bf16.msra.mxu0 %v6972_v1  ;;  %v7718_v37 = vsel %vm7486_vm5, %v1445_v20, %v1446_v8  ;;  %v7730_v29 = vsel %vm7486_vm5, %v1452_v57, %v1453_v50  ;;  %v6979_v50 = vld [vmem:[%s9799_s1 + $0xc8] sm:$0xff]   ;;  %v7745_v1 = vld [vmem:[%s7144_s29 + $0xb4] sm:$0xe]  ;;  %v5594_v20 = vcombine.low %v1409_v61, %v1412_v33  ;;  %v2233_v8 = vshrl.u32 %v7682_v32, 16  ;;  %v7773_v61 = vld [vmem:[%s7144_s29 + $0x1c] sm:$0xf] }
  0x75   : > { %6658 = vmatprep.subr.bf16.mxu0 %v6976_v23  ;;  %v7760_v57 = vld [vmem:[%s7144_s29 + $0x6c] sm:$0xf]  ;;  %v2244_v33 = vshrl.u32 %v5685_v45, 16  ;;  %v2253_v51 = vshll.u32 %v7773_v61, 16  ;;  %v2257_v39 = vshrl.u32 %v7773_v61, 16  ;;  %v2268_v59 = vshrl.u32 %v5688_v53, 16 }
  0x76   : > { %6529 = vmatmul.mubr.bf16.gmra.mxu1 %v5535_v35  ;;  %v1425_v35 = vrot.slane %v7053_v54, 5  ;;  %v5539_v54 = vcombine.low %v7760_v57, %v7634_v16  ;;  %v2235_v3 = vrot.slane %v2233_v8, 4  ;;  %v2271_v46 = vshll.u32 %v5688_v53, 16  ;;  %v7057_v8 = vld [vmem:[%s7144_s29 + $0x7c] sm:$0xf] }
  0x77   : > { %6532 = vmatprep.mubr.bf16.mxu1 %v5536_v60  ;;  %6609 = vmatpush3.bf16.msra.mxu1 %v6971_v36  ;;  %v5538_v60 = vcombine.low %v7054_v17, %v7616_v48  ;;  %v1424_v36 = vrot.slane %v1422_v47, 4  ;;  %v7770_v48 = vsel %vm7486_vm5, %v5563_v62, %v1415_v58  ;;  %v2247_v17 = vshll.u32 %v5685_v45, 16  ;;  %v6983_v58 = vld [vmem:[%s9799_s1 + $0xc0] sm:$0xff]   ;;  %v7800_v45 = vld [vmem:[%s7144_s29 + $0x28] sm:$0xf] }
  0x78   : > { %6610 = vmatprep.subr.bf16.mxu1 %v6975_v0  ;;  %6659 = vmatpush3.bf16.msra.mxu0 %v6976_v23  ;;  %v9812_v62 = vrot.slane %v9841_v40, 5  ;;  %v7787_v23 = vld [vmem:[%s7144_s29 + $0x20] sm:$0x1]  ;;  %v2246_v12 = vrot.slane %v2244_v33, 4  ;;  %9843 = vst [vmem:[#allocation2_spill] sm:$0xff] %v7800_v45  ;;  %v5595_v34 = vcombine.low %v7770_v48, %v1419_v11  ;;  %v2277_v53 = vshll.u32 %v7800_v45, 16 }
  0x79   : > { %6660 = vmatprep.subr.bf16.mxu0 %v6980_v14  ;;  %v2249_v10 = vrot.slane %v2247_v17, 5  ;;  %v1426_v7 = vsel %vm7486_vm5, %v1424_v36, %v1425_v35  ;;  %v2226_v35 = vor.u32 %v2225_v49, %v2222_v63  ;;  %v7813_v36 = vld [vmem:[%s9799_s1 + $0x178] sm:$0xff]   ;;  %v5691_v63 = vld [vmem:[%s7144_s29 + $0x30] sm:$0xf]  ;;  %v7834_v48 = vld [vmem:[%s7144_s29 + $0x34] sm:$0xf] }
  0x7a   : > { %6581 = vmatmul.mubr.bf16.gmra.mxu0 %v5593_v38  ;;  %v2239_v38 = vshll.u32 %v7756_v42, 16  ;;  %v5596_v17 = vcombine.low %v1423_v4, %v1426_v7  ;;  %9846 = vst [vmem:[#allocation5_spill] sm:$0xff] %v7834_v48  ;;  %v7836_v11 = vrot.slane %v2253_v51, 5  ;;  %v2273_v47 = vrot.slane %v2271_v46, 5  ;;  %v7855_v46 = vld [vmem:[%s7144_s29 + $0x40] sm:$0xf] }
  0x7b   : > { %6611 = vmatpush3.bf16.msra.mxu1 %v6975_v0  ;;  %6584 = vmatprep.mubr.bf16.mxu0 %v5594_v20  ;;  %v2236_v20 = vor.u32 %v2235_v3, %v7775_v19  ;;  %v2250_v49 = vor.u32 %v2249_v10, %v2246_v12  ;;  %v7056_v3 = vld [vmem:[%s7144_s29 + $0x78] sm:$0xf]  ;;  %v2259_v12 = vrot.slane %v2257_v39, 4  ;;  %v2270_v10 = vrot.slane %v2268_v59, 4  ;;  %9847 = vst [vmem:[#allocation4_spill] sm:$0xff] %v7855_v46 }
  0x7c   : > { %6612 = vmatprep.subr.bf16.mxu1 %v6979_v50  ;;  %6661 = vmatpush3.bf16.msra.mxu0 %v6980_v14  ;;  %v2263_v14 = vshll.u32 %v7787_v23, 16  ;;  %v5540_v33 = vcombine.low %v7056_v3, %v7057_v8  ;;  %v7827_v25 = vrot.slane %v2239_v38, 5  ;;  %v7839_v0 = vld [vmem:[%s7144_s29 + $0x38] sm:$0x1]  ;;  %v7841_v4 = vrot.slane %v2226_v35, 4 }
  0x7d   : > { %6662 = vmatprep.subr.bf16.mxu0 %v6984_v30  ;;  %v7843_v7 = vrot.slane %v2236_v20, 4  ;;  %v2292_v3 = vshrl.u32 %v5691_v63, 16  ;;  %v5694_v8 = vld [vmem:[%s7144_s29 + $0x3c] sm:$0xf]  ;;  %v7851_v51 = vrot.slane %v2277_v53, 5  ;;  %v2295_v39 = vshll.u32 %v5691_v63, 16 }
  0x7e   : > { %6533 = vmatmul.mubr.bf16.gmra.mxu1 %v5537_v55  ;;  %v1459_v55 = vrot.slane %v9812_v62, 4  ;;  %v7845_v38 = vrot.slane %v2263_v14, 5  ;;  %v2301_v59 = vshll.u32 %v7834_v48, 16  ;;  %v2305_v20 = vshrl.u32 %v7834_v48, 16 }
  0x7f   : > { %6536 = vmatprep.mubr.bf16.mxu1 %v5538_v60  ;;  %6613 = vmatpush3.bf16.msra.mxu1 %v6979_v50  ;;  %v7830_v60 = vld [vmem:[%s7144_s29 + $0x2c] sm:$0x1]  ;;  %v2281_v50 = vshrl.u32 %v7800_v45, 16  ;;  %v2260_v14 = vor.u32 %v2259_v12, %v7836_v11  ;;  %v2294_v53 = vrot.slane %v2292_v3, 4  ;;  %v2297_v63 = vrot.slane %v2295_v39, 5 }
  0x80   : > { %6614 = vmatprep.subr.bf16.mxu1 %v6983_v58  ;;  %9845 = vst [vmem:[#allocation3_spill] sm:$0xff] %v7830_v60  ;;  %6663 = vmatpush3.bf16.msra.mxu0 %v6984_v30  ;;  %v7849_v30 = vrot.slane %v2250_v49, 4  ;;  %v2316_v49 = vshrl.u32 %v5694_v8, 16  ;;  %v2319_v62 = vshll.u32 %v5694_v8, 16  ;;  %v2307_v48 = vrot.slane %v2305_v20, 4 }
  0x81   : > { %6744 = vmatprep.subr.bf16.mxu0 %v7818_v15  ;;  %v2283_v35 = vrot.slane %v2281_v50, 4  ;;  %v7865_v50 = vrot.slane %v2301_v59, 5  ;;  %v7868_v45 = vld [vmem:[%s7144_s29 + $0x44] sm:$0x1]  ;;  %v2329_v12 = vshrl.u32 %v7855_v46, 16  ;;  %v9848_v16 = vrot.slane %v9841_v40, 5 }
  0x82   : > { %6585 = vmatmul.mubr.bf16.gmra.mxu0 %v5595_v34  ;;  %v2287_v34 = vshll.u32 %v7830_v60, 16  ;;  %v9849_v57 = vrot.slane %v7745_v1, 9  ;;  %v7889_v39 = vld [vmem:[%s7144_s29 + $0x4c] sm:$0xf]  ;;  %v2318_v59 = vrot.slane %v2316_v49, 4  ;;  %v2321_v20 = vrot.slane %v2319_v62, 5 }
  0x83   : > { %6615 = vmatpush3.bf16.msra.mxu1 %v6983_v58  ;;  %6588 = vmatprep.mubr.bf16.mxu0 %v5596_v17  ;;  %v2274_v58 = vor.u32 %v2273_v47, %v2270_v10  ;;  %v2311_v17 = vshll.u32 %v7839_v0, 16  ;;  %v2325_v47 = vshll.u32 %v7855_v46, 16  ;;  %v5697_v10 = vld [vmem:[%s7144_s29 + $0x48] sm:$0xf]  ;;  %v2284_v8 = vor.u32 %v2283_v35, %v7851_v51 }
  0x84   : > { %6696 = vmatprep.subr.bf16.mxu1 %v7813_v36  ;;  %v2331_v1 = vrot.slane %v2329_v12, 4  ;;  %v7893_v46 = vrot.slane %v2260_v14, 4  ;;  %v2232_v62 = vsel %vm7175_vm2, %v7841_v4, %v7775_v19  ;;  %v2242_v35 = vsel %vm7175_vm2, %v7843_v7, %v7827_v25  ;;  %v5700_v4 = vld [vmem:[%s7144_s29 + $0x54] sm:$0xf] }
  0x85   : > { %v7891_v60 = vrot.slane %v2325_v47, 5  ;;  %v2343_v14 = vshll.u32 %v5697_v10, 16  ;;  %v2335_v49 = vshll.u32 %v7868_v45, 16  ;;  %v2353_v19 = vshrl.u32 %v7889_v39, 16 }
  0x86   : > { %6537 = vmatmul.mubr.bf16.gmra.mxu1 %v5539_v54  ;;  %v7879_v54 = vsel %vm7486_vm5, %v9849_v57, %v9848_v16  ;;  %v7895_v16 = vrot.slane %v2274_v58, 4  ;;  %v7897_v57 = vrot.slane %v2287_v34, 5  ;;  %v2349_v58 = vshll.u32 %v7889_v39, 16 }
  0x87   : > { %6540 = vmatprep.mubr.bf16.mxu1 %v5540_v33  ;;  %v9850_v33 = vrot.slane %v9844_v5, 5  ;;  %v2340_v5 = vshrl.u32 %v5697_v10, 16  ;;  %v9852_v34 = vcombine.low %v7670_v44, %v7686_v41  ;;  %v7918_v47 = vrot.slane %v2284_v8, 4  ;;  %v7924_v10 = vld [vmem:[%s7144_s29 + $0x58] sm:$0xf] }
  0x88   : > { %v7920_v12 = vrot.slane %v2311_v17, 5  ;;  %v2322_v25 = vor.u32 %v2321_v20, %v2318_v59  ;;  %v2332_v7 = vor.u32 %v2331_v1, %v7891_v60  ;;  %v9853_v44 = vcombine.low %v7265_v13, %v7272_v22  ;;  %v7930_v41 = vld [vmem:[%s7144_s29 + $0x50] sm:$0x1] }
  0x89   : > { %v7885_v3 = vsel %vm7486_vm5, %v1459_v55, %v9850_v33  ;;  %v9851_v55 = vcombine.low %v7650_v6, %v7662_v21  ;;  %v2298_v6 = vor.u32 %v2297_v63, %v2294_v53  ;;  %v2308_v21 = vor.u32 %v2307_v48, %v7865_v50 }
  0x8a   : > { %v2342_v48 = vrot.slane %v2340_v5, 4  ;;  %v2345_v53 = vrot.slane %v2343_v14, 5  ;;  %v7932_v63 = vrot.slane %v2349_v58, 5  ;;  %v2355_v17 = vrot.slane %v2353_v19, 4  ;;  %v5703_v5 = vld [vmem:[%s7144_s29 + $0x60] sm:$0xf] }
  0x8b   : > { %6589 = vmatmul.mubr.bf16.gmra.mxu0 %v9851_v55  ;;  %v9854_v33 = vcombine.low %v7317_v18, %v7323_v31  ;;  %v2364_v8 = vshrl.u32 %v5700_v4, 16  ;;  %v2367_v59 = vshll.u32 %v5700_v4, 16  ;;  %v7937_v20 = vrot.slane %v2298_v6, 4  ;;  %v7954_v31 = vld [vmem:[%s7144_s29 + $0x64] sm:$0xf] }
  0x8c   : > { %6592 = vmatprep.mubr.bf16.mxu0 %v9852_v34  ;;  %v7939_v1 = vrot.slane %v2308_v21, 4  ;;  %v7941_v13 = vrot.slane %v2335_v49, 5  ;;  %v2373_v22 = vshll.u32 %v7924_v10, 16  ;;  %v5601_v55 = vcombine.low %v7879_v54, %v7885_v3  ;;  %v7950_v34 = vld [vmem:[%s7144_s29 + $0x5c] sm:$0x1] }
  0x8d   : > { %v5746_v14 = vcombine.low %v2232_v62, %v2242_v35  ;;  %v7947_v58 = vrot.slane %v2322_v25, 4  ;;  %v2377_v18 = vshrl.u32 %v7924_v10, 16  ;;  %v7956_v6 = vrot.slane %v2332_v7, 4 }
  0x8e   : > { %6541 = vmatmul.mubr.bf16.gmra.mxu1 %v9853_v44  ;;  %v2359_v21 = vshll.u32 %v7930_v41, 16  ;;  %v2388_v49 = vshrl.u32 %v5703_v5, 16  ;;  %v2391_v19 = vshll.u32 %v5703_v5, 16  ;;  %v9855_v4 = vcombine.low %v7690_v26, %v7718_v37 }
  0x8f   : > { %6544 = vmatprep.mubr.bf16.mxu1 %v9854_v33  ;;  %v2346_v54 = vor.u32 %v2345_v53, %v2342_v48  ;;  %v2356_v3 = vor.u32 %v2355_v17, %v7932_v63  ;;  %v2366_v62 = vrot.slane %v2364_v8, 4  ;;  %v2369_v35 = vrot.slane %v2367_v59, 5  ;;  %v7994_v8 = vld [vmem:[%s7144_s29 + $0x70] sm:$0xf] }
  0x90   : > { %v9856_v25 = vcombine.low %v7700_v2, %v7730_v29  ;;  %v7966_v7 = vrot.slane %v2373_v22, 5  ;;  %v2379_v44 = vrot.slane %v2377_v18, 4  ;;  %v2383_v33 = vshll.u32 %v7950_v34, 16 }
  0x91   : > { %v2397_v26 = vshll.u32 %v7954_v31, 16  ;;  %v2256_v37 = vsel %vm7175_vm2, %v7849_v30, %v7836_v11  ;;  %v2266_v2 = vsel %vm7175_vm2, %v7893_v46, %v7845_v38  ;;  %v2390_v29 = vrot.slane %v2388_v49, 4  ;;  %v5706_v46 = vld [vmem:[%s7144_s29 + $0x6c] sm:$0xf] }
  0x92   : > { %v2393_v48 = vrot.slane %v2391_v19, 5  ;;  %v9857_v53 = vcombine.low %v7359_v9, %v7368_v28  ;;  %v2280_v17 = vsel %vm7175_vm2, %v7895_v16, %v7851_v51  ;;  %v2290_v11 = vsel %vm7175_vm2, %v7918_v47, %v7897_v57  ;;  %v8002_v16 = vld [vmem:[%s7144_s29 + $0x68] sm:$0x1] }
  0x93   : > { %6593 = vmatmul.mubr.bf16.gmra.mxu0 %v9855_v4  ;;  %v7989_v30 = vrot.slane %v2359_v21, 5  ;;  %v2401_v38 = vshrl.u32 %v7954_v31, 16  ;;  %v9858_v9 = vcombine.low %v9839_v24, %v7423_v52  ;;  %v7999_v28 = vrot.slane %v2346_v54, 4  ;;  %v6985_v52 = vld [vmem:[%s7144_s29 + $0xc] sm:$0xff]  }
  0x94   : > { %6596 = vmatprep.mubr.bf16.mxu0 %v9856_v25  ;;  %v2370_v51 = vor.u32 %v2369_v35, %v2366_v62  ;;  %v2412_v59 = vshrl.u32 %v5706_v46, 16  ;;  %v2415_v57 = vshll.u32 %v5706_v46, 16  ;;  %v8004_v47 = vrot.slane %v2356_v3, 4  ;;  %v8015_v62 = vld [vmem:[%s7144_s29 + $0x74] sm:$0x1] }
  0x95   : > { %v2380_v22 = vor.u32 %v2379_v44, %v7966_v7  ;;  %v8007_v5 = vrot.slane %v2383_v33, 5  ;;  %v2421_v18 = vshll.u32 %v7994_v8, 16  ;;  %v2394_v24 = vor.u32 %v2393_v48, %v2390_v29  ;;  %v5709_v25 = vld [vmem:[%s7144_s29 + $0x78] sm:$0xf]  ;;  %v8019_v44 = vld [vmem:[%s7144_s29 + $0x7c] sm:$0xf] }
  0x96   : > { %6545 = vmatmul.mubr.bf16.gmra.mxu1 %v9857_v53  ;;  %v8011_v21 = vrot.slane %v2397_v26, 5  ;;  %v2403_v49 = vrot.slane %v2401_v38, 4  ;;  %v2425_v19 = vshrl.u32 %v7994_v8, 16  ;;  %v5747_v4 = vcombine.low %v2256_v37, %v2266_v2  ;;  %v8026_v26 = vld [vmem:[%s7144_s29 + $0x80] sm:$0x1] }
  0x97   : > { %6548 = vmatprep.mubr.bf16.mxu1 %v9858_v9  ;;  %v5748_v54 = vcombine.low %v2280_v17, %v2290_v11  ;;  %v2414_v3 = vrot.slane %v2412_v59, 4  ;;  %v2417_v35 = vrot.slane %v2415_v57, 5  ;;  %v8021_v33 = vrot.slane %v2370_v51, 4 }
  0x98   : > { %v8023_v53 = vrot.slane %v2421_v18, 5  ;;  %v2427_v29 = vrot.slane %v2425_v19, 4  ;;  %v2436_v48 = vshrl.u32 %v5709_v25, 16  ;;  %v2407_v37 = vshll.u32 %v8002_v16, 16  ;;  %v5712_v19 = vld [vmem:[%s7144_s29 + $0x84] sm:$0xf] }
  0x99   : > { %v2439_v2 = vshll.u32 %v5709_v25, 16  ;;  %v2445_v17 = vshll.u32 %v8019_v44, 16  ;;  %v2449_v11 = vshrl.u32 %v8019_v44, 16  ;;  %v8031_v38 = vrot.slane %v2380_v22, 4  ;;  %v6989_v25 = vld [vmem:[%s7144_s29 + $0x24] sm:$0xff]  }
  0x9a   : > { %v8033_v46 = vrot.slane %v2394_v24, 4  ;;  %v2438_v9 = vrot.slane %v2436_v48, 4  ;;  %v9859_v51 = vcombine.low %v9842_v43, %v9841_v40  ;;  %v2304_v22 = vsel %vm7175_vm2, %v7937_v20, %v7865_v50 }
  0x9b   : > { %6597 = vmatmul.mubr.bf16.gmra.mxu0 %v5601_v55  ;;  %v2404_v55 = vor.u32 %v2403_v49, %v8011_v21  ;;  %v2441_v59 = vrot.slane %v2439_v2, 5  ;;  %v8039_v57 = vrot.slane %v2445_v17, 5  ;;  %v2451_v18 = vrot.slane %v2449_v11, 4  ;;  %v8088_v17 = vld [vmem:[%s7144_s29 + $0x8c] sm:$0x1] }
  0x9c   : > { %6664 = vmatprep.mubr.bf16.mxu0 %v5746_v14  ;;  %v2418_v14 = vor.u32 %v2417_v35, %v2414_v3  ;;  %v2428_v24 = vor.u32 %v2427_v29, %v8023_v53  ;;  %v2431_v49 = vshll.u32 %v8015_v62, 16  ;;  %v2455_v40 = vshll.u32 %v8026_v26, 16  ;;  %v8062_v3 = vld [vmem:[%s7144_s29 + $0x88] sm:$0xf]  ;;  %v6986_v35 = vld [vmem:[%s7144_s29 + $0x18] sm:$0xff]  }
  0x9d   : > { %v2314_v43 = vsel %vm7175_vm2, %v7939_v1, %v7920_v12  ;;  %v2338_v50 = vsel %vm7175_vm2, %v7956_v6, %v7941_v13  ;;  %v2442_v20 = vor.u32 %v2441_v59, %v2438_v9  ;;  %v6992_v12 = vld [vmem:[%s9799_s1 + $0x1b0] sm:$0xff]   ;;  %v8069_v1 = vrot.slane %v2407_v37, 5  ;;  %v8093_v11 = vld [vmem:[%s9799_s1 + $0x1a8] sm:$0xff]  }
  0x9e   : > { %6549 = vmatmul.mubr.bf16.gmra.mxu1 %v9859_v51  ;;  %v2463_v29 = vshll.u32 %v5712_v19, 16  ;;  %v6991_v13 = vld [vmem:[%s9799_s1 + $0x170] sm:$0xff]   ;;  %v2352_v6 = vsel %vm7175_vm2, %v7999_v28, %v7932_v63  ;;  %v2362_v48 = vsel %vm7175_vm2, %v8004_v47, %v7989_v30  ;;  %v8083_v37 = vrot.slane %v2404_v55, 4 }
  0x9f   : > { %6616 = vmatprep.mubr.bf16.mxu1 %v6985_v52  ;;  %v2328_v52 = vsel %vm7175_vm2, %v7947_v58, %v7891_v60  ;;  %v2452_v60 = vor.u32 %v2451_v18, %v8039_v57  ;;  %v2460_v58 = vshrl.u32 %v5712_v19, 16  ;;  %v8085_v2 = vrot.slane %v2418_v14, 4  ;;  %v5715_v14 = vld [vmem:[%s7144_s29 + $0x90] sm:$0xf]  ;;  %v8116_v59 = vld [vmem:[%s7144_s29 + $0x94] sm:$0xf] }
  0xa0   : > { %v8095_v63 = vrot.slane %v2428_v24, 4  ;;  %v8097_v28 = vrot.slane %v2431_v49, 5  ;;  %v2469_v30 = vshll.u32 %v8062_v3, 16  ;;  %v2473_v47 = vshrl.u32 %v8062_v3, 16  ;;  %9860 = vst [vmem:[#allocation6_spill] sm:$0xff] %v8116_v59 }
  0xa1   : > { %v2386_v55 = vsel %vm7175_vm2, %v8031_v38, %v8007_v5  ;;  %v8110_v9 = vrot.slane %v2442_v20, 4  ;;  %v8112_v51 = vrot.slane %v2455_v40, 5  ;;  %v2465_v18 = vrot.slane %v2463_v29, 5  ;;  %v6995_v5 = vld [vmem:[%s9799_s1 + $0x168] sm:$0xff]  }
  0xa2   : > { %v2487_v38 = vshll.u32 %v5715_v14, 16  ;;  %v2493_v24 = vshll.u32 %v8116_v59, 16  ;;  %v2497_v49 = vshrl.u32 %v8116_v59, 16  ;;  %v5749_v40 = vcombine.low %v2304_v22, %v2314_v43 }
  0xa3   : > { %6665 = vmatmul.mubr.bf16.vlgmr.msra.gmra.mxu0 %v5747_v4  ;;  %v2376_v4 = vsel %vm7175_vm2, %v8021_v33, %v7966_v7  ;;  %v2479_v7 = vshll.u32 %v8088_v17, 16  ;;  %v2484_v33 = vshrl.u32 %v5715_v14, 16  ;;  %v5750_v20 = vcombine.low %v2328_v52, %v2338_v50 }
  0xa4   : > { %6745 = vmatpush3.bf16.msra.mxu0 %v7818_v15  ;;  %6668 = vmatprep.mubr.bf16.mxu0 %v5748_v54  ;;  %v8118_v15 = vrot.slane %v2452_v60, 4  ;;  %v2462_v54 = vrot.slane %v2460_v58, 4  ;;  %v8127_v19 = vrot.slane %v2469_v30, 5  ;;  %v6990_v60 = vld [vmem:[%s7144_s29 + $0x30] sm:$0xff]   ;;  %v7000_v58 = vld [vmem:[%s9799_s1 + $0x1a0] sm:$0xff]   ;;  %v2489_v14 = vrot.slane %v2487_v38, 5 }
  0xa5   : > { %6746 = vmatprep.subr.bf16.mxu0 %v6992_v12  ;;  %v2486_v29 = vrot.slane %v2484_v33, 4  ;;  %v2499_v22 = vrot.slane %v2497_v49, 4  ;;  %v8135_v43 = vcombine.low %v2352_v6, %v2362_v48  ;;  %v8138_v52 = vcombine.low %v2376_v4, %v2386_v55  ;;  %v5718_v30 = vld [vmem:[%s7144_s29 + $0x9c] sm:$0xf]  ;;  %v8160_v4 = vld [vmem:[%s7144_s29 + $0xa4] sm:$0x1] }
  0xa6   : > { %6617 = vmatmul.mubr.bf16.vlgmr.msra.gmra.mxu1 %v6986_v35  ;;  %v2475_v35 = vrot.slane %v2473_v47, 4  ;;  %v2466_v48 = vor.u32 %v2465_v18, %v2462_v54  ;;  %v8157_v47 = vld [vmem:[%s7144_s29 + $0xa0] sm:$0xf]  ;;  %9863 = vst [vmem:[#allocation9_spill] sm:$0xff] %v8160_v4  ;;  %v2508_v55 = vshrl.u32 %v5718_v30, 16  ;;  %v2511_v33 = vshll.u32 %v5718_v30, 16 }
  0xa7   : > { %6697 = vmatpush3.bf16.msra.mxu1 %v7813_v36  ;;  %6620 = vmatprep.mubr.bf16.mxu1 %v6989_v25  ;;  %v8133_v36 = vrot.slane %v2493_v24, 5  ;;  %v2410_v25 = vsel %vm7175_vm2, %v8083_v37, %v8069_v1  ;;  %9862 = vst [vmem:[#allocation8_spill] sm:$0xff] %v8157_v47  ;;  %v6993_v38 = vld [vmem:[%s7144_s29 + $0x3c] sm:$0xff]   ;;  %v2517_v37 = vshll.u32 %v8157_v47, 16  ;;  %v2521_v24 = vshrl.u32 %v8157_v47, 16 }
  0xa8   : > { %6698 = vmatprep.subr.bf16.mxu1 %v6991_v13  ;;  %6747 = vmatpush3.bf16.msra.mxu0 %v6992_v12  ;;  %v8149_v12 = vld [vmem:[%s7144_s29 + $0x98] sm:$0x1]  ;;  %v2476_v1 = vor.u32 %v2475_v35, %v8127_v19  ;;  %v6999_v54 = vld [vmem:[%s9799_s1 + $0x160] sm:$0xff]   ;;  %v2490_v18 = vor.u32 %v2489_v14, %v2486_v29  ;;  %v2510_v30 = vrot.slane %v2508_v55, 4  ;;  %v2513_v49 = vrot.slane %v2511_v33, 5 }
  0xa9   : > { %6748 = vmatprep.subr.bf16.mxu0 %v8093_v11  ;;  %9861 = vst [vmem:[#allocation7_spill] sm:$0xff] %v8149_v12  ;;  %v2503_v35 = vshll.u32 %v8149_v12, 16  ;;  %v2523_v6 = vrot.slane %v2521_v24, 4  ;;  %v2527_v50 = vshll.u32 %v8160_v4, 16  ;;  %v5721_v47 = vld [vmem:[%s7144_s29 + $0xa8] sm:$0xf] }
  0xaa   : > { %v7003_v29 = vld [vmem:[%s9799_s1 + $0x158] sm:$0xff]   ;;  %v8183_v14 = vrot.slane %v2466_v48, 4  ;;  %v2532_v55 = vshrl.u32 %v5721_v47, 16  ;;  %v2535_v33 = vshll.u32 %v5721_v47, 16  ;;  %v8196_v4 = vld [vmem:[%s7144_s29 + $0xb0] sm:$0x1] }
  0xab   : > { %6669 = vmatmul.mubr.bf16.gmra.mxu0 %v5749_v40  ;;  %6699 = vmatpush3.bf16.msra.mxu1 %v6991_v13  ;;  %v7004_v13 = vld [vmem:[%s9799_s1 + $0x198] sm:$0xff]   ;;  %v2500_v40 = vor.u32 %v2499_v22, %v8133_v36  ;;  %v8185_v22 = vrot.slane %v2479_v7, 5  ;;  %v6994_v48 = vld [vmem:[%s7144_s29 + $0x48] sm:$0xff]   ;;  %v8199_v7 = vrot.slane %v2476_v1, 4  ;;  %v8201_v12 = vrot.slane %v2490_v18, 4 }
  0xac   : > { %6672 = vmatprep.mubr.bf16.mxu0 %v5750_v20  ;;  %6700 = vmatprep.subr.bf16.mxu1 %v6995_v5  ;;  %v8176_v20 = vrot.slane %v2517_v37, 5  ;;  %v2514_v37 = vor.u32 %v2513_v49, %v2510_v30  ;;  %v8203_v59 = vrot.slane %v2503_v35, 5  ;;  %v7007_v49 = vld [vmem:[%s9799_s1 + $0x150] sm:$0xff]   ;;  %v8220_v18 = vrot.slane %v2535_v33, 5 }
  0xad   : > { %6749 = vmatpush3.bf16.msra.mxu0 %v8093_v11  ;;  %v8188_v11 = vld [vmem:[%s7144_s29 + $0xac] sm:$0xf]  ;;  %v2551_v35 = vshll.u32 %v8196_v4, 16 }
  0xae   : > { %6621 = vmatmul.mubr.bf16.gmra.mxu1 %v6990_v60  ;;  %6750 = vmatprep.subr.bf16.mxu0 %v7000_v58  ;;  %9864 = vst [vmem:[#allocation10_spill] sm:$0xff] %v8188_v11  ;;  %v2434_v60 = vsel %vm7175_vm2, %v8095_v63, %v8097_v28  ;;  %v2524_v24 = vor.u32 %v2523_v6, %v8176_v20  ;;  %v2541_v47 = vshll.u32 %v8188_v11, 16  ;;  %v6997_v63 = vld [vmem:[%s7144_s29 + $0x54] sm:$0xff]   ;;  %v8210_v28 = vrot.slane %v2500_v40, 4 }
  0xaf   : > { %6624 = vmatprep.mubr.bf16.mxu1 %v6993_v38  ;;  %6701 = vmatpush3.bf16.msra.mxu1 %v6995_v5  ;;  %v7008_v5 = vld [vmem:[%s9799_s1 + $0x190] sm:$0xff]   ;;  %v8212_v6 = vrot.slane %v2527_v50, 5  ;;  %v8214_v38 = vrot.slane %v2532_v55, 4  ;;  %v2545_v1 = vshrl.u32 %v8188_v11, 16  ;;  %v8229_v40 = vrot.slane %v2514_v37, 4 }
  0xb0   : > { %6702 = vmatprep.subr.bf16.mxu1 %v6999_v54  ;;  %v8231_v30 = vrot.slane %v2524_v24, 4  ;;  %v5724_v55 = vld [vmem:[%s7144_s29 + $0xb4] sm:$0xf]  ;;  %v8235_v11 = vld [vmem:[%s7144_s29 + $0xb8] sm:$0xf]  ;;  %v7011_v24 = vld [vmem:[%s9799_s1 + $0x148] sm:$0xff]  }
  0xb1   : > { %6751 = vmatpush3.bf16.msra.mxu0 %v7000_v58  ;;  %v9865_v58 = vsel %vm7175_vm2, %v8033_v46, %v8011_v21  ;;  %9866 = vst [vmem:[#allocation11_spill] sm:$0xff] %v8235_v11  ;;  %v2448_v21 = vsel %vm7175_vm2, %v8110_v9, %v8039_v57  ;;  %v8247_v46 = vrot.slane %v2541_v47, 5  ;;  %v5727_v37 = vld [vmem:[%s7144_s29 + $0xc0] sm:$0xf]  ;;  %v2458_v57 = vsel %vm7175_vm2, %v8118_v15, %v8112_v51  ;;  %v8274_v47 = vld [vmem:[%s7144_s29 + $0xc4] sm:$0xf] }
  0xb2   : > { %6752 = vmatprep.subr.bf16.mxu0 %v7004_v13  ;;  %v5753_v50 = vcombine.low %v9865_v58, %v2410_v25  ;;  %v2556_v25 = vshrl.u32 %v5724_v55, 16  ;;  %v2472_v9 = vsel %vm7175_vm2, %v8183_v14, %v8127_v19  ;;  %9869 = vst [vmem:[#allocation13_spill] sm:$0xff] %v8274_v47  ;;  %v8277_v51 = vld [vmem:[%s7144_s29 + $0xc8] sm:$0x1]  ;;  %v2589_v58 = vshll.u32 %v8274_v47, 16 }
  0xb3   : > { %6673 = vmatmul.mubr.bf16.gmra.mxu0 %v8135_v43  ;;  %6703 = vmatpush3.bf16.msra.mxu1 %v6999_v54  ;;  %v9867_v43 = vsel %vm7175_vm2, %v8085_v2, %v8023_v53  ;;  %v2547_v54 = vrot.slane %v2545_v1, 4  ;;  %v2559_v53 = vshll.u32 %v5724_v55, 16  ;;  %v2565_v2 = vshll.u32 %v8235_v11, 16 }
  0xb4   : > { %6676 = vmatprep.mubr.bf16.mxu0 %v8138_v52  ;;  %v5754_v33 = vcombine.low %v9867_v43, %v2434_v60  ;;  %6704 = vmatprep.subr.bf16.mxu1 %v7003_v29  ;;  %v7012_v52 = vld [vmem:[%s9799_s1 + $0x188] sm:$0xff]   ;;  %v2569_v60 = vshrl.u32 %v8235_v11, 16  ;;  %v2558_v15 = vrot.slane %v2556_v25, 4  ;;  %v9870_v55 = vrot.slane %v7682_v32, 5 }
  0xb5   : > { %6753 = vmatpush3.bf16.msra.mxu0 %v7004_v13  ;;  %v2482_v13 = vsel %vm7175_vm2, %v8199_v7, %v8185_v22  ;;  %v2561_v19 = vrot.slane %v2559_v53, 5  ;;  %v8279_v14 = vrot.slane %v2565_v2, 5  ;;  %v2580_v22 = vshrl.u32 %v5727_v37, 16  ;;  %v6998_v2 = vld [vmem:[%s7144_s29 + $0x60] sm:$0xff]  }
  0xb6   : > { %6625 = vmatmul.mubr.bf16.gmra.mxu1 %v6994_v48  ;;  %6754 = vmatprep.subr.bf16.mxu0 %v7008_v5  ;;  %v8271_v48 = vld [vmem:[%s7144_s29 + $0xbc] sm:$0x1]  ;;  %v2571_v1 = vrot.slane %v2569_v60, 4  ;;  %v2583_v7 = vshll.u32 %v5727_v37, 16  ;;  %v8284_v43 = vrot.slane %v9870_v55, 4  ;;  %v8289_v25 = vrot.slane %v2551_v35, 5 }
  0xb7   : > { %9868 = vst [vmem:[#allocation12_spill] sm:$0xff] %v8271_v48  ;;  %6628 = vmatprep.mubr.bf16.mxu1 %v6997_v63  ;;  %6705 = vmatpush3.bf16.msra.mxu1 %v7003_v29  ;;  %v2538_v63 = vor.u32 %v8220_v18, %v8214_v38  ;;  %v2548_v29 = vor.u32 %v2547_v54, %v8247_v46  ;;  %v2593_v53 = vshrl.u32 %v8274_v47, 16  ;;  %v2575_v60 = vshll.u32 %v8271_v48, 16  ;;  %v7001_v38 = vld [vmem:[%s7144_s29 + $0x6c] sm:$0xff]   ;;  %v8309_v48 = vld [vmem:[%s7144_s29 + $0x18] sm:$0xe] }
  0xb8   : > { %6706 = vmatprep.subr.bf16.mxu1 %v7007_v49  ;;  %v2582_v37 = vrot.slane %v2580_v22, 4  ;;  %v2585_v11 = vrot.slane %v2583_v7, 5  ;;  %v8294_v55 = vrot.slane %v2589_v58, 5  ;;  %v2562_v18 = vor.u32 %v2561_v19, %v2558_v15  ;;  %v7015_v22 = vld [vmem:[%s9799_s1 + $0x140] sm:$0xff]   ;;  %v8306_v58 = vld [vmem:[%s7144_s29 + $0xc] sm:$0xe] }
  0xb9   : > { %6755 = vmatpush3.bf16.msra.mxu0 %v7008_v5  ;;  %v7016_v5 = vld [vmem:[%s9799_s1 + $0x180] sm:$0xff]   ;;  %v2572_v35 = vor.u32 %v2571_v1, %v8279_v14  ;;  %v2595_v54 = vrot.slane %v2593_v53, 4  ;;  %v2599_v47 = vshll.u32 %v8277_v51, 16  ;;  %v5755_v15 = vcombine.low %v2448_v21, %v2458_v57 }
  0xba   : > { %6756 = vmatprep.subr.bf16.mxu0 %v7012_v52  ;;  %v2586_v7 = vor.u32 %v2585_v11, %v2582_v37  ;;  %v5756_v19 = vcombine.low %v2472_v9, %v2482_v13  ;;  %v8317_v1 = vrot.slane %v2538_v63, 4  ;;  %v8319_v11 = vrot.slane %v2548_v29, 4  ;;  %v7002_v9 = vld [vmem:[%s7144_s29 + $0x78] sm:$0xff]   ;;  %v7005_v37 = vld [vmem:[%s7144_s29 + $0x84] sm:$0xff]  }
  0xbb   : > { %6677 = vmatmul.mubr.bf16.gmra.mxu0 %v5753_v50  ;;  %6707 = vmatpush3.bf16.msra.mxu1 %v7007_v49  ;;  %v8314_v49 = vld [vmem:[%s9799_s1 + $0x238] sm:$0xff]   ;;  %v2596_v50 = vor.u32 %v2595_v54, %v8294_v55  ;;  %v8328_v53 = vrot.slane %v2572_v35, 4  ;;  %v8330_v21 = vrot.slane %v2575_v60, 5  ;;  %v8336_v63 = vrot.slane %v2599_v47, 5  ;;  %v5773_v60 = vld [vmem:[%s7144_s29 + $0x30] sm:$0xe] }
  0xbc   : > { %6680 = vmatprep.mubr.bf16.mxu0 %v5754_v33  ;;  %6708 = vmatprep.subr.bf16.mxu1 %v7011_v24  ;;  %v8324_v33 = vld [vmem:[%s9799_s1 + $0x1f8] sm:$0xff]   ;;  %v8334_v13 = vrot.slane %v2586_v7, 4  ;;  %v2994_v29 = vrot.slane %v7756_v42, 5  ;;  %v9871_v35 = vld [vmem:[#allocation2_spill] sm:$0xff]  ;;  %v5789_v47 = vrot.slane %v5773_v60, 9  ;;  %v9874_v60 = vld [vmem:[#allocation3_spill] sm:$0xff] }
  0xbd   : > { %6757 = vmatpush3.bf16.msra.mxu0 %v7012_v52  ;;  %v8326_v52 = vrot.slane %v2562_v18, 4  ;;  %v9872_v7 = vld [vmem:[#allocation5_spill] sm:$0xff]  ;;  %v3015_v18 = vrot.slane %v7839_v0, 5  ;;  %v2530_v0 = vsel %vm7175_vm2, %v8231_v30, %v8212_v6  ;;  %v3029_v30 = vrot.slane %v7930_v41, 5 }
  0xbe   : > { %6629 = vmatmul.mubr.bf16.gmra.mxu1 %v6998_v2  ;;  %6758 = vmatprep.subr.bf16.mxu0 %v7016_v5  ;;  %v3012_v57 = vrot.slane %v9872_v7, 5  ;;  %v9873_v2 = vld [vmem:[#allocation4_spill] sm:$0xff] }
  0xbf   : > { %6632 = vmatprep.mubr.bf16.mxu1 %v7001_v38  ;;  %6709 = vmatpush3.bf16.msra.mxu1 %v7011_v24  ;;  %v8341_v24 = vrot.slane %v2596_v50, 4  ;;  %v2998_v38 = vrot.slane %v7773_v61, 5  ;;  %v2496_v50 = vsel %vm7175_vm2, %v8201_v12, %v8133_v36  ;;  %v3019_v54 = vrot.slane %v9873_v2, 5  ;;  %v5774_v12 = vld [vmem:[%s7144_s29 + $0x3c] sm:$0xe] }
  0xc0   : > { %6710 = vmatprep.subr.bf16.mxu1 %v7015_v22  ;;  %v8363_v7 = vsel %vm7486_vm5, %v5789_v47, %v3012_v57  ;;  %v3014_v36 = vrot.slane %v3012_v57, 4  ;;  %v5790_v2 = vrot.slane %v5774_v12, 9  ;;  %v7006_v47 = vld [vmem:[%s7144_s29 + $0x90] sm:$0xff]   ;;  %v3036_v12 = vrot.slane %v7950_v34, 5 }
  0xc1   : > { %6759 = vmatpush3.bf16.msra.mxu0 %v7016_v5  ;;  %v2506_v5 = vsel %vm7175_vm2, %v8210_v28, %v8203_v59  ;;  %v2520_v59 = vsel %vm7175_vm2, %v8229_v40, %v8176_v20  ;;  %v3021_v28 = vrot.slane %v3019_v54, 4  ;;  %v3026_v20 = vrot.slane %v7889_v39, 5 }
  0xc2   : > { %6840 = vmatprep.subr.bf16.mxu0 %v8314_v49  ;;  %v8377_v57 = vsel %vm7486_vm5, %v3014_v36, %v3015_v18  ;;  %v5758_v18 = vcombine.low %v2520_v59, %v2530_v0  ;;  %v8392_v39 = vsel %vm7486_vm5, %v5790_v2, %v3019_v54  ;;  %v2544_v36 = vsel %vm7175_vm2, %v8317_v1, %v8247_v46  ;;  %v5776_v54 = vld [vmem:[%s7144_s29 + $0x54] sm:$0xe] }
  0xc3   : > { %6681 = vmatmul.mubr.bf16.gmra.mxu0 %v5755_v15  ;;  %6711 = vmatpush3.bf16.msra.mxu1 %v7015_v22  ;;  %v3008_v15 = vrot.slane %v9874_v60, 5  ;;  %v3022_v22 = vrot.slane %v7868_v45, 5  ;;  %v5821_v40 = vcombine.low %v8363_v7, %v8377_v57  ;;  %v5775_v45 = vld [vmem:[%s7144_s29 + $0x48] sm:$0xe]  ;;  %v2554_v46 = vsel %vm7175_vm2, %v8319_v11, %v8289_v25  ;;  %v7026_v7 = vld [vmem:[%s7144_s29 + $0x54] sm:$0xff]  }
  0xc4   : > { %6684 = vmatprep.mubr.bf16.mxu0 %v5756_v19  ;;  %6792 = vmatprep.subr.bf16.mxu1 %v8324_v33  ;;  %v5757_v19 = vcombine.low %v2496_v50, %v2506_v5  ;;  %v3028_v50 = vrot.slane %v3026_v20, 4  ;;  %v7009_v5 = vld [vmem:[%s7144_s29 + $0x9c] sm:$0xff]   ;;  %v3040_v2 = vrot.slane %v7954_v31, 5  ;;  %v2568_v34 = vsel %vm7175_vm2, %v8326_v52, %v8279_v14 }
  0xc5   : > { %v8384_v6 = vsel %vm7486_vm5, %v3021_v28, %v3022_v22  ;;  %v5792_v28 = vrot.slane %v5776_v54, 9  ;;  %v5777_v22 = vld [vmem:[%s7144_s29 + $0x60] sm:$0xe]  ;;  %v3043_v25 = vrot.slane %v8002_v16, 5  ;;  %v2578_v11 = vsel %vm7175_vm2, %v8328_v53, %v8330_v21 }
  0xc6   : > { %6633 = vmatmul.mubr.bf16.gmra.mxu1 %v7002_v9  ;;  %v3033_v9 = vrot.slane %v7924_v10, 5  ;;  %v5822_v41 = vcombine.low %v8392_v39, %v8384_v6  ;;  %v8407_v59 = vsel %vm7486_vm5, %v3028_v50, %v3029_v30  ;;  %v3047_v14 = vrot.slane %v7994_v8, 5  ;;  %v6003_v6 = vld [vmem:[%s7144_s29 + $0x24] sm:$0xe] }
  0xc7   : > { %6636 = vmatprep.mubr.bf16.mxu1 %v7005_v37  ;;  %v5791_v37 = vrot.slane %v5775_v45, 9  ;;  %v3042_v45 = vrot.slane %v3040_v2, 4  ;;  %v5759_v52 = vcombine.low %v2544_v36, %v2554_v46  ;;  %v3050_v8 = vrot.slane %v8015_v62, 5  ;;  %v5779_v36 = vld [vmem:[%s7144_s29 + $0x78] sm:$0xe] }
  0xc8   : > { %v3035_v0 = vrot.slane %v3033_v9, 4  ;;  %v8434_v31 = vsel %vm7486_vm5, %v5792_v28, %v3033_v9  ;;  %v3049_v9 = vrot.slane %v3047_v14, 4  ;;  %v3054_v54 = vrot.slane %v8019_v44, 5 }
  0xc9   : > { %v8403_v10 = vsel %vm7486_vm5, %v5791_v37, %v3026_v20  ;;  %v5793_v20 = vrot.slane %v5777_v22, 9  ;;  %v8446_v53 = vsel %vm7486_vm5, %v3042_v45, %v3043_v25  ;;  %v5760_v37 = vcombine.low %v2568_v34, %v2578_v11 }
  0xca   : > { %v8462_v46 = vsel %vm7486_vm5, %v3049_v9, %v3050_v8  ;;  %v5795_v62 = vrot.slane %v5779_v36, 9  ;;  %v3061_v28 = vrot.slane %v8062_v3, 5  ;;  %v3056_v44 = vrot.slane %v3054_v54, 4  ;;  %v7017_v8 = vld [vmem:[%s7144_s29 + $0x18] sm:$0xff]   ;;  %v9879_v36 = vld [vmem:[#allocation8_spill] sm:$0xff] }
  0xcb   : > { %6685 = vmatmul.mubr.bf16.gmra.mxu0 %v5757_v19  ;;  %v8425_v19 = vsel %vm7486_vm5, %v3035_v0, %v3036_v12  ;;  %v8441_v16 = vsel %vm7486_vm5, %v5793_v20, %v3040_v2  ;;  %v3057_v0 = vrot.slane %v8026_v26, 5  ;;  %v3064_v26 = vrot.slane %v8088_v17, 5  ;;  %v5780_v20 = vld [vmem:[%s7144_s29 + $0x84] sm:$0xe] }
  0xcc   : > { %6688 = vmatprep.mubr.bf16.mxu0 %v5758_v18  ;;  %v5778_v18 = vld [vmem:[%s7144_s29 + $0x6c] sm:$0xe]  ;;  %v2592_v2 = vsel %vm7175_vm2, %v8334_v13, %v8294_v55  ;;  %v8474_v34 = vsel %vm7486_vm5, %v5795_v62, %v3054_v54  ;;  %v2602_v3 = vsel %vm7175_vm2, %v8341_v24, %v8336_v63  ;;  %v5796_v25 = vrot.slane %v5780_v20, 9  ;;  %v9877_v63 = vld [vmem:[#allocation6_spill] sm:$0xff] }
  0xcd   : > { %v5794_v21 = vrot.slane %v5778_v18, 9  ;;  %v8483_v17 = vsel %vm7486_vm5, %v3056_v44, %v3057_v0  ;;  %v3063_v11 = vrot.slane %v3061_v28, 4  ;;  %v9875_v45 = vrot.slane %v7682_v32, 5  ;;  %v5781_v18 = vld [vmem:[%s7144_s29 + $0x90] sm:$0xe]  ;;  %v7029_v62 = vld [vmem:[%s7144_s29 + $0x60] sm:$0xff]  }
  0xce   : > { %6637 = vmatmul.mubr.bf16.gmra.mxu1 %v7006_v47  ;;  %v7010_v47 = vld [vmem:[%s7144_s29 + $0xa8] sm:$0xff]   ;;  %v9876_v55 = vrot.slane %v8306_v58, 9  ;;  %v3068_v24 = vrot.slane %v9877_v63, 5  ;;  %v8500_v32 = vsel %vm7486_vm5, %v5796_v25, %v3061_v28  ;;  %v3075_v54 = vrot.slane %v9879_v36, 5 }
  0xcf   : > { %6640 = vmatprep.mubr.bf16.mxu1 %v7009_v5  ;;  %v7013_v5 = vld [vmem:[%s7144_s29 + $0xb4] sm:$0xff]   ;;  %v8458_v12 = vsel %vm7486_vm5, %v5794_v21, %v3047_v14  ;;  %v5772_v14 = vld [vmem:[%s7144_s29 + $0x24] sm:$0xe]  ;;  %v9878_v21 = vld [vmem:[#allocation7_spill] sm:$0xff]  ;;  %v8504_v58 = vsel %vm7486_vm5, %v3063_v11, %v3064_v26  ;;  %v5761_v0 = vcombine.low %v2592_v2, %v2602_v3  ;;  %v2995_v28 = vsel %vm7486_vm5, %v8284_v43, %v2994_v29 }
  0xd0   : > { %v2992_v13 = vsel %vm7486_vm5, %v9876_v55, %v9875_v45  ;;  %v3071_v9 = vrot.slane %v9878_v21, 5  ;;  %v3070_v44 = vrot.slane %v3068_v24, 4  ;;  %v7014_v45 = vld [vmem:[%s7144_s29 + $0xc0] sm:$0xff]   ;;  %v3000_v26 = vrot.slane %v2998_v38, 4  ;;  %v5782_v2 = vld [vmem:[%s7144_s29 + $0x9c] sm:$0xe] }
  0xd1   : > { %v3077_v3 = vrot.slane %v3075_v54, 4  ;;  %v5798_v11 = vrot.slane %v5782_v2, 9  ;;  %v9881_v55 = vld [vmem:[#allocation10_spill] sm:$0xff]  ;;  %v5783_v63 = vld [vmem:[%s7144_s29 + $0xa8] sm:$0xe]  ;;  %v5818_v21 = vcombine.low %v2992_v13, %v2995_v28  ;;  %v9885_v28 = vrot.slane %v8309_v48, 9 }
  0xd2   : > { %v8525_v25 = vsel %vm7486_vm5, %v3070_v44, %v3071_v9  ;;  %v3082_v42 = vrot.slane %v9881_v55, 5  ;;  %v8648_v43 = vld [vmem:[%s7144_s29 + $0x34] sm:$0xf] }
  0xd3   : > { %6689 = vmatmul.mubr.bf16.gmra.mxu0 %v5759_v52  ;;  %v8538_v9 = vsel %vm7486_vm5, %v5798_v11, %v3075_v54  ;;  %v5784_v54 = vld [vmem:[%s7144_s29 + $0xb4] sm:$0xe]  ;;  %v3916_v39 = vshll.u32 %v8648_v43, 16 }
  0xd4   : > { %6692 = vmatprep.mubr.bf16.mxu0 %v5760_v37  ;;  %v5797_v37 = vrot.slane %v5781_v18, 9  ;;  %v5788_v18 = vrot.slane %v5772_v14, 9  ;;  %v3084_v36 = vrot.slane %v3082_v42, 4  ;;  %v9882_v14 = vrot.slane %v9871_v35, 5 }
  0xd5   : > { %v5800_v55 = vrot.slane %v5784_v54, 9 }
  0xd6   : > { %6641 = vmatmul.mubr.bf16.gmra.mxu1 %v7010_v47  ;;  %v9880_v47 = vld [vmem:[#allocation9_spill] sm:$0xff]  ;;  %v3007_v44 = vrot.slane %v9882_v14, 4  ;;  %v9887_v61 = vmov %v9882_v14  ;;  %v3099_v14 = vrot.slane %v8277_v51, 5  ;;  %v5920_v51 = vld [vmem:[%s7144_s29 + $0x30] sm:$0xf] }
  0xd7   : > { %6644 = vmatprep.mubr.bf16.mxu1 %v7013_v5  ;;  %v3078_v20 = vrot.slane %v9880_v47, 5  ;;  %v8520_v5 = vsel %vm7486_vm5, %v5797_v37, %v3068_v24  ;;  %v3085_v24 = vrot.slane %v8196_v4, 5  ;;  %v5799_v37 = vrot.slane %v5783_v63, 9 }
  0xd8   : > { %v9886_v63 = vrot.slane %v7787_v23, 5  ;;  %v3006_v48 = vsel %vm7486_vm5, %v5788_v18, %v9887_v61  ;;  %v3009_v23 = vsel %vm7486_vm5, %v3007_v44, %v3008_v15  ;;  %v8618_v61 = vld [vmem:[%s7144_s29 + $0x28] sm:$0xf] }
  0xd9   : > { %v8532_v29 = vsel %vm7486_vm5, %v3077_v3, %v3078_v20  ;;  %v9883_v20 = vld [vmem:[#allocation11_spill] sm:$0xff]  ;;  %v8547_v4 = vsel %vm7486_vm5, %v5799_v37, %v3082_v42  ;;  %v8551_v13 = vsel %vm7486_vm5, %v3084_v36, %v3085_v24  ;;  %v2999_v3 = vsel %vm7486_vm5, %v9885_v28, %v2998_v38  ;;  %v5785_v37 = vld [vmem:[%s7144_s29 + $0xc0] sm:$0xe]  ;;  %v9888_v38 = vld [vmem:[#allocation13_spill] sm:$0xff] }
  0xda   : > { %v3089_v2 = vrot.slane %v9883_v20, 5  ;;  %v3002_v24 = vsel %vm7486_vm5, %v3000_v26, %v9886_v63  ;;  %v3096_v36 = vrot.slane %v9888_v38, 5  ;;  %v5801_v18 = vrot.slane %v5785_v37, 9  ;;  %v7024_v20 = vld [vmem:[%s9799_s1 + $0x230] sm:$0xff]   ;;  %v5917_v63 = vld [vmem:[%s7144_s29 + $0x24] sm:$0xf] }
  0xdb   : > { %6693 = vmatmul.mubr.bf16.gmra.mxu0 %v5761_v0  ;;  %v5819_v15 = vcombine.low %v2999_v3, %v3002_v24  ;;  %v5820_v54 = vcombine.low %v3006_v48, %v3009_v23  ;;  %v7023_v28 = vld [vmem:[%s9799_s1 + $0x1f0] sm:$0xff]   ;;  %v7022_v48 = vld [vmem:[%s7144_s29 + $0x3c] sm:$0xff]   ;;  %v3883_v37 = vshrl.u32 %v5917_v63, 16  ;;  %v7025_v38 = vld [vmem:[%s7144_s29 + $0x48] sm:$0xff]   ;;  %v3892_v23 = vshll.u32 %v8618_v61, 16 }
  0xdc   : > { %6760 = vmatprep.mubr.bf16.mxu0 %v7017_v8  ;;  %v9884_v8 = vld [vmem:[#allocation12_spill] sm:$0xff]  ;;  %v3091_v42 = vrot.slane %v3089_v2, 4  ;;  %v8582_v26 = vsel %vm7486_vm5, %v5800_v55, %v3089_v2  ;;  %v3098_v60 = vrot.slane %v3096_v36, 4  ;;  %v8595_v44 = vsel %vm7486_vm5, %v5801_v18, %v3096_v36  ;;  %v5914_v2 = vld [vmem:[%s7144_s29 + $0x18] sm:$0xf]  ;;  %v7028_v55 = vld [vmem:[%s9799_s1 + $0x228] sm:$0xff]  }
  0xdd   : > { %v3092_v0 = vrot.slane %v9884_v8, 5  ;;  %v3862_v24 = vshll.u32 %v5914_v2, 16  ;;  %v7027_v36 = vld [vmem:[%s9799_s1 + $0x1e8] sm:$0xff]   ;;  %v5916_v18 = vld [vmem:[%s7144_s29 + $0x20] sm:$0x1]  ;;  %v3885_v11 = vrot.slane %v3883_v37, 4 }
  0xde   : > { %6645 = vmatmul.mubr.bf16.gmra.mxu1 %v7014_v45  ;;  %v7018_v45 = vld [vmem:[%s7144_s29 + $0x24] sm:$0xff]   ;;  %v8600_v8 = vsel %vm7486_vm5, %v3098_v60, %v3099_v14  ;;  %v3886_v14 = vshll.u32 %v5917_v63, 16  ;;  %v8638_v63 = vld [vmem:[%s7144_s29 + $0x2c] sm:$0x1]  ;;  %v3907_v37 = vshrl.u32 %v5920_v51, 16 }
  0xdf   : > { %6712 = vmatprep.mubr.bf16.mxu1 %v5818_v21  ;;  %v7021_v21 = vld [vmem:[%s7144_s29 + $0x30] sm:$0xff]   ;;  %v8586_v35 = vsel %vm7486_vm5, %v3091_v42, %v3092_v0  ;;  %v8603_v0 = vld [vmem:[%s7144_s29 + $0x1c] sm:$0xf]  ;;  %v3859_v42 = vshrl.u32 %v5914_v2, 16 }
  0xe0   : > { %v4630_v3 = vrot.slane %v8603_v0, 5  ;;  %v3888_v47 = vrot.slane %v3886_v14, 5 }
  0xe1   : > { %v3861_v60 = vrot.slane %v3859_v42, 4  ;;  %v7031_v42 = vld [vmem:[%s9799_s1 + $0x1e0] sm:$0xff]  }
  0xe3   : > { %6761 = vmatmul.mubr.bf16.vlgmr.msra.gmra.mxu0 %v7018_v45  ;;  %v3872_v45 = vshrl.u32 %v8603_v0, 16 }
  0xe4   : > { %6841 = vmatpush3.bf16.msra.mxu0 %v8314_v49  ;;  %6764 = vmatprep.mubr.bf16.mxu0 %v7021_v21  ;;  %v3868_v49 = vshll.u32 %v8603_v0, 16  ;;  %v3896_v21 = vshrl.u32 %v8618_v61, 16 }
  0xe5   : > { %6842 = vmatprep.subr.bf16.mxu0 %v7024_v20 }
  0xe6   : > { %6713 = vmatmul.mubr.bf16.vlgmr.msra.gmra.mxu1 %v5819_v15  ;;  %v6002_v15 = vld [vmem:[%s7144_s29 + $0x18] sm:$0xe]  ;;  %v8633_v2 = vrot.slane %v3868_v49, 5  ;;  %v3878_v49 = vshll.u32 %v5916_v18, 16  ;;  %v3898_v0 = vrot.slane %v3896_v21, 4 }
  0xe7   : > { %6793 = vmatpush3.bf16.msra.mxu1 %v8324_v33  ;;  %6716 = vmatprep.mubr.bf16.mxu1 %v5820_v54  ;;  %v7032_v33 = vld [vmem:[%s9799_s1 + $0x220] sm:$0xff]   ;;  %v3874_v54 = vrot.slane %v3872_v45, 4  ;;  %v8645_v45 = vrot.slane %v3892_v23, 5  ;;  %v7036_v23 = vld [vmem:[%s9799_s1 + $0x218] sm:$0xff]  }
  0xe8   : > { %6794 = vmatprep.subr.bf16.mxu1 %v7023_v28  ;;  %6843 = vmatpush3.bf16.msra.mxu0 %v7024_v20  ;;  %v3864_v20 = vrot.slane %v3862_v24, 5 }
  0xe9   : > { %6844 = vmatprep.subr.bf16.mxu0 %v7028_v55  ;;  %v3875_v21 = vor.u32 %v3874_v54, %v8633_v2  ;;  %v3899_v54 = vor.u32 %v3898_v0, %v8645_v45 }
  0xeb   : > { %6765 = vmatmul.mubr.bf16.gmra.mxu0 %v7022_v48  ;;  %6795 = vmatpush3.bf16.msra.mxu1 %v7023_v28  ;;  %v6018_v48 = vrot.slane %v6002_v15, 9  ;;  %v4633_v28 = vrot.slane %v5916_v18, 5  ;;  %v4632_v18 = vrot.slane %v4630_v3, 4  ;;  %v3902_v15 = vshll.u32 %v8638_v63, 16 }
  0xec   : > { %6768 = vmatprep.mubr.bf16.mxu0 %v7025_v38  ;;  %6796 = vmatprep.subr.bf16.mxu1 %v7027_v36  ;;  %v3910_v38 = vshll.u32 %v5920_v51, 16  ;;  %v4637_v51 = vrot.slane %v8618_v61, 5  ;;  %v3920_v61 = vshrl.u32 %v8648_v43, 16 }
  0xed   : > { %v8643_v24 = vpop.f32.mrf.mxu0  ;;  %6845 = vmatpush3.bf16.msra.mxu0 %v7028_v55  ;;  %v8653_v14 = vpop.f32.mrf.mxu1  ;;  %v3865_v55 = vor.u32 %v3864_v20, %v3861_v60  ;;  %v7035_v60 = vld [vmem:[%s9799_s1 + $0x1d8] sm:$0xff]   ;;  %v8671_v20 = vrot.slane %v3878_v49, 5  ;;  %v7040_v49 = vld [vmem:[%s9799_s1 + $0x210] sm:$0xff]  }
  0xee   : > { %6717 = vmatmul.mubr.bf16.gmra.mxu1 %v5821_v40  ;;  %6846 = vmatprep.subr.bf16.mxu0 %v7032_v33  ;;  %9889 = vst [vmem:[#allocation2_spill] sm:$0xff] %v8653_v14  ;;  %v3889_v40 = vor.u32 %v3888_v47, %v3885_v11  ;;  %v3909_v47 = vrot.slane %v3907_v37, 4  ;;  %v3912_v11 = vrot.slane %v3910_v38, 5  ;;  %v8698_v37 = vld [vmem:[%s7144_s29 + $0x40] sm:$0xf]  ;;  %v4639_v50 = vrot.slane %v4637_v51, 4 }
  0xef   : > { %6720 = vmatprep.mubr.bf16.mxu1 %v5822_v41  ;;  %6797 = vmatpush3.bf16.msra.mxu1 %v7027_v36  ;;  %v8664_v57 = vpop.f32.mrf.mxu0  ;;  %v8678_v41 = vsel %vm7486_vm5, %v6018_v48, %v4630_v3  ;;  %v5923_v36 = vld [vmem:[%s7144_s29 + $0x3c] sm:$0xf]  ;;  %v8682_v52 = vpop.f32.mrf.mxu1  ;;  %v8687_v0 = vrot.slane %v3865_v55, 4  ;;  %v8693_v3 = vsel %vm7486_vm5, %v4632_v18, %v4633_v28  ;;  %v8695_v48 = vrot.slane %v3902_v15, 5  ;;  %v7039_v55 = vld [vmem:[%s9799_s1 + $0x1d0] sm:$0xff]  }
  0xf0   : > { %6798 = vmatprep.subr.bf16.mxu1 %v7031_v42  ;;  %9890 = vst [vmem:[#allocation5_spill] sm:$0xff] %v8682_v52  ;;  %v8705_v22 = vrot.slane %v3889_v40, 4  ;;  %v4640_v28 = vrot.slane %v8638_v63, 5  ;;  %v3900_v18 = vrot.slane %v3899_v54, 4  ;;  %v8709_v15 = vld [vmem:[%s7144_s29 + $0x38] sm:$0x1]  ;;  %v3913_v1 = vor.u32 %v3912_v11, %v3909_v47 }
  0xf1   : > { %6847 = vmatpush3.bf16.msra.mxu0 %v7032_v33  ;;  %v8689_v33 = vrot.slane %v3875_v21, 4  ;;  %v8700_v38 = vpop.f32.mrf.mxu0  ;;  %v6019_v21 = vrot.slane %v6003_v6, 9  ;;  %v3934_v30 = vshll.u32 %v5923_v36, 16  ;;  %v8713_v52 = vrot.slane %v3920_v61, 4  ;;  %v6004_v40 = vld [vmem:[%s7144_s29 + $0x30] sm:$0xe]  ;;  %v8721_v54 = vpop.f32.mrf.mxu1 }
  0xf2   : > { %6848 = vmatprep.subr.bf16.mxu0 %v7036_v23  ;;  %v3940_v6 = vshll.u32 %v8698_v37, 16  ;;  %v3944_v63 = vshrl.u32 %v8698_v37, 16  ;;  %9892 = vst [vmem:[#allocation4_spill] sm:$0xff] %v8721_v54  ;;  %v9893_v11 = vcombine.low %v8434_v31, %v8425_v19  ;;  %v7030_v61 = vld [vmem:[%s7144_s29 + $0x6c] sm:$0xff]   ;;  %v8754_v19 = vsel %vm7486_vm5, %v4639_v50, %v4640_v28  ;;  %v8772_v28 = vld [vmem:[%s7144_s29 + $0x44] sm:$0x1] }
  0xf3   : > { %6769 = vmatmul.mubr.bf16.gmra.mxu0 %v7026_v7  ;;  %6799 = vmatpush3.bf16.msra.mxu1 %v7031_v42  ;;  %v8711_v7 = vrot.slane %v3916_v39, 5  ;;  %v3931_v42 = vshrl.u32 %v5923_v36, 16  ;;  %v3871_v39 = vsel %vm7175_vm2, %v8687_v0, %v8633_v2  ;;  %v3881_v47 = vsel %vm7175_vm2, %v8689_v33, %v8671_v20  ;;  %v7033_v36 = vld [vmem:[%s7144_s29 + $0x78] sm:$0xff]   ;;  %v8765_v33 = vld [vmem:[%s7144_s29 + $0x4c] sm:$0xf]  ;;  %v8776_v54 = vpop.f32.mrf.mxu1 }
  0xf4   : > { %6772 = vmatprep.mubr.bf16.mxu0 %v7029_v62  ;;  %6800 = vmatprep.subr.bf16.mxu1 %v7035_v60  ;;  %v9891_v62 = vcombine.low %v8403_v10, %v8407_v59  ;;  %v4644_v59 = vrot.slane %v8648_v43, 5  ;;  %v3895_v2 = vsel %vm7175_vm2, %v8705_v22, %v8645_v45  ;;  %v8750_v20 = vsel %vm7486_vm5, %v6019_v21, %v4637_v51  ;;  %v5926_v43 = vld [vmem:[%s7144_s29 + $0x48] sm:$0xf]  ;;  %v6005_v14 = vld [vmem:[%s7144_s29 + $0x3c] sm:$0xe] }
  0xf5   : > { %6849 = vmatpush3.bf16.msra.mxu0 %v7036_v23  ;;  %v7044_v23 = vld [vmem:[%s9799_s1 + $0x208] sm:$0xff]   ;;  %v3926_v31 = vshll.u32 %v8709_v15, 16  ;;  %v3905_v22 = vsel %vm7175_vm2, %v3900_v18, %v8695_v48  ;;  %v6020_v45 = vrot.slane %v6004_v40, 9  ;;  %v3933_v0 = vrot.slane %v3931_v42, 4  ;;  %9895 = vst [vmem:[#allocation6_spill] sm:$0xff] %v8776_v54  ;;  %v7047_v42 = vld [vmem:[%s9799_s1 + $0x1c0] sm:$0xff]  }
  0xf6   : > { %6721 = vmatmul.mubr.bf16.gmra.mxu1 %v9891_v62  ;;  %6850 = vmatprep.subr.bf16.mxu0 %v7040_v49  ;;  %v8742_v62 = vpop.f32.mrf.mxu0  ;;  %v3936_v51 = vrot.slane %v3934_v30, 5  ;;  %v8767_v50 = vrot.slane %v3913_v1, 4  ;;  %v3923_v21 = vor.u32 %v8713_v52, %v8711_v7  ;;  %v3946_v10 = vrot.slane %v3944_v63, 4  ;;  %v7048_v30 = vld [vmem:[%s9799_s1 + $0x200] sm:$0xff]  }
  0xf7   : > { %6724 = vmatprep.mubr.bf16.mxu1 %v9893_v11  ;;  %6801 = vmatpush3.bf16.msra.mxu1 %v7035_v60  ;;  %9894 = vst [vmem:[#allocation3_spill] sm:$0xff] %v8742_v62  ;;  %v7043_v60 = vld [vmem:[%s9799_s1 + $0x1c8] sm:$0xff]   ;;  %v8774_v11 = vrot.slane %v3940_v6, 5  ;;  %v4646_v48 = vrot.slane %v4644_v59, 4  ;;  %v3955_v1 = vshrl.u32 %v5926_v43, 16  ;;  %v3958_v18 = vshll.u32 %v5926_v43, 16 }
  0xf8   : > { %6802 = vmatprep.subr.bf16.mxu1 %v7039_v55  ;;  %v8782_v52 = vpop.f32.mrf.mxu0  ;;  %v8787_v40 = vcombine.low %v3871_v39, %v3881_v47  ;;  %v3968_v63 = vshrl.u32 %v8765_v33, 16  ;;  %v8795_v43 = vrot.slane %v3926_v31, 5  ;;  %v3950_v54 = vshll.u32 %v8772_v28, 16  ;;  %v5929_v39 = vld [vmem:[%s7144_s29 + $0x54] sm:$0xf]  ;;  %v7034_v6 = vld [vmem:[%s7144_s29 + $0x84] sm:$0xff]  }
  0xf9   : > { %6851 = vmatpush3.bf16.msra.mxu0 %v7040_v49  ;;  %v4647_v49 = vrot.slane %v8709_v15, 5  ;;  %9896 = vst [vmem:[#allocation7_spill] sm:$0xff] %v8782_v52  ;;  %v3964_v15 = vshll.u32 %v8765_v33, 16  ;;  %v4651_v31 = vrot.slane %v8698_v37, 5  ;;  %v9899_v37 = vcombine.low %v8458_v12, %v8462_v46  ;;  %v7037_v47 = vld [vmem:[%s7144_s29 + $0x90] sm:$0xff]  }
  0xfa   : > { %6852 = vmatprep.subr.bf16.mxu0 %v7044_v23 }
  0xfb   : > { %6773 = vmatmul.mubr.bf16.gmra.mxu0 %v7030_v61  ;;  %6803 = vmatpush3.bf16.msra.mxu1 %v7039_v55  ;;  %v8793_v61 = vcombine.low %v3895_v2, %v3905_v22  ;;  %v3937_v55 = vor.u32 %v3936_v51, %v3933_v0  ;;  %v3947_v2 = vor.u32 %v3946_v10, %v8774_v11  ;;  %v8811_v22 = vld [vmem:[%s7144_s29 + $0x58] sm:$0xf]  ;;  %v8818_v51 = vrot.slane %v3923_v21, 4 }
  0xfc   : > { %6776 = vmatprep.mubr.bf16.mxu0 %v7033_v36  ;;  %6804 = vmatprep.subr.bf16.mxu1 %v7043_v60  ;;  %v8806_v36 = vsel %vm7486_vm5, %v6020_v45, %v4644_v59  ;;  %v9897_v0 = vcombine.low %v8441_v16, %v8446_v53  ;;  %v8822_v59 = vsel %vm7486_vm5, %v4646_v48, %v4647_v49  ;;  %v3957_v45 = vrot.slane %v3955_v1, 4  ;;  %v8829_v16 = vpop.f32.mrf.mxu0  ;;  %v5928_v1 = vld [vmem:[%s7144_s29 + $0x50] sm:$0x1] }
  0xfd   : > { %6853 = vmatpush3.bf16.msra.mxu0 %v7044_v23  ;;  %v8816_v23 = vpop.f32.mrf.mxu1  ;;  %v3960_v10 = vrot.slane %v3958_v18, 5  ;;  %9900 = vst [vmem:[#allocation9_spill] sm:$0xff] %v8829_v16  ;;  %v6021_v53 = vrot.slane %v6005_v14, 9  ;;  %v3970_v21 = vrot.slane %v3968_v63, 4  ;;  %v3938_v48 = vrot.slane %v3937_v55, 4 }
  0xfe   : > { %6725 = vmatmul.mubr.bf16.gmra.mxu1 %v9897_v0  ;;  %9898 = vst [vmem:[#allocation8_spill] sm:$0xff] %v8816_v23  ;;  %6854 = vmatprep.subr.bf16.mxu0 %v7048_v30  ;;  %v8831_v0 = vrot.slane %v3964_v15, 5  ;;  %v3979_v23 = vshrl.u32 %v5929_v39, 16  ;;  %v3952_v49 = vrot.slane %v3950_v54, 5  ;;  %v3982_v18 = vshll.u32 %v5929_v39, 16  ;;  %v8847_v39 = vpop.f32.mrf.mxu0 }
  0xff   : > { %6728 = vmatprep.mubr.bf16.mxu1 %v9899_v37  ;;  %6805 = vmatpush3.bf16.msra.mxu1 %v7043_v60  ;;  %v3988_v52 = vshll.u32 %v8811_v22, 16  ;;  %v3948_v12 = vrot.slane %v3947_v2, 4  ;;  %v4653_v46 = vrot.slane %v4651_v31, 4  ;;  %v4654_v37 = vrot.slane %v8772_v28, 5  ;;  %v8837_v60 = vpop.f32.mrf.mxu1  ;;  %v5932_v55 = vld [vmem:[%s7144_s29 + $0x60] sm:$0xf] }
 0x100   : > { %6806 = vmatprep.subr.bf16.mxu1 %v7047_v42  ;;  %v3992_v14 = vshrl.u32 %v8811_v22, 16  ;;  %9901 = vst [vmem:[#allocation10_spill] sm:$0xff] %v8837_v60  ;;  %v3929_v15 = vsel %vm7175_vm2, %v8818_v51, %v8795_v43  ;;  %v3961_v63 = vor.u32 %v3960_v10, %v3957_v45  ;;  %v3971_v28 = vor.u32 %v3970_v21, %v8831_v0  ;;  %v6006_v60 = vld [vmem:[%s7144_s29 + $0x48] sm:$0xe] }
 0x101   : > { %6855 = vmatpush3.bf16.msra.mxu0 %v7048_v30  ;;  %v4658_v30 = vrot.slane %v8765_v33, 5  ;;  %v3974_v2 = vshll.u32 %v5928_v1, 16  ;;  %v3981_v16 = vrot.slane %v3979_v23, 4  ;;  %v3984_v62 = vrot.slane %v3982_v18, 5  ;;  %v8872_v10 = vpop.f32.mrf.mxu1 }
 0x102   : > { %v3943_v43 = vsel %vm7175_vm2, %v3938_v48, %v8774_v11  ;;  %v8856_v33 = vsel %vm7486_vm5, %v6021_v53, %v4651_v31  ;;  %v3953_v51 = vsel %vm7175_vm2, %v3948_v12, %v3952_v49  ;;  %v8864_v23 = vsel %vm7486_vm5, %v4653_v46, %v4654_v37  ;;  %9903 = vst [vmem:[#allocation11_spill] sm:$0xff] %v8872_v10  ;;  %v8875_v49 = vld [vmem:[%s7144_s29 + $0x64] sm:$0xf]  ;;  %v7038_v12 = vld [vmem:[%s7144_s29 + $0x9c] sm:$0xff]   ;;  %v8881_v46 = vpop.f32.mrf.mxu0 }
 0x103   : > { %6777 = vmatmul.mubr.bf16.gmra.mxu0 %v7034_v6  ;;  %6807 = vmatpush3.bf16.msra.mxu1 %v7047_v42  ;;  %v8858_v6 = vrot.slane %v3988_v52, 5  ;;  %v3994_v42 = vrot.slane %v3992_v14, 4  ;;  %v4003_v45 = vshrl.u32 %v5932_v55, 16  ;;  %v4006_v11 = vshll.u32 %v5932_v55, 16  ;;  %v7041_v55 = vld [vmem:[%s7144_s29 + $0xa8] sm:$0xff]  }
 0x104   : > { %6780 = vmatprep.mubr.bf16.mxu0 %v7037_v47  ;;  %v8867_v47 = vld [vmem:[%s7144_s29 + $0x5c] sm:$0x1]  ;;  %v9902_v31 = vcombine.low %v8474_v34, %v8483_v17  ;;  %v3962_v52 = vrot.slane %v3961_v63, 4  ;;  %v6022_v53 = vrot.slane %v6006_v60, 9  ;;  %v4660_v21 = vrot.slane %v4658_v30, 4 }
 0x105   : > { %v4661_v48 = vrot.slane %v5928_v1, 5  ;;  %v9904_v18 = vcombine.low %v8500_v32, %v8504_v58  ;;  %v3972_v37 = vrot.slane %v3971_v28, 4  ;;  %v3976_v14 = vrot.slane %v3974_v2, 5  ;;  %v6007_v63 = vld [vmem:[%s7144_s29 + $0x54] sm:$0xe]  ;;  %v8899_v28 = vpop.f32.mrf.mxu1 }
 0x106   : > { %6729 = vmatmul.mubr.bf16.gmra.mxu1 %v9902_v31  ;;  %v3985_v34 = vor.u32 %v3984_v62, %v3981_v16  ;;  %v4665_v17 = vrot.slane %v8811_v22, 5  ;;  %v3995_v60 = vor.u32 %v3994_v42, %v8858_v6  ;;  %v3998_v1 = vshll.u32 %v8867_v47, 16  ;;  %9906 = vst [vmem:[#allocation12_spill] sm:$0xff] %v8899_v28  ;;  %v6008_v62 = vld [vmem:[%s7144_s29 + $0x60] sm:$0xe] }
 0x107   : > { %6732 = vmatprep.mubr.bf16.mxu1 %v9904_v18  ;;  %v4005_v31 = vrot.slane %v4003_v45, 4  ;;  %v4008_v54 = vrot.slane %v4006_v11, 5  ;;  %v9905_v32 = vsel %vm7175_vm2, %v8767_v50, %v8711_v7  ;;  %v4012_v22 = vshll.u32 %v8875_v49, 16 }
 0x108   : > { %v8893_v58 = vcombine.low %v9905_v32, %v3929_v15  ;;  %v4016_v16 = vshrl.u32 %v8875_v49, 16  ;;  %v8901_v2 = vcombine.low %v3943_v43, %v3953_v51  ;;  %v3967_v42 = vsel %vm7175_vm2, %v3962_v52, %v8831_v0  ;;  %v5935_v15 = vld [vmem:[%s7144_s29 + $0x6c] sm:$0xf]  ;;  %v8919_v32 = vld [vmem:[%s7144_s29 + $0x70] sm:$0xf] }
 0x109   : > { %v8908_v7 = vsel %vm7486_vm5, %v6022_v53, %v4658_v30  ;;  %v8912_v50 = vsel %vm7486_vm5, %v4660_v21, %v4661_v48  ;;  %v8915_v45 = vpop.f32.mrf.mxu0  ;;  %v3986_v43 = vrot.slane %v3985_v34, 4  ;;  %v6023_v51 = vrot.slane %v6007_v63, 9  ;;  %v5934_v53 = vld [vmem:[%s7144_s29 + $0x68] sm:$0x1] }
 0x10a   : > { %9907 = vst [vmem:[#allocation13_spill] sm:$0xff] %v8915_v45  ;;  %v4667_v11 = vrot.slane %v4665_v17, 4  ;;  %v4668_v18 = vrot.slane %v8867_v47, 5  ;;  %v3977_v0 = vsel %vm7175_vm2, %v3972_v37, %v3976_v14  ;;  %v3996_v30 = vrot.slane %v3995_v60, 4  ;;  %v6010_v45 = vld [vmem:[%s7144_s29 + $0x78] sm:$0xe] }
 0x10b   : > { %6781 = vmatmul.mubr.bf16.gmra.mxu0 %v7038_v12  ;;  %v4000_v52 = vrot.slane %v3998_v1, 5  ;;  %v4009_v21 = vor.u32 %v4008_v54, %v4005_v31  ;;  %v8924_v48 = vrot.slane %v4012_v22, 5  ;;  %v4018_v12 = vrot.slane %v4016_v16, 4  ;;  %v7042_v31 = vld [vmem:[%s7144_s29 + $0xb4] sm:$0xff]  }
 0x10c   : > { %6784 = vmatprep.mubr.bf16.mxu0 %v7041_v55  ;;  %v4027_v34 = vshrl.u32 %v5935_v15, 16  ;;  %v4030_v63 = vshll.u32 %v5935_v15, 16  ;;  %v9908_v47 = vcombine.low %v8520_v5, %v8525_v25  ;;  %v4672_v14 = vrot.slane %v8875_v49, 5  ;;  %v8941_v5 = vpop.f32.mrf.mxu0 }
 0x10d   : > { %v4036_v54 = vshll.u32 %v8919_v32, 16  ;;  %v4040_v60 = vshrl.u32 %v8919_v32, 16  ;;  %v9910_v1 = vcombine.low %v8538_v9, %v8532_v29  ;;  %9911 = vst [vmem:[#allocation15_spill] sm:$0xff] %v8941_v5  ;;  %v8943_v25 = vcombine.low %v3967_v42, %v3977_v0  ;;  %v5938_v29 = vld [vmem:[%s7144_s29 + $0x78] sm:$0xf]  ;;  %v7045_v9 = vld [vmem:[%s7144_s29 + $0xc0] sm:$0xff]  }
 0x10e   : > { %6733 = vmatmul.mubr.bf16.gmra.mxu1 %v9908_v47  ;;  %v8930_v55 = vpop.f32.mrf.mxu1  ;;  %v3991_v22 = vsel %vm7175_vm2, %v3986_v43, %v8858_v6  ;;  %v8950_v49 = vsel %vm7486_vm5, %v6023_v51, %v4665_v17  ;;  %v8954_v16 = vsel %vm7486_vm5, %v4667_v11, %v4668_v18  ;;  %v4001_v15 = vsel %vm7175_vm2, %v3996_v30, %v4000_v52  ;;  %v8967_v43 = vld [vmem:[%s7144_s29 + $0x74] sm:$0x1]  ;;  %v9024_v5 = vld [vmem:[%s7144_s29 + $0x8c] sm:$0x1] }
 0x10f   : > { %9909 = vst [vmem:[#allocation14_spill] sm:$0xff] %v8930_v55  ;;  %6736 = vmatprep.mubr.bf16.mxu1 %v9910_v1  ;;  %v8960_v47 = vrot.slane %v4009_v21, 4  ;;  %v4022_v42 = vshll.u32 %v5934_v53, 16  ;;  %v6024_v0 = vrot.slane %v6008_v62, 9  ;;  %v8963_v1 = vld [vmem:[%s7144_s29 + $0x7c] sm:$0xf]  ;;  %v4019_v6 = vor.u32 %v4018_v12, %v8924_v48  ;;  %v8973_v21 = vpop.f32.mrf.mxu0 }
 0x110   : > { %v4675_v17 = vrot.slane %v5934_v53, 5  ;;  %v4029_v51 = vrot.slane %v4027_v34, 4  ;;  %v4032_v11 = vrot.slane %v4030_v63, 5  ;;  %v8969_v18 = vpop.f32.mrf.mxu1  ;;  %v4674_v37 = vrot.slane %v4672_v14, 4  ;;  %9913 = vst [vmem:[#allocation17_spill] sm:$0xff] %v8973_v21 }
 0x111   : > { %9912 = vst [vmem:[#allocation16_spill] sm:$0xff] %v8969_v18  ;;  %v8971_v55 = vrot.slane %v4036_v54, 5  ;;  %v4042_v30 = vrot.slane %v4040_v60, 4  ;;  %v4051_v52 = vshrl.u32 %v5938_v29, 16  ;;  %v6009_v53 = vld [vmem:[%s7144_s29 + $0x6c] sm:$0xe]  ;;  %v8980_v18 = vcombine.low %v3991_v22, %v4001_v15 }
 0x112   : > { %v4054_v12 = vshll.u32 %v5938_v29, 16  ;;  %v4060_v34 = vshll.u32 %v8963_v1, 16  ;;  %v4064_v63 = vshrl.u32 %v8963_v1, 16  ;;  %v8982_v54 = vrot.slane %v4022_v42, 5  ;;  %v5941_v62 = vld [vmem:[%s7144_s29 + $0x84] sm:$0xf]  ;;  %v9003_v42 = vpop.f32.mrf.mxu1 }
 0x113   : > { %6785 = vmatmul.mubr.bf16.gmra.mxu0 %v7042_v31  ;;  %9914 = vst [vmem:[#allocation18_spill] sm:$0xff] %v8980_v18  ;;  %v8986_v60 = vsel %vm7486_vm5, %v6024_v0, %v4672_v14  ;;  %v4046_v31 = vshll.u32 %v8967_v43, 16  ;;  %v8994_v28 = vrot.slane %v4019_v6, 4  ;;  %v4679_v22 = vrot.slane %v8919_v32, 5  ;;  %v8998_v15 = vld [vmem:[%s7144_s29 + $0x88] sm:$0xf] }
 0x114   : > { %6788 = vmatprep.mubr.bf16.mxu0 %v7045_v9  ;;  %v4033_v9 = vor.u32 %v4032_v11, %v4029_v51  ;;  %v9915_v14 = vcombine.low %v8547_v4, %v8551_v13  ;;  %9916 = vst [vmem:[#allocation19_spill] sm:$0xff] %v9003_v42  ;;  %v7046_v0 = vld [vmem:[%s7144_s29 + $0xcc] sm:$0xff]   ;;  %v9008_v10 = vsel %vm7486_vm5, %v4674_v37, %v4675_v17  ;;  %v6025_v6 = vrot.slane %v6009_v53, 9  ;;  %v9011_v11 = vpop.f32.mrf.mxu0  ;;  %v9017_v4 = vld [vmem:[%s7144_s29 + $0x80] sm:$0x1] }
 0x115   : > { %v4043_v29 = vor.u32 %v4042_v30, %v8971_v55  ;;  %v4053_v51 = vrot.slane %v4051_v52, 4  ;;  %9917 = vst [vmem:[#allocation20_spill] sm:$0xff] %v9011_v11  ;;  %v9918_v32 = vcombine.low %v8582_v26, %v8586_v35  ;;  %v4056_v13 = vrot.slane %v4054_v12, 5 }
 0x116   : > { %6737 = vmatmul.mubr.bf16.gmra.mxu1 %v9915_v14  ;;  %v9019_v14 = vrot.slane %v4060_v34, 5  ;;  %v4066_v42 = vrot.slane %v4064_v63, 4  ;;  %v4075_v21 = vshrl.u32 %v5941_v62, 16  ;;  %v4048_v37 = vrot.slane %v4046_v31, 5 }
 0x117   : > { %6740 = vmatprep.mubr.bf16.mxu1 %v9918_v32  ;;  %v4682_v17 = vrot.slane %v8967_v43, 5  ;;  %v4078_v30 = vshll.u32 %v5941_v62, 16  ;;  %v4084_v52 = vshll.u32 %v8998_v15, 16  ;;  %v4034_v53 = vrot.slane %v4033_v9, 4  ;;  %v9027_v32 = vpop.f32.mrf.mxu1 }
 0x118   : > { %v4681_v11 = vrot.slane %v4679_v22, 4  ;;  %v4077_v26 = vrot.slane %v4075_v21, 4  ;;  %v4088_v35 = vshrl.u32 %v8998_v15, 16  ;;  %v4044_v12 = vrot.slane %v4043_v29, 4 }
 0x119   : > { %v4070_v34 = vshll.u32 %v9017_v4, 16  ;;  %v4080_v63 = vrot.slane %v4078_v30, 5  ;;  %v9030_v31 = vrot.slane %v4084_v52, 5  ;;  %v4057_v62 = vor.u32 %v4056_v13, %v4053_v51  ;;  %v6011_v52 = vld [vmem:[%s7144_s29 + $0x84] sm:$0xe] }
 0x11a   : > { %v9032_v43 = vpop.f32.mrf.mxu0  ;;  %v4067_v9 = vor.u32 %v4066_v42, %v9019_v14  ;;  %v4686_v21 = vrot.slane %v8963_v1, 5  ;;  %v4090_v18 = vrot.slane %v4088_v35, 4  ;;  %v9919_v29 = vcombine.low %v8678_v41, %v8693_v3 }
 0x11b   : > { %6789 = vmatmul.mubr.bf16.gmra.mxu0 %v7046_v0  ;;  %v4025_v30 = vsel %vm7175_vm2, %v8994_v28, %v8982_v54  ;;  %v9048_v51 = vsel %vm7486_vm5, %v6025_v6, %v4679_v22  ;;  %v4094_v42 = vshll.u32 %v9024_v5, 16  ;;  %v4039_v41 = vsel %vm7175_vm2, %v4034_v53, %v8971_v55  ;;  %v5944_v54 = vld [vmem:[%s7144_s29 + $0x90] sm:$0xf] }
 0x11c   : > { %6856 = vmatprep.mubr.bf16.mxu0 %v9919_v29  ;;  %v9051_v1 = vpop.f32.mrf.mxu0  ;;  %v4081_v3 = vor.u32 %v4080_v63, %v4077_v26  ;;  %v4091_v13 = vor.u32 %v4090_v18, %v9030_v31  ;;  %v4693_v28 = vrot.slane %v8998_v15, 5  ;;  %v9921_v22 = vcombine.low %v8595_v44, %v8600_v8 }
 0x11d   : > { %v4049_v6 = vsel %vm7175_vm2, %v4044_v12, %v4048_v37  ;;  %v9069_v55 = vsel %vm7486_vm5, %v4681_v11, %v4682_v17  ;;  %v4072_v53 = vrot.slane %v4070_v34, 5  ;;  %v6026_v18 = vrot.slane %v6010_v45, 9  ;;  %v9078_v12 = vld [vmem:[%s7144_s29 + $0x94] sm:$0xf] }
 0x11e   : > { %v9060_v35 = vpop.f32.mrf.mxu1  ;;  %6741 = vmatmul.mubr.bf16.gmra.mxu1 %v9921_v22  ;;  %v9071_v26 = vpop.f32.mrf.mxu0  ;;  %v4058_v15 = vrot.slane %v4057_v62, 4  ;;  %v4068_v63 = vrot.slane %v4067_v9, 4  ;;  %v4688_v29 = vrot.slane %v4686_v21, 4  ;;  %v4689_v0 = vrot.slane %v9017_v4, 5 }
 0x11f   : > { %9920 = vst [vmem:[#allocation21_spill] sm:$0xff] %v9060_v35  ;;  %6808 = vmatprep.mubr.bf16.mxu1 %v8787_v40  ;;  %v4096_v8 = vrot.slane %v4094_v42, 5  ;;  %v6027_v37 = vrot.slane %v6011_v52, 9  ;;  %v4099_v11 = vshrl.u32 %v5944_v54, 16  ;;  %v4102_v17 = vshll.u32 %v5944_v54, 16 }
 0x120   : > { %v9075_v44 = vpop.f32.mrf.mxu1  ;;  %v9080_v34 = vpop.f32.mrf.mxu0  ;;  %v4082_v45 = vrot.slane %v4081_v3, 4  ;;  %v4092_v22 = vrot.slane %v4091_v13, 4  ;;  %v4695_v40 = vrot.slane %v4693_v28, 4  ;;  %v4696_v62 = vrot.slane %v9024_v5, 5  ;;  %v9101_v54 = vld [vmem:[%s7144_s29 + $0x98] sm:$0x1] }
 0x121   : > { %9922 = vst [vmem:[#allocation22_spill] sm:$0xff] %v9075_v44  ;;  %v9924_v4 = vsel %vm7175_vm2, %v8960_v47, %v8924_v48  ;;  %v9092_v52 = vcombine.low %v4039_v41, %v4049_v6  ;;  %v9098_v13 = vsel %vm7486_vm5, %v6026_v18, %v4686_v21  ;;  %v4063_v48 = vsel %vm7175_vm2, %v4058_v15, %v9019_v14  ;;  %v5947_v41 = vld [vmem:[%s7144_s29 + $0x9c] sm:$0xf]  ;;  %v9118_v6 = vld [vmem:[%s7144_s29 + $0xa0] sm:$0xf] }
 0x122   : > { %v9083_v9 = vpop.f32.mrf.mxu1  ;;  %v9090_v42 = vcombine.low %v9924_v4, %v4025_v30  ;;  %v6570_v5 = vpop.f32.mrf.mxu0  ;;  %v4073_v47 = vsel %vm7175_vm2, %v4068_v63, %v4072_v53  ;;  %v9113_v30 = vsel %vm7486_vm5, %v4688_v29, %v4689_v0  ;;  %v4108_v21 = vshll.u32 %v9078_v12, 16  ;;  %v9205_v35 = vld [vmem:[%s7144_s29 + $0xb0] sm:$0x1] }
 0x123   : > { %9923 = vst [vmem:[#allocation23_spill] sm:$0xff] %v9083_v9  ;;  %v9925_v9 = vcombine.low %v8750_v20, %v8754_v19  ;;  %v9927_v20 = vcombine.low %v8806_v36, %v8822_v59  ;;  %v9127_v19 = vsel %vm7486_vm5, %v6027_v37, %v4693_v28  ;;  %v4101_v14 = vrot.slane %v4099_v11, 4  ;;  %v9142_v37 = vld [vmem:[%s7144_s29 + $0x90] sm:$0xe] }
 0x124   : > { %v9120_v18 = vpop.f32.mrf.mxu1  ;;  %v4104_v53 = vrot.slane %v4102_v17, 5  ;;  %v4112_v0 = vshrl.u32 %v9078_v12, 16  ;;  %v1625_v15 = vpop.f32.mrf.mxu0  ;;  %v4087_v63 = vsel %vm7175_vm2, %v4082_v45, %v9030_v31  ;;  %v4097_v29 = vsel %vm7175_vm2, %v4092_v22, %v4096_v8 }
 0x125   : > { %6857 = vmatmul.mubr.bf16.vlgmr.msra.gmra.mxu0 %v9925_v9  ;;  %9926 = vst [vmem:[#allocation24_spill] sm:$0xff] %v9120_v18  ;;  %v9137_v36 = vsel %vm7486_vm5, %v4695_v40, %v4696_v62  ;;  %v4118_v59 = vshll.u32 %v9101_v54, 16  ;;  %v4123_v11 = vshrl.u32 %v5947_v41, 16  ;;  %v4126_v17 = vshll.u32 %v5947_v41, 16 }
 0x126   : > { %6860 = vmatprep.mubr.bf16.mxu0 %v9927_v20  ;;  %v6522_v28 = vpop.f32.mrf.mxu1  ;;  %6809 = vmatmul.mubr.bf16.vlgmr.msra.gmra.mxu1 %v8793_v61  ;;  %v4132_v9 = vshll.u32 %v9118_v6, 16  ;;  %v4136_v31 = vshrl.u32 %v9118_v6, 16  ;;  %v6571_v45 = vpop.f32.mrf.mxu0  ;;  %v9148_v22 = vcombine.low %v4063_v48, %v4073_v47  ;;  %v9152_v40 = vrot.slane %v4108_v21, 5  ;;  %v9166_v61 = vld [vmem:[%s7144_s29 + $0xa4] sm:$0x1] }
 0x127   : > { %v1181_v8 = vadd.f32 %v6522_v28, %v8643_v24  ;;  %6812 = vmatprep.mubr.bf16.mxu1 %v8893_v58  ;;  %v9154_v4 = vcombine.low %v4087_v63, %v4097_v29  ;;  %v4105_v20 = vor.u32 %v4104_v53, %v4101_v14  ;;  %v4114_v24 = vrot.slane %v4112_v0, 4  ;;  %v5950_v28 = vld [vmem:[%s7144_s29 + $0xa8] sm:$0xf]  ;;  %v9171_v14 = vld [vmem:[%s7144_s29 + $0xac] sm:$0xf] }
 0x128   : > { %v1172_v62 = vpop.f32.mrf.mxu1  ;;  %v1628_v48 = vpop.f32.mrf.mxu0  ;;  %v9162_v47 = vrot.slane %v4118_v59, 5  ;;  %v6028_v21 = vrot.slane %v9142_v37, 9  ;;  %v4125_v29 = vrot.slane %v4123_v11, 4  ;;  %v4128_v18 = vrot.slane %v4126_v17, 5 }
 0x129   : > { %v9159_v3 = vadd.f32 %v6570_v5, %v1181_v8  ;;  %v1173_v58 = vadd.f32 %v1172_v62, %v8664_v57  ;;  %v9168_v44 = vrot.slane %v4132_v9, 5  ;;  %v4138_v41 = vrot.slane %v4136_v31, 4  ;;  %v9933_v62 = vld [vmem:[#allocation3_spill] sm:$0xff] }
 0x12a   : > { %v6523_v63 = vpop.f32.mrf.mxu1  ;;  %v6574_v5 = vpop.f32.mrf.mxu0  ;;  %v9930_v0 = vcombine.low %v8856_v33, %v8864_v23  ;;  %v4147_v59 = vshrl.u32 %v5950_v28, 16  ;;  %v4150_v37 = vshll.u32 %v5950_v28, 16  ;;  %v9931_v11 = vcombine.low %v8908_v7, %v8912_v50 }
 0x12b   : > { %9928 = vst [vmem:[#allocation25_spill] sm:$0xff] %v9159_v3  ;;  %v9173_v53 = vadd.f32 %v1625_v15, %v1173_v58  ;;  %v1184_v57 = vadd.f32 %v6523_v63, %v8700_v38  ;;  %v9182_v17 = vrot.slane %v4105_v20, 4  ;;  %v4115_v15 = vor.u32 %v4114_v24, %v9152_v40  ;;  %v6013_v58 = vld [vmem:[%s7144_s29 + $0x9c] sm:$0xe] }
 0x12c   : > { %v1175_v8 = vpop.f32.mrf.mxu1  ;;  %v4700_v9 = vrot.slane %v9078_v12, 5  ;;  %v4142_v38 = vshll.u32 %v9166_v61, 16  ;;  %v1641_v23 = vpop.f32.mrf.mxu0  ;;  %v4703_v28 = vrot.slane %v9101_v54, 5  ;;  %v4156_v63 = vshll.u32 %v9171_v14, 16 }
 0x12d   : > { %9929 = vst [vmem:[#allocation26_spill] sm:$0xff] %v9173_v53  ;;  %6861 = vmatmul.mubr.bf16.gmra.mxu0 %v9930_v0  ;;  %v9187_v31 = vadd.f32 %v6571_v45, %v1184_v57  ;;  %v1176_v33 = vadd.f32 %v1175_v8, %v9933_v62  ;;  %v4129_v50 = vor.u32 %v4128_v18, %v4125_v29  ;;  %v4707_v12 = vrot.slane %v9118_v6, 5  ;;  %v9934_v57 = vld [vmem:[#allocation7_spill] sm:$0xff]  ;;  %v9935_v6 = vld [vmem:[#allocation9_spill] sm:$0xff] }
 0x12e   : > { %6864 = vmatprep.mubr.bf16.mxu0 %v9931_v11  ;;  %v6526_v7 = vpop.f32.mrf.mxu1  ;;  %6813 = vmatmul.mubr.bf16.gmra.mxu1 %v8901_v2  ;;  %v4139_v20 = vor.u32 %v4138_v41, %v9168_v44  ;;  %v4160_v45 = vshrl.u32 %v9171_v14, 16  ;;  %v6575_v8 = vpop.f32.mrf.mxu0  ;;  %v4149_v54 = vrot.slane %v4147_v59, 4  ;;  %v4152_v11 = vrot.slane %v4150_v37, 5 }
 0x12f   : > { %9932 = vst [vmem:[#allocation27_spill] sm:$0xff] %v9187_v31  ;;  %v9197_v24 = vadd.f32 %v1628_v48, %v1176_v33  ;;  %v1197_v0 = vadd.f32 %v6526_v7, %v9934_v57  ;;  %6816 = vmatprep.mubr.bf16.mxu1 %v8943_v25  ;;  %v4116_v31 = vrot.slane %v4115_v15, 4  ;;  %v4702_v2 = vrot.slane %v4700_v9, 4 }
 0x130   : > { %v1188_v62 = vpop.f32.mrf.mxu1  ;;  %v4144_v18 = vrot.slane %v4142_v38, 5  ;;  %v6029_v29 = vrot.slane %v6013_v58, 9  ;;  %v1644_v3 = vpop.f32.mrf.mxu0  ;;  %v9207_v48 = vrot.slane %v4156_v63, 5  ;;  %v4162_v33 = vrot.slane %v4160_v45, 4 }
 0x131   : > { %v9201_v41 = vadd.f32 %v6574_v5, %v1197_v0  ;;  %v1189_v53 = vadd.f32 %v1188_v62, %v9935_v6  ;;  %v4130_v57 = vrot.slane %v4129_v50, 4  ;;  %v4140_v25 = vrot.slane %v4139_v20, 4 }
 0x132   : > { %v6527_v7 = vpop.f32.mrf.mxu1  ;;  %v4709_v59 = vrot.slane %v4707_v12, 4  ;;  %v4710_v37 = vrot.slane %v9166_v61, 5  ;;  %v6578_v38 = vpop.f32.mrf.mxu0  ;;  %v9936_v58 = vcombine.low %v8950_v49, %v8954_v16  ;;  %v9218_v63 = vsel %vm7486_vm5, %v6028_v21, %v4700_v9  ;;  %v6014_v21 = vld [vmem:[%s7144_s29 + $0xa8] sm:$0xe] }
 0x133   : > { %v9210_v15 = vadd.f32 %v1641_v23, %v1189_v53  ;;  %v1200_v5 = vadd.f32 %v6527_v7, %v8847_v39  ;;  %v4153_v50 = vor.u32 %v4152_v11, %v4149_v54  ;;  %v9937_v20 = vcombine.low %v8986_v60, %v9008_v10 }
 0x134   : > { %v1191_v45 = vpop.f32.mrf.mxu1  ;;  %v4111_v39 = vsel %vm7175_vm2, %v9182_v17, %v9152_v40  ;;  %v4121_v49 = vsel %vm7175_vm2, %v4116_v31, %v9162_v47  ;;  %v9232_v16 = vsel %vm7486_vm5, %v4702_v2, %v4703_v28  ;;  %v4166_v61 = vshll.u32 %v9205_v35, 16  ;;  %v1657_v60 = vpop.f32.mrf.mxu0  ;;  %v5953_v17 = vld [vmem:[%s7144_s29 + $0xb4] sm:$0xf]  ;;  %v9938_v47 = vld [vmem:[#allocation18_spill] sm:$0xff]  ;;  %v9261_v2 = vld [vmem:[%s7144_s29 + $0xb8] sm:$0xf] }
 0x135   : > { %6865 = vmatmul.mubr.bf16.gmra.mxu0 %v9936_v58  ;;  %v9236_v53 = vadd.f32 %v6575_v8, %v1200_v5  ;;  %v1192_v10 = vadd.f32 %v1191_v45, %v8881_v46  ;;  %v4163_v9 = vor.u32 %v4162_v33, %v9207_v48  ;;  %v4714_v40 = vrot.slane %v9171_v14, 5  ;;  %v9939_v8 = vld [vmem:[#allocation13_spill] sm:$0xff] }
 0x136   : > { %6868 = vmatprep.mubr.bf16.mxu0 %v9937_v20  ;;  %v6530_v23 = vpop.f32.mrf.mxu1  ;;  %6817 = vmatmul.mubr.bf16.gmra.mxu1 %v9938_v47  ;;  %v4135_v31 = vsel %vm7175_vm2, %v4130_v57, %v9168_v44  ;;  %v4145_v28 = vsel %vm7175_vm2, %v4140_v25, %v4144_v18  ;;  %v9250_v46 = vsel %vm7486_vm5, %v6029_v29, %v4707_v12  ;;  %v6579_v11 = vpop.f32.mrf.mxu0  ;;  %v4154_v62 = vrot.slane %v4153_v50, 4  ;;  %v9940_v57 = vld [vmem:[#allocation15_spill] sm:$0xff]  ;;  %v9944_v47 = vld [vmem:[#allocation20_spill] sm:$0xff] }
 0x137   : > { %v9254_v0 = vsel %vm7486_vm5, %v4709_v59, %v4710_v37  ;;  %v9256_v14 = vadd.f32 %v1644_v3, %v1192_v10  ;;  %v1213_v54 = vadd.f32 %v6530_v23, %v9939_v8  ;;  %6820 = vmatprep.mubr.bf16.mxu1 %v9090_v42  ;;  %v6030_v44 = vrot.slane %v6014_v21, 9 }
 0x138   : > { %v1204_v18 = vpop.f32.mrf.mxu1  ;;  %v4168_v6 = vrot.slane %v4166_v61, 5  ;;  %v4717_v12 = vrot.slane %v9205_v35, 5  ;;  %v4171_v29 = vshrl.u32 %v5953_v17, 16  ;;  %v4174_v33 = vshll.u32 %v5953_v17, 16  ;;  %v1660_v25 = vpop.f32.mrf.mxu0 }
 0x139   : > { %v9264_v7 = vadd.f32 %v6578_v38, %v1213_v54  ;;  %v1205_v3 = vadd.f32 %v1204_v18, %v9940_v57  ;;  %v4164_v59 = vrot.slane %v4163_v9, 4  ;;  %v4716_v37 = vrot.slane %v4714_v40, 4  ;;  %v9941_v38 = vld [vmem:[#allocation17_spill] sm:$0xff] }
 0x13a   : > { %v6531_v42 = vpop.f32.mrf.mxu1  ;;  %v9267_v5 = vcombine.low %v4111_v39, %v4121_v49  ;;  %v6060_v58 = vcombine.low %v9218_v63, %v9232_v16  ;;  %v9271_v50 = vcombine.low %v4135_v31, %v4145_v28  ;;  %v4180_v35 = vshll.u32 %v9261_v2, 16  ;;  %v6582_v61 = vpop.f32.mrf.mxu0  ;;  %v5956_v49 = vld [vmem:[%s7144_s29 + $0xc0] sm:$0xf]  ;;  %v9285_v16 = vld [vmem:[%s7144_s29 + $0xc4] sm:$0xf] }
 0x13b   : > { %v9274_v45 = vadd.f32 %v1657_v60, %v1205_v3  ;;  %v1216_v20 = vadd.f32 %v6531_v42, %v9941_v38  ;;  %v9942_v21 = vcombine.low %v9048_v51, %v9069_v55  ;;  %v6061_v39 = vcombine.low %v9250_v46, %v9254_v0  ;;  %v9949_v46 = vld [vmem:[#allocation6_spill] sm:$0xff] }
 0x13c   : > { %v4184_v63 = vshrl.u32 %v9261_v2, 16  ;;  %v1207_v10 = vpop.f32.mrf.mxu1  ;;  %v9943_v60 = vcombine.low %v9098_v13, %v9113_v30  ;;  %v4159_v51 = vsel %vm7175_vm2, %v4154_v62, %v9207_v48  ;;  %v9295_v55 = vsel %vm7486_vm5, %v6030_v44, %v4714_v40  ;;  %v1673_v28 = vpop.f32.mrf.mxu0  ;;  %v9307_v30 = vld [vmem:[%s7144_s29 + $0xbc] sm:$0x1]  ;;  %v6015_v48 = vld [vmem:[%s7144_s29 + $0xb4] sm:$0xe] }
 0x13d   : > { %6869 = vmatmul.mubr.bf16.gmra.mxu0 %v9942_v21  ;;  %v4173_v9 = vrot.slane %v4171_v29, 4  ;;  %v4176_v17 = vrot.slane %v4174_v33, 5  ;;  %v9297_v23 = vadd.f32 %v6579_v11, %v1216_v20  ;;  %v1208_v31 = vadd.f32 %v1207_v10, %v9944_v47  ;;  %v9329_v20 = vld [vmem:[%s7144_s29 + $0xc8] sm:$0x1] }
 0x13e   : > { %6872 = vmatprep.mubr.bf16.mxu0 %v9943_v60  ;;  %v4169_v8 = vsel %vm7175_vm2, %v4164_v59, %v4168_v6  ;;  %v9304_v13 = vsel %vm7486_vm5, %v4716_v37, %v4717_v12  ;;  %v6534_v54 = vpop.f32.mrf.mxu1  ;;  %6821 = vmatmul.mubr.bf16.gmra.mxu1 %v9092_v52  ;;  %v9311_v40 = vrot.slane %v4180_v35, 5  ;;  %v4195_v11 = vshrl.u32 %v5956_v49, 16  ;;  %v6583_v29 = vpop.f32.mrf.mxu0 }
 0x13f   : > { %v4198_v62 = vshll.u32 %v5956_v49, 16  ;;  %v4204_v44 = vshll.u32 %v9285_v16, 16  ;;  %v9314_v18 = vadd.f32 %v1660_v25, %v1208_v31  ;;  %v1229_v6 = vadd.f32 %v6534_v54, %v9032_v43  ;;  %6824 = vmatprep.mubr.bf16.mxu1 %v9148_v22 }
 0x140   : > { %v4186_v12 = vrot.slane %v4184_v63, 4  ;;  %v4208_v33 = vshrl.u32 %v9285_v16, 16  ;;  %v1220_v57 = vpop.f32.mrf.mxu1  ;;  %v4177_v3 = vor.u32 %v4176_v17, %v4173_v9  ;;  %v4190_v52 = vshll.u32 %v9307_v30, 16  ;;  %v1676_v43 = vpop.f32.mrf.mxu0  ;;  %v5959_v9 = vld [vmem:[%s7144_s29 + $0xcc] sm:$0xf] }
 0x141   : > { %v6031_v59 = vrot.slane %v6015_v48, 9  ;;  %v4721_v37 = vrot.slane %v9261_v2, 5  ;;  %v9321_v42 = vadd.f32 %v6582_v61, %v1229_v6  ;;  %v1221_v25 = vadd.f32 %v1220_v57, %v9051_v1  ;;  %v6016_v48 = vld [vmem:[%s7144_s29 + $0xc0] sm:$0xe] }
 0x142   : > { %v9324_v35 = vcombine.low %v4159_v51, %v4169_v8  ;;  %v6062_v22 = vcombine.low %v9295_v55, %v9304_v13  ;;  %v6535_v38 = vpop.f32.mrf.mxu1  ;;  %v4197_v21 = vrot.slane %v4195_v11, 4  ;;  %v4200_v63 = vrot.slane %v4198_v62, 5  ;;  %v6586_v10 = vpop.f32.mrf.mxu0  ;;  %v9351_v8 = vld [vmem:[%s7144_s29 + $0xd0] sm:$0xf] }
 0x143   : > { %v9331_v49 = vrot.slane %v4204_v44, 5  ;;  %v4210_v2 = vrot.slane %v4208_v33, 4  ;;  %v9333_v61 = vadd.f32 %v1673_v28, %v1221_v25  ;;  %v1232_v1 = vadd.f32 %v6535_v38, %v9071_v26 }
 0x144   : > { %v9945_v60 = vcombine.low %v9127_v19, %v9137_v36  ;;  %v4187_v51 = vor.u32 %v4186_v12, %v9311_v40  ;;  %v4724_v55 = vrot.slane %v9307_v30, 5  ;;  %v1223_v17 = vpop.f32.mrf.mxu1  ;;  %v9342_v47 = vrot.slane %v4177_v3, 4  ;;  %v1689_v13 = vpop.f32.mrf.mxu0 }
 0x145   : > { %v9344_v31 = vrot.slane %v4190_v52, 5  ;;  %v9348_v26 = vsel %vm7486_vm5, %v6031_v59, %v4721_v37  ;;  %v4723_v28 = vrot.slane %v4721_v37, 4  ;;  %v9353_v19 = vadd.f32 %v6583_v29, %v1232_v1  ;;  %v9946_v29 = vld [vmem:[#allocation2_spill] sm:$0xff] }
 0x146   : > { %6873 = vmatmul.mubr.bf16.gmra.mxu0 %v9945_v60  ;;  %v1224_v36 = vadd.f32 %v1223_v17, %v9080_v34  ;;  %v4214_v30 = vshll.u32 %v9329_v20, 16  ;;  %v6538_v54 = vpop.f32.mrf.mxu1  ;;  %6825 = vmatmul.mubr.bf16.gmra.mxu1 %v9154_v4  ;;  %v4201_v11 = vor.u32 %v4200_v63, %v4197_v21  ;;  %v4211_v62 = vor.u32 %v4210_v2, %v9331_v49  ;;  %v6587_v57 = vpop.f32.mrf.mxu0 }
 0x147   : > { %6876 = vmatprep.mubr.bf16.mxu0 %v6060_v58  ;;  %v4728_v58 = vrot.slane %v9285_v16, 5  ;;  %v4219_v44 = vshrl.u32 %v5959_v9, 16  ;;  %v4222_v6 = vshll.u32 %v5959_v9, 16  ;;  %v1245_v33 = vadd.f32 %v6538_v54, %v9946_v29  ;;  %6828 = vmatprep.mubr.bf16.mxu1 %v9267_v5 }
 0x148   : > { %v9361_v12 = vadd.f32 %v1676_v43, %v1224_v36  ;;  %v4228_v34 = vshll.u32 %v9351_v8, 16  ;;  %v4232_v3 = vshrl.u32 %v9351_v8, 16  ;;  %v1236_v16 = vpop.f32.mrf.mxu1  ;;  %v4188_v52 = vrot.slane %v4187_v51, 4  ;;  %v9947_v43 = vld [vmem:[#allocation5_spill] sm:$0xff]  ;;  %v1692_v21 = vpop.f32.mrf.mxu0  ;;  %v9948_v36 = vld [vmem:[#allocation4_spill] sm:$0xff] }
 0x149   : > { %v4725_v4 = vsel %vm7486_vm5, %v4723_v28, %v4724_v55  ;;  %v6032_v59 = vrot.slane %v6016_v48, 9  ;;  %v4731_v37 = vrot.slane %v9329_v20, 5  ;;  %v9370_v25 = vadd.f32 %v6586_v10, %v1245_v33  ;;  %v5961_v20 = vld [vmem:[%s7144_s29 + $0xd4] sm:$0x1] }
 0x14a   : > { %v1237_v38 = vadd.f32 %v1236_v16, %v9947_v43  ;;  %v4216_v63 = vrot.slane %v4214_v30, 5  ;;  %v4730_v5 = vrot.slane %v4728_v58, 4  ;;  %v6539_v2 = vpop.f32.mrf.mxu1  ;;  %v4202_v1 = vrot.slane %v4201_v11, 4 }
 0x14b   : > { %v4212_v60 = vrot.slane %v4211_v62, 4  ;;  %v4221_v9 = vrot.slane %v4219_v44, 4  ;;  %v4224_v17 = vrot.slane %v4222_v6, 5  ;;  %v1248_v55 = vadd.f32 %v6539_v2, %v9948_v36  ;;  %v6590_v28 = vpop.f32.mrf.mxu0  ;;  %v6017_v6 = vld [vmem:[%s7144_s29 + $0xcc] sm:$0xe]  ;;  %s6112_s29 = sshll.u32 %s7135_s23, 7 }
 0x14c   : > { %v9373_v51 = vadd.f32 %v1689_v13, %v1237_v38  ;;  %v9380_v10 = vrot.slane %v4228_v34, 5  ;;  %v4234_v30 = vrot.slane %v4232_v3, 4  ;;  %v1239_v48 = vpop.f32.mrf.mxu1  ;;  %v4183_v13 = vsel %vm7175_vm2, %v9342_v47, %v9311_v40  ;;  %s9687_s23 = scalar_lea.vmem %s9800_s2, %s6112_s29 }
 0x14d   : > { %v4193_v54 = vsel %vm7175_vm2, %v4188_v52, %v9344_v31  ;;  %v4735_v11 = vrot.slane %v9351_v8, 5  ;;  %v9390_v62 = vadd.f32 %v6587_v57, %v1248_v55  ;;  %v1240_v0 = vadd.f32 %v1239_v48, %v9949_v46  ;;  %v9950_v57 = vld [vmem:[#allocation8_spill] sm:$0xff] }
 0x14e   : > { %6877 = vmatmul.mubr.bf16.gmra.mxu0 %v6061_v39  ;;  %v1705_v39 = vpop.f32.mrf.mxu0  ;;  %v4729_v44 = vsel %vm7486_vm5, %v6032_v59, %v4728_v58  ;;  %v6542_v29 = vpop.f32.mrf.mxu1  ;;  %6829 = vmatmul.mubr.bf16.gmra.mxu1 %v9271_v50  ;;  %v6063_v40 = vcombine.low %v9348_v26, %v4725_v4  ;;  %v4207_v47 = vsel %vm7175_vm2, %v4202_v1, %v9331_v49  ;;  %v4238_v8 = vshll.u32 %v5961_v20, 16  ;;  %v9953_v48 = vld [vmem:[#allocation12_spill] sm:$0xff] }
 0x14f   : > { %6880 = vmatprep.mubr.bf16.mxu0 %v6062_v22  ;;  %v4732_v22 = vsel %vm7486_vm5, %v4730_v5, %v4731_v37  ;;  %v4225_v31 = vor.u32 %v4224_v17, %v4221_v9  ;;  %v9403_v33 = vadd.f32 %v1692_v21, %v1240_v0  ;;  %v1261_v34 = vadd.f32 %v6542_v29, %v9950_v57  ;;  %v9951_v37 = vld [vmem:[#allocation10_spill] sm:$0xff]  ;;  %v9952_v9 = vld [vmem:[#allocation11_spill] sm:$0xff] }
 0x150   : > { %v6591_v58 = vpop.f32.mrf.mxu0  ;;  %6832 = vmatprep.mubr.bf16.mxu1 %v9324_v35  ;;  %v4217_v3 = vsel %vm7175_vm2, %v4212_v60, %v4216_v63  ;;  %v4235_v50 = vor.u32 %v4234_v30, %v9380_v10  ;;  %v1252_v16 = vpop.f32.mrf.mxu1  ;;  %v6064_v26 = vcombine.low %v4729_v44, %v4732_v22  ;;  %v6033_v52 = vrot.slane %v6017_v6, 9  ;;  %v9954_v44 = vld [vmem:[#allocation14_spill] sm:$0xff] }
 0x151   : > { %v4737_v4 = vrot.slane %v4735_v11, 4  ;;  %v4738_v59 = vrot.slane %v5961_v20, 5  ;;  %v9410_v49 = vadd.f32 %v6590_v28, %v1261_v34  ;;  %v1253_v43 = vadd.f32 %v1252_v16, %v9951_v37  ;;  %v9957_v37 = vld [vmem:[#allocation21_spill] sm:$0xff] }
 0x152   : > { %v1708_v38 = vpop.f32.mrf.mxu0  ;;  %v6543_v21 = vpop.f32.mrf.mxu1  ;;  %v5991_v5 = vcombine.low %v4183_v13, %v4193_v54  ;;  %v5992_v2 = vcombine.low %v4207_v47, %v4217_v3  ;;  %v4226_v1 = vrot.slane %v4225_v31, 4  ;;  %v4236_v17 = vrot.slane %v4235_v50, 4  ;;  %v9955_v47 = vld [vmem:[#allocation16_spill] sm:$0xff] }
 0x153   : > { %v9413_v35 = vadd.f32 %v1705_v39, %v1253_v43  ;;  %v1264_v63 = vadd.f32 %v6543_v21, %v9952_v9  ;;  %v4240_v36 = vrot.slane %v4238_v8, 5  ;;  %v4736_v28 = vsel %vm7486_vm5, %v6033_v52, %v4735_v11 }
 0x154   : > { %v6594_v60 = vpop.f32.mrf.mxu0  ;;  %v1255_v55 = vpop.f32.mrf.mxu1  ;;  %v4739_v20 = vsel %vm7486_vm5, %v4737_v4, %v4738_v59  ;;  %v4231_v0 = vsel %vm7175_vm2, %v4226_v1, %v9380_v10  ;;  %v9956_v10 = vld [vmem:[#allocation19_spill] sm:$0xff] }
 0x155   : > { %v9420_v30 = vadd.f32 %v6591_v58, %v1264_v63  ;;  %v1256_v13 = vadd.f32 %v1255_v55, %v9953_v48  ;;  %v4241_v56 = vsel %vm7175_vm2, %v4236_v17, %v4240_v36  ;;  %v6065_v11 = vcombine.low %v4736_v28, %v4739_v20  ;;  %v9959_v17 = vld [vmem:[#allocation23_spill] sm:$0xff]  ;;  %v9960_v20 = vld [vmem:[#allocation24_spill] sm:$0xff] }
 0x156   : > { %6881 = vmatmul.mubr.bf16.gmra.mxu0 %v6063_v40  ;;  %v1721_v54 = vpop.f32.mrf.mxu0  ;;  %v6546_v46 = vpop.f32.mrf.mxu1  ;;  %6833 = vmatmul.mubr.bf16.gmra.mxu1 %v5991_v5  ;;  %v5993_v34 = vcombine.low %v4231_v0, %v4241_v56  ;;  %v9961_v0 = vld [vmem:[#allocation25_spill] sm:$0xff] }
 0x157   : > { %6884 = vmatprep.mubr.bf16.mxu0 %v6064_v26  ;;  %v9426_v39 = vadd.f32 %v1708_v38, %v1256_v13  ;;  %v1277_v22 = vadd.f32 %v6546_v46, %v9954_v44  ;;  %6836 = vmatprep.mubr.bf16.mxu1 %v5992_v2  ;;  %v9958_v2 = vld [vmem:[#allocation22_spill] sm:$0xff] }
 0x158   : > { %v6595_v6 = vpop.f32.mrf.mxu0  ;;  %v1268_v29 = vpop.f32.mrf.mxu1 }
 0x159   : > { %v9431_v40 = vadd.f32 %v6594_v60, %v1277_v22  ;;  %v1269_v31 = vadd.f32 %v1268_v29, %v9955_v47 }
 0x15a   : > { %v1724_v8 = vpop.f32.mrf.mxu0  ;;  %v6547_v57 = vpop.f32.mrf.mxu1 }
 0x15b   : > { %v9434_v58 = vadd.f32 %v1721_v54, %v1269_v31  ;;  %v1280_v3 = vadd.f32 %v6547_v57, %v9956_v10  ;;  %v9963_v57 = vld [vmem:[#allocation27_spill] sm:$0xff] }
 0x15c   : > { %v6598_v50 = vpop.f32.mrf.mxu0  ;;  %v1271_v16 = vpop.f32.mrf.mxu1 }
 0x15d   : > { %v9437_v26 = vadd.f32 %v6595_v6, %v1280_v3  ;;  %v1272_v27 = vadd.f32 %v1271_v16, %v9027_v32 }
 0x15e   : > { %6885 = vmatmul.mubr.bf16.gmra.mxu0 %v6065_v11  ;;  %v1737_v52 = vpop.f32.mrf.mxu0  ;;  %v6550_v4 = vpop.f32.mrf.mxu1  ;;  %6837 = vmatmul.mubr.bf16.gmra.mxu1 %v5993_v34  ;;  %v9962_v11 = vld [vmem:[#allocation26_spill] sm:$0xff] }
 0x15f   : > { %v9440_v59 = vadd.f32 %v1724_v8, %v1272_v27  ;;  %v1293_v43 = vadd.f32 %v6550_v4, %v9957_v37 }
 0x160   : > { %v6599_v38 = vpop.f32.mrf.mxu0  ;;  %v1284_v21 = vpop.f32.mrf.mxu1 }
 0x161   : > { %v9443_v5 = vadd.f32 %v6598_v50, %v1293_v43  ;;  %v1285_v1 = vadd.f32 %v1284_v21, %v9958_v2 }
 0x162   : > { %v1740_v9 = vpop.f32.mrf.mxu0  ;;  %v6551_v63 = vpop.f32.mrf.mxu1 }
 0x163   : > { %v9446_v60 = vadd.f32 %v1737_v52, %v1285_v1  ;;  %v1296_v36 = vadd.f32 %v6551_v63, %v9959_v17 }
 0x164   : > { %v6666_v32 = vpop.f32.mrf.mxu0  ;;  %v1287_v55 = vpop.f32.mrf.mxu1 }
 0x165   : > { %v9449_v28 = vadd.f32 %v6599_v38, %v1296_v36  ;;  %v1288_v48 = vadd.f32 %v1287_v55, %v9960_v20 }
 0x166   : > { %v2766_v13 = vpop.f32.mrf.mxu0  ;;  %v6618_v54 = vpop.f32.mrf.mxu1 }
 0x167   : > { %v9452_v46 = vadd.f32 %v1740_v9, %v1288_v48  ;;  %v2141_v44 = vadd.f32 %v6618_v54, %v9961_v0 }
 0x168   : > { %v6667_v22 = vpop.f32.mrf.mxu0  ;;  %v2012_v6 = vpop.f32.mrf.mxu1 }
 0x169   : > { %v9455_v56 = vadd.f32 %v6666_v32, %v2141_v44  ;;  %v2139_v29 = vadd.f32 %v2012_v6, %v9962_v11 }
 0x16a   : > { %v2769_v47 = vpop.f32.mrf.mxu0  ;;  %v6619_v31 = vpop.f32.mrf.mxu1 }
 0x16b   : > { %v9458_v8 = vadd.f32 %v2766_v13, %v2139_v29  ;;  %v2142_v34 = vadd.f32 %v6619_v31, %v9963_v57 }
 0x16c   : > { %v6670_v10 = vpop.f32.mrf.mxu0  ;;  %v2015_v3 = vpop.f32.mrf.mxu1 }
 0x16d   : > { %v9461_v50 = vadd.f32 %v6667_v22, %v2142_v34  ;;  %v2140_v16 = vadd.f32 %v2015_v3, %v9197_v24 }
 0x16e   : > { %v2782_v27 = vpop.f32.mrf.mxu0  ;;  %v6622_v52 = vpop.f32.mrf.mxu1 }
 0x16f   : > { %v9464_v4 = vadd.f32 %v2769_v47, %v2140_v16  ;;  %v2145_v37 = vadd.f32 %v6622_v52, %v9201_v41 }
 0x170   : > { %v6671_v43 = vpop.f32.mrf.mxu0  ;;  %v2028_v38 = vpop.f32.mrf.mxu1 }
 0x171   : > { %v9467_v21 = vadd.f32 %v6670_v10, %v2145_v37  ;;  %v2143_v2 = vadd.f32 %v2028_v38, %v9210_v15 }
 0x172   : > { %v2785_v1 = vpop.f32.mrf.mxu0  ;;  %v6623_v9 = vpop.f32.mrf.mxu1 }
 0x173   : > { %v9470_v63 = vadd.f32 %v2782_v27, %v2143_v2  ;;  %v2146_v17 = vadd.f32 %v6623_v9, %v9236_v53 }
 0x174   : > { %v6674_v36 = vpop.f32.mrf.mxu0  ;;  %v2031_v24 = vpop.f32.mrf.mxu1 }
 0x175   : > { %v9473_v32 = vadd.f32 %v6671_v43, %v2146_v17  ;;  %v2144_v55 = vadd.f32 %v2031_v24, %v9256_v14 }
 0x176   : > { %v2798_v20 = vpop.f32.mrf.mxu0  ;;  %v6626_v41 = vpop.f32.mrf.mxu1 }
 0x177   : > { %v9476_v48 = vadd.f32 %v2785_v1, %v2144_v55  ;;  %v2149_v13 = vadd.f32 %v6626_v41, %v9264_v7 }
 0x178   : > { %v6675_v54 = vpop.f32.mrf.mxu0  ;;  %v2044_v15 = vpop.f32.mrf.mxu1 }
 0x179   : > { %v9479_v0 = vadd.f32 %v6674_v36, %v2149_v13  ;;  %v2147_v44 = vadd.f32 %v2044_v15, %v9274_v45 }
 0x17a   : > { %v2801_v22 = vpop.f32.mrf.mxu0  ;;  %v6627_v53 = vpop.f32.mrf.mxu1 }
 0x17b   : > { %v9482_v6 = vadd.f32 %v2798_v20, %v2147_v44  ;;  %v2150_v11 = vadd.f32 %v6627_v53, %v9297_v23 }
 0x17c   : > { %v6678_v29 = vpop.f32.mrf.mxu0  ;;  %v2047_v14 = vpop.f32.mrf.mxu1 }
 0x17d   : > { %v9485_v47 = vadd.f32 %v6675_v54, %v2150_v11  ;;  %v2148_v31 = vadd.f32 %v2047_v14, %v9314_v18 }
 0x17e   : > { %v2814_v57 = vpop.f32.mrf.mxu0  ;;  %v6630_v7 = vpop.f32.mrf.mxu1 }
 0x17f   : > { %v9488_v34 = vadd.f32 %v2801_v22, %v2148_v31  ;;  %v2153_v10 = vadd.f32 %v6630_v7, %v9321_v42 }
 0x180   : > { %v6679_v3 = vpop.f32.mrf.mxu0  ;;  %v2060_v45 = vpop.f32.mrf.mxu1 }
 0x181   : > { %v9491_v16 = vadd.f32 %v6678_v29, %v2153_v10  ;;  %v2151_v27 = vadd.f32 %v2060_v45, %v9333_v61 }
 0x182   : > { %v2817_v52 = vpop.f32.mrf.mxu0  ;;  %v6631_v23 = vpop.f32.mrf.mxu1 }
 0x183   : > { %v9494_v37 = vadd.f32 %v2814_v57, %v2151_v27  ;;  %v2154_v43 = vadd.f32 %v6631_v23, %v9353_v19 }
 0x184   : > { %v6682_v38 = vpop.f32.mrf.mxu0  ;;  %v2063_v18 = vpop.f32.mrf.mxu1 }
 0x185   : > { %v9497_v2 = vadd.f32 %v6679_v3, %v2154_v43  ;;  %v2152_v1 = vadd.f32 %v2063_v18, %v9361_v12 }
 0x186   : > { %v2830_v9 = vpop.f32.mrf.mxu0  ;;  %v6634_v42 = vpop.f32.mrf.mxu1 }
 0x187   : > { %v9500_v17 = vadd.f32 %v2817_v52, %v2152_v1  ;;  %v2157_v36 = vadd.f32 %v6634_v42, %v9370_v25 }
 0x188   : > { %v6683_v24 = vpop.f32.mrf.mxu0  ;;  %v2076_v61 = vpop.f32.mrf.mxu1 }
 0x189   : > { %v9503_v55 = vadd.f32 %v6682_v38, %v2157_v36  ;;  %v2155_v20 = vadd.f32 %v2076_v61, %v9373_v51 }
 0x18a   : > { %v2833_v41 = vpop.f32.mrf.mxu0  ;;  %v6635_v19 = vpop.f32.mrf.mxu1 }
 0x18b   : > { %v9506_v13 = vadd.f32 %v2830_v9, %v2155_v20  ;;  %v2158_v54 = vadd.f32 %v6635_v19, %v9390_v62 }
 0x18c   : > { %v6686_v15 = vpop.f32.mrf.mxu0  ;;  %v2079_v12 = vpop.f32.mrf.mxu1 }
 0x18d   : > { %v9509_v44 = vadd.f32 %v6683_v24, %v2158_v54  ;;  %v2156_v22 = vadd.f32 %v2079_v12, %v9403_v33 }
 0x18e   : > { %v2846_v53 = vpop.f32.mrf.mxu0  ;;  %v6638_v25 = vpop.f32.mrf.mxu1 }
 0x18f   : > { %v9512_v11 = vadd.f32 %v2833_v41, %v2156_v22  ;;  %v2161_v29 = vadd.f32 %v6638_v25, %v9410_v49 }
 0x190   : > { %v6687_v14 = vpop.f32.mrf.mxu0  ;;  %v2092_v51 = vpop.f32.mrf.mxu1 }
 0x191   : > { %v9515_v31 = vadd.f32 %v6686_v15, %v2161_v29  ;;  %v2159_v57 = vadd.f32 %v2092_v51, %v9413_v35 }
 0x192   : > { %v2849_v7 = vpop.f32.mrf.mxu0  ;;  %v6639_v62 = vpop.f32.mrf.mxu1 }
 0x193   : > { %v9518_v10 = vadd.f32 %v2846_v53, %v2159_v57  ;;  %v2162_v3 = vadd.f32 %v6639_v62, %v9420_v30 }
 0x194   : > { %v6690_v45 = vpop.f32.mrf.mxu0  ;;  %v2095_v33 = vpop.f32.mrf.mxu1 }
 0x195   : > { %9964 = vst [vmem:[#allocation3_spill] sm:$0xff] %v9518_v10  ;;  %v9521_v27 = vadd.f32 %v6687_v14, %v2162_v3  ;;  %v2160_v52 = vadd.f32 %v2095_v33, %v9426_v39 }
 0x196   : > { %v2862_v23 = vpop.f32.mrf.mxu0  ;;  %v6642_v49 = vpop.f32.mrf.mxu1 }
 0x197   : > { %9965 = vst [vmem:[#allocation7_spill] sm:$0xff] %v9521_v27  ;;  %v9524_v43 = vadd.f32 %v2849_v7, %v2160_v52  ;;  %v2165_v38 = vadd.f32 %v6642_v49, %v9431_v40 }
 0x198   : > { %v6691_v18 = vpop.f32.mrf.mxu0  ;;  %v2108_v35 = vpop.f32.mrf.mxu1 }
 0x199   : > { %9966 = vst [vmem:[#allocation9_spill] sm:$0xff] %v9524_v43  ;;  %v9527_v1 = vadd.f32 %v6690_v45, %v2165_v38  ;;  %v2163_v9 = vadd.f32 %v2108_v35, %v9434_v58 }
 0x19a   : > { %v2865_v42 = vpop.f32.mrf.mxu0  ;;  %v6643_v30 = vpop.f32.mrf.mxu1 }
 0x19b   : > { %v9530_v36 = vadd.f32 %v2862_v23, %v2163_v9  ;;  %v2166_v24 = vadd.f32 %v6643_v30, %v9437_v26 }
 0x19c   : > { %v6694_v61 = vpop.f32.mrf.mxu0  ;;  %v2111_v39 = vpop.f32.mrf.mxu1 }
 0x19d   : > { %9967 = vst [vmem:[#allocation18_spill] sm:$0xff] %v9530_v36  ;;  %v9533_v20 = vadd.f32 %v6691_v18, %v2166_v24  ;;  %v2164_v41 = vadd.f32 %v2111_v39, %v9440_v59 }
 0x19e   : > { %v2878_v19 = vpop.f32.mrf.mxu0  ;;  %v6646_v40 = vpop.f32.mrf.mxu1 }
 0x19f   : > { %9968 = vst [vmem:[#allocation13_spill] sm:$0xff] %v9533_v20  ;;  %v9536_v54 = vadd.f32 %v2865_v42, %v2164_v41  ;;  %v2169_v15 = vadd.f32 %v6646_v40, %v9443_v5 }
 0x1a0   : > { %v6695_v12 = vpop.f32.mrf.mxu0  ;;  %v2124_v58 = vpop.f32.mrf.mxu1 }
 0x1a1   : > { %9969 = vst [vmem:[#allocation15_spill] sm:$0xff] %v9536_v54  ;;  %v9539_v22 = vadd.f32 %v6694_v61, %v2169_v15  ;;  %v2167_v53 = vadd.f32 %v2124_v58, %v9446_v60 }
 0x1a2   : > { %v2881_v25 = vpop.f32.mrf.mxu0  ;;  %v6647_v26 = vpop.f32.mrf.mxu1 }
 0x1a3   : > { %v9542_v29 = vadd.f32 %v2878_v19, %v2167_v53  ;;  %v2170_v14 = vadd.f32 %v6647_v26, %v9449_v28 }
 0x1a4   : > { %v6762_v51 = vpop.f32.mrf.mxu0  ;;  %v2127_v59 = vpop.f32.mrf.mxu1 }
 0x1a5   : > { %9970 = vst [vmem:[#allocation17_spill] sm:$0xff] %v9542_v29  ;;  %v9545_v57 = vadd.f32 %v6695_v12, %v2170_v14  ;;  %v2168_v7 = vadd.f32 %v2127_v59, %v9452_v46 }
 0x1a6   : > { %v3651_v62 = vpop.f32.mrf.mxu0  ;;  %v6714_v5 = vpop.f32.mrf.mxu1 }
 0x1a7   : > { %9971 = vst [vmem:[#allocation20_spill] sm:$0xff] %v9545_v57  ;;  %v9548_v3 = vadd.f32 %v2881_v25, %v2168_v7  ;;  %v3393_v45 = vadd.f32 %v6714_v5, %v9455_v56 }
 0x1a8   : > { %v9551_v33 = vpop.f32.mrf.mxu0  ;;  %v3264_v60 = vpop.f32.mrf.mxu1 }
 0x1a9   : > { %9972 = vst [vmem:[#allocation2_spill] sm:$0xff] %v9548_v3  ;;  %v9553_v52 = vadd.f32 %v6762_v51, %v3393_v45  ;;  %v3391_v23 = vadd.f32 %v3264_v60, %v9458_v8 }
 0x1aa   : > { %v9556_v28 = vpop.f32.mrf.mxu0  ;;  %v9558_v49 = vpop.f32.mrf.mxu1 }
 0x1ab   : > { %v9560_v38 = vadd.f32 %v3651_v62, %v3391_v23 }
 0x1ac   : > { %v6766_v46 = vpop.f32.mrf.mxu0  ;;  %v9562_v18 = vpop.f32.mrf.mxu1 }
 0x1ae   : > { %v9564_v35 = vpop.f32.mrf.mxu0  ;;  %v6718_v9 = vpop.f32.mrf.mxu1 }
 0x1af   : > { %v3397_v56 = vadd.f32 %v6718_v9, %v9467_v21 }
 0x1b0   : > { %v9567_v42 = vpop.f32.mrf.mxu0  ;;  %v9569_v30 = vpop.f32.mrf.mxu1 }
 0x1b1   : > { %v9571_v24 = vadd.f32 %v6766_v46, %v3397_v56 }
 0x1b2   : > { %v9573_v8 = vpop.f32.mrf.mxu0  ;;  %v9575_v61 = vpop.f32.mrf.mxu1 }
 0x1b4   : > { %v6770_v39 = vpop.f32.mrf.mxu0  ;;  %v9577_v41 = vpop.f32.mrf.mxu1 }
 0x1b6   : > { %v9579_v19 = vpop.f32.mrf.mxu0  ;;  %v6722_v40 = vpop.f32.mrf.mxu1 }
 0x1b7   : > { %v3401_v15 = vadd.f32 %v6722_v40, %v9479_v0 }
 0x1b8   : > { %v9582_v12 = vpop.f32.mrf.mxu0  ;;  %v9584_v21 = vpop.f32.mrf.mxu1 }
 0x1b9   : > { %v9586_v58 = vadd.f32 %v6770_v39, %v3401_v15 }
 0x1ba   : > { %v9588_v53 = vpop.f32.mrf.mxu0  ;;  %v9590_v25 = vpop.f32.mrf.mxu1 }
 0x1bc   : > { %v6774_v26 = vpop.f32.mrf.mxu0  ;;  %v9592_v14 = vpop.f32.mrf.mxu1 }
 0x1be   : > { %v9594_v51 = vpop.f32.mrf.mxu0  ;;  %v6726_v59 = vpop.f32.mrf.mxu1 }
 0x1bf   : > { %v3405_v7 = vadd.f32 %v6726_v59, %v9491_v16 }
 0x1c0   : > { %v9597_v62 = vpop.f32.mrf.mxu0  ;;  %v9599_v0 = vpop.f32.mrf.mxu1 }
 0x1c1   : > { %v9601_v5 = vadd.f32 %v6774_v26, %v3405_v7 }
 0x1c2   : > { %v9603_v45 = vpop.f32.mrf.mxu0  ;;  %v9605_v60 = vpop.f32.mrf.mxu1 }
 0x1c4   : > { %v6778_v23 = vpop.f32.mrf.mxu0  ;;  %v9607_v46 = vpop.f32.mrf.mxu1 }
 0x1c6   : > { %v9609_v9 = vpop.f32.mrf.mxu0  ;;  %v6730_v56 = vpop.f32.mrf.mxu1 }
 0x1c7   : > { %v3409_v39 = vadd.f32 %v6730_v56, %v9503_v55 }
 0x1c8   : > { %v9612_v40 = vpop.f32.mrf.mxu0  ;;  %v9614_v16 = vpop.f32.mrf.mxu1 }
 0x1c9   : > { %v9616_v15 = vadd.f32 %v6778_v23, %v3409_v39 }
 0x1ca   : > { %v9618_v26 = vpop.f32.mrf.mxu0  ;;  %v9620_v59 = vpop.f32.mrf.mxu1 }
 0x1cb   : > { %9973 = vst [vmem:[#allocation5_spill] sm:$0xff] %v9618_v26 }
 0x1cc   : > { %v6782_v7 = vpop.f32.mrf.mxu0  ;;  %v9622_v3 = vpop.f32.mrf.mxu1 }
 0x1ce   : > { %v9624_v57 = vpop.f32.mrf.mxu0  ;;  %v6734_v29 = vpop.f32.mrf.mxu1 }
 0x1cf   : > { %9974 = vst [vmem:[#allocation4_spill] sm:$0xff] %v9624_v57  ;;  %v3413_v54 = vadd.f32 %v6734_v29, %v9515_v31 }
 0x1d0   : > { %v9627_v20 = vpop.f32.mrf.mxu0  ;;  %v9629_v55 = vpop.f32.mrf.mxu1 }
 0x1d1   : > { %9975 = vst [vmem:[#allocation6_spill] sm:$0xff] %v9627_v20  ;;  %v9631_v56 = vadd.f32 %v6782_v7, %v3413_v54 }
 0x1d2   : > { %v9633_v23 = vpop.f32.mrf.mxu0  ;;  %v9635_v39 = vpop.f32.mrf.mxu1 }
 0x1d3   : > { %9976 = vst [vmem:[#allocation8_spill] sm:$0xff] %v9631_v56  ;;  %9977 = vst [vmem:[#allocation10_spill] sm:$0xff] %v9633_v23 }
 0x1d4   : > { %9978 = vst [vmem:[#allocation11_spill] sm:$0xff] %v9635_v39  ;;  %v6786_v36 = vpop.f32.mrf.mxu0  ;;  %v9637_v43 = vpop.f32.mrf.mxu1 }
 0x1d5   : > { %9979 = vst [vmem:[#allocation12_spill] sm:$0xff] %v9637_v43 }
 0x1d6   : > { %v9639_v27 = vpop.f32.mrf.mxu0  ;;  %v6738_v10 = vpop.f32.mrf.mxu1 }
 0x1d7   : > { %9980 = vst [vmem:[#allocation14_spill] sm:$0xff] %v9639_v27  ;;  %v3417_v57 = vadd.f32 %v6738_v10, %v9527_v1 }
 0x1d8   : > { %v9642_v26 = vpop.f32.mrf.mxu0  ;;  %v9644_v31 = vpop.f32.mrf.mxu1 }
 0x1d9   : > { %9981 = vst [vmem:[#allocation16_spill] sm:$0xff] %v9642_v26  ;;  %v9646_v29 = vadd.f32 %v6786_v36, %v3417_v57 }
 0x1da   : > { %v9648_v54 = vpop.f32.mrf.mxu0  ;;  %v9650_v7 = vpop.f32.mrf.mxu1 }
 0x1db   : > { %9982 = vst [vmem:[#allocation19_spill] sm:$0xff] %v9646_v29  ;;  %9983 = vst [vmem:[#allocation21_spill] sm:$0xff] %v9648_v54 }
 0x1dc   : > { %9984 = vst [vmem:[#allocation22_spill] sm:$0xff] %v9650_v7  ;;  %v6790_v23 = vpop.f32.mrf.mxu0  ;;  %v9652_v56 = vpop.f32.mrf.mxu1 }
 0x1dd   : > { %9985 = vst [vmem:[#allocation23_spill] sm:$0xff] %v9652_v56 }
 0x1de   : > { %v9654_v20 = vpop.f32.mrf.mxu0  ;;  %v6742_v43 = vpop.f32.mrf.mxu1 }
 0x1df   : > { %9986 = vst [vmem:[#allocation24_spill] sm:$0xff] %v9654_v20  ;;  %v3421_v27 = vadd.f32 %v6742_v43, %v9539_v22  ;;  %v3394_v20 = vadd.f32 %v9558_v49, %v9461_v50  ;;  %v3392_v43 = vadd.f32 %v9562_v18, %v9464_v4  ;;  %v3395_v49 = vadd.f32 %v9569_v30, %v9470_v63 }
 0x1e0   : > { %v9657_v39 = vpop.f32.mrf.mxu0  ;;  %v9659_v10 = vpop.f32.mrf.mxu1  ;;  %v3398_v4 = vadd.f32 %v9575_v61, %v9473_v32 }
 0x1e1   : > { %9987 = vst [vmem:[#allocation25_spill] sm:$0xff] %v9657_v39  ;;  %9988 = vst [vmem:[#allocation26_spill] sm:$0xff] %v9659_v10  ;;  %v9661_v1 = vadd.f32 %v6790_v23, %v3421_v27  ;;  %v3781_v27 = vadd.f32 %v9551_v33, %v3394_v20  ;;  %v3782_v32 = vadd.f32 %v9564_v35, %v3395_v49 }
 0x1e2   : > { %v9663_v36 = vpop.f32.mrf.mxu0  ;;  %v9665_v57 = vpop.f32.mrf.mxu1  ;;  %v3785_v61 = vadd.f32 %v9567_v42, %v3398_v4  ;;  %v3402_v49 = vadd.f32 %v9590_v25, %v9485_v47 }
 0x1e3   : > { %9989 = vst [vmem:[#allocation27_spill] sm:$0xff] %v9661_v1  ;;  %9990 = vst [vmem:[#allocation28_spill] sm:$0xff] %v9663_v36 }
 0x1e4   : > { %9991 = vst [vmem:[#allocation29_spill] sm:$0xff] %v9665_v57  ;;  %v9667_v29 = vpop.f32.mrf.mxu1 }
 0x1e5   : > { %v6858_v54 = vpop.f32.mrf.mxu0  ;;  %9992 = vst [vmem:[#allocation30_spill] sm:$0xff] %v9667_v29  ;;  %v3779_v29 = vadd.f32 %v9556_v28, %v3392_v43 }
 0x1e6   : > { %v6810_v56 = vpop.f32.mrf.mxu1 }
 0x1e7   : > { %v4903_v26 = vpop.f32.mrf.mxu0  ;;  %v4534_v23 = vadd.f32 %v6810_v56, %v9553_v52 }
 0x1e8   : > { %v4405_v39 = vpop.f32.mrf.mxu1 }
 0x1e9   : > { %v6859_v22 = vpop.f32.mrf.mxu0  ;;  %v4532_v36 = vadd.f32 %v4405_v39, %v9560_v38  ;;  %v5032_v7 = vadd.f32 %v6858_v54, %v4534_v23  ;;  %v3396_v38 = vadd.f32 %v9577_v41, %v9476_v48 }
 0x1ea   : > { %v6811_v57 = vpop.f32.mrf.mxu1 }
 0x1eb   : > { %v4906_v1 = vpop.f32.mrf.mxu0  ;;  %v4535_v10 = vadd.f32 %v6811_v57, %v3781_v27  ;;  %v5030_v20 = vadd.f32 %v4903_v26, %v4532_v36  ;;  %v3783_v57 = vadd.f32 %v9573_v8, %v3396_v38  ;;  %v5261_v27 = vmul.f32 %v5032_v7, %v5032_v7 }
 0x1ec   : > { %v4408_v18 = vpop.f32.mrf.mxu1 }
 0x1ed   : > { %v6862_v50 = vpop.f32.mrf.mxu0  ;;  %v5033_v33 = vadd.f32 %v6859_v22, %v4535_v10  ;;  %v4533_v52 = vadd.f32 %v4408_v18, %v3779_v29  ;;  %v5259_v54 = vmul.f32 %v5030_v20, %v5030_v20 }
 0x1ee   : > { %v6814_v28 = vpop.f32.mrf.mxu1 }
 0x1ef   : > { %v4919_v56 = vpop.f32.mrf.mxu0  ;;  %v6153_v63 = vpack.c.bf16 %v5033_v33, %v5032_v7  ;;  %v5031_v30 = vadd.f32 %v4906_v1, %v4533_v52  ;;  %v4538_v26 = vadd.f32 %v6814_v28, %v9571_v24  ;;  %v3399_v1 = vadd.f32 %v9584_v21, %v9482_v6 }
 0x1f0   : > { %v4421_v29 = vpop.f32.mrf.mxu1  ;;  %v5262_v4 = vmul.f32 %v5033_v33, %v5033_v33 }
 0x1f1   : > { %v6863_v39 = vpop.f32.mrf.mxu0  ;;  %6225 = vst [vmem:[%s9687_s23 + $0x8] sm:$0xff] %v6153_v63   ;;  %v6148_v48 = vpack.c.bf16 %v5031_v30, %v5030_v20  ;;  %v5222_v41 = vadd.f32 %v5031_v30, %v5030_v20  ;;  %v5260_v10 = vmul.f32 %v5031_v30, %v5031_v30  ;;  %v4536_v43 = vadd.f32 %v4421_v29, %v3782_v32 }
 0x1f2   : > { %v6815_v22 = vpop.f32.mrf.mxu1  ;;  %v5036_v18 = vadd.f32 %v6862_v50, %v4538_v26  ;;  %v3786_v63 = vadd.f32 %v9579_v19, %v3399_v1  ;;  %v3789_v26 = vadd.f32 %v9582_v12, %v3402_v49 }
 0x1f3   : > { %v4922_v36 = vpop.f32.mrf.mxu0  ;;  %6149 = vst [vmem:[%s9687_s23] sm:$0xff] %v6148_v48   ;;  %v5223_v35 = vadd.f32 %v5222_v41, %v5032_v7  ;;  %v5291_v42 = vadd.f32 %v5260_v10, %v5259_v54  ;;  %v4539_v23 = vadd.f32 %v6815_v22, %v3785_v61  ;;  %v5034_v20 = vadd.f32 %v4919_v56, %v4536_v43 }
 0x1f4   : > { %v4424_v52 = vpop.f32.mrf.mxu1  ;;  %v3400_v7 = vadd.f32 %v9592_v14, %v9488_v34  ;;  %v5265_v43 = vmul.f32 %v5036_v18, %v5036_v18 }
 0x1f5   : > { %v6866_v24 = vpop.f32.mrf.mxu0  ;;  %v5292_v28 = vadd.f32 %v5291_v42, %v5261_v27  ;;  %v5224_v8 = vadd.f32 %v5223_v35, %v5033_v33  ;;  %v5037_v38 = vadd.f32 %v6863_v39, %v4539_v23  ;;  %v4537_v6 = vadd.f32 %v4424_v52, %v3783_v57 }
 0x1f6   : > { %v6818_v30 = vpop.f32.mrf.mxu1  ;;  %v5263_v61 = vmul.f32 %v5034_v20, %v5034_v20  ;;  %v3787_v10 = vadd.f32 %v9588_v53, %v3400_v7  ;;  %v3403_v57 = vadd.f32 %v9599_v0, %v9494_v37 }
 0x1f7   : > { %v4935_v21 = vpop.f32.mrf.mxu0  ;;  %v5225_v32 = vadd.f32 %v5224_v8, %v5034_v20  ;;  %v5293_v29 = vadd.f32 %v5292_v28, %v5262_v4  ;;  %v6163_v47 = vpack.c.bf16 %v5037_v38, %v5036_v18  ;;  %v5035_v50 = vadd.f32 %v4922_v36, %v4537_v6 }
 0x1f8   : > { %v4437_v56 = vpop.f32.mrf.mxu1  ;;  %v4542_v39 = vadd.f32 %v6818_v30, %v9586_v58  ;;  %v3406_v36 = vadd.f32 %v9605_v60, %v9497_v2  ;;  %v5266_v53 = vmul.f32 %v5037_v38, %v5037_v38  ;;  %v3790_v0 = vadd.f32 %v9594_v51, %v3403_v57 }
 0x1f9   : > { %v6867_v25 = vpop.f32.mrf.mxu0  ;;  %v5294_v33 = vadd.f32 %v5293_v29, %v5263_v61  ;;  %6227 = vst [vmem:[%s9687_s23 + $0x18] sm:$0xff] %v6163_v47   ;;  %v4540_v54 = vadd.f32 %v4437_v56, %v3786_v63  ;;  %v6158_v48 = vpack.c.bf16 %v5035_v50, %v5034_v20  ;;  %v5226_v41 = vadd.f32 %v5225_v32, %v5035_v50 }
 0x1fa   : > { %v5264_v34 = vmul.f32 %v5035_v50, %v5035_v50  ;;  %v6819_v14 = vpop.f32.mrf.mxu1  ;;  %v5040_v42 = vadd.f32 %v6866_v24, %v4542_v39  ;;  %v3404_v2 = vadd.f32 %v9607_v46, %v9500_v17  ;;  %v3793_v8 = vadd.f32 %v9597_v62, %v3406_v36 }
 0x1fb   : > { %v4938_v19 = vpop.f32.mrf.mxu0  ;;  %v4543_v12 = vadd.f32 %v6819_v14, %v3789_v26  ;;  %6226 = vst [vmem:[%s9687_s23 + $0x10] sm:$0xff] %v6158_v48   ;;  %v5227_v22 = vadd.f32 %v5226_v41, %v5036_v18  ;;  %v5038_v27 = vadd.f32 %v4935_v21, %v4540_v54  ;;  %v3407_v62 = vadd.f32 %v9614_v16, %v9506_v13 }
 0x1fc   : > { %v5295_v58 = vadd.f32 %v5294_v33, %v5264_v34  ;;  %v4440_v35 = vpop.f32.mrf.mxu1  ;;  %v3791_v46 = vadd.f32 %v9603_v45, %v3404_v2  ;;  %v3410_v47 = vadd.f32 %v9620_v59, %v9509_v44  ;;  %v5269_v56 = vmul.f32 %v5040_v42, %v5040_v42 }
 0x1fd   : > { %v6870_v1 = vpop.f32.mrf.mxu0  ;;  %v5041_v23 = vadd.f32 %v6867_v25, %v4543_v12  ;;  %v4541_v49 = vadd.f32 %v4440_v35, %v3787_v10  ;;  %v5228_v52 = vadd.f32 %v5227_v22, %v5037_v38  ;;  %v5267_v24 = vmul.f32 %v5038_v27, %v5038_v27 }
 0x1fe   : > { %v5296_v20 = vadd.f32 %v5295_v58, %v5265_v43  ;;  %v6822_v37 = vpop.f32.mrf.mxu1  ;;  %v3794_v16 = vadd.f32 %v9609_v9, %v3407_v62  ;;  %v3408_v44 = vadd.f32 %v9622_v3, %v9512_v11  ;;  %v3797_v36 = vadd.f32 %v9612_v40, %v3410_v47  ;;  %v9993_v3 = vld [vmem:[#allocation5_spill] sm:$0xff] }
 0x1ff   : > { %v4951_v4 = vpop.f32.mrf.mxu0  ;;  %v6173_v60 = vpack.c.bf16 %v5041_v23, %v5040_v42  ;;  %v5039_v28 = vadd.f32 %v4938_v19, %v4541_v49  ;;  %v5229_v6 = vadd.f32 %v5228_v52, %v5038_v27  ;;  %v4546_v38 = vadd.f32 %v6822_v37, %v9601_v5  ;;  %v9996_v52 = vld [vmem:[#allocation11_spill] sm:$0xff] }
 0x200   : > { %v5297_v21 = vadd.f32 %v5296_v20, %v5266_v53  ;;  %v4453_v63 = vpop.f32.mrf.mxu1  ;;  %v5270_v45 = vmul.f32 %v5041_v23, %v5041_v23  ;;  %v9994_v53 = vld [vmem:[#allocation3_spill] sm:$0xff] }
 0x201   : > { %v6871_v18 = vpop.f32.mrf.mxu0  ;;  %6229 = vst [vmem:[%s9687_s23 + $0x28] sm:$0xff] %v6173_v60   ;;  %v6168_v7 = vpack.c.bf16 %v5039_v28, %v5038_v27  ;;  %v5268_v30 = vmul.f32 %v5039_v28, %v5039_v28  ;;  %v4544_v32 = vadd.f32 %v4453_v63, %v3790_v0  ;;  %v5230_v29 = vadd.f32 %v5229_v6, %v5039_v28  ;;  %v9995_v20 = vld [vmem:[#allocation7_spill] sm:$0xff] }
 0x202   : > { %v5298_v61 = vadd.f32 %v5297_v21, %v5267_v24  ;;  %v6823_v17 = vpop.f32.mrf.mxu1  ;;  %v5044_v54 = vadd.f32 %v6870_v1, %v4546_v38  ;;  %v3411_v40 = vadd.f32 %v9629_v55, %v9994_v53  ;;  %v3414_v37 = vadd.f32 %v9996_v52, %v9995_v20  ;;  %v10007_v52 = vld [vmem:[#allocation15_spill] sm:$0xff] }
 0x203   : > { %v4954_v51 = vpop.f32.mrf.mxu0  ;;  %6228 = vst [vmem:[%s9687_s23 + $0x20] sm:$0xff] %v6168_v7   ;;  %v4547_v25 = vadd.f32 %v6823_v17, %v3793_v8  ;;  %v5231_v26 = vadd.f32 %v5230_v29, %v5040_v42  ;;  %v5042_v5 = vadd.f32 %v4951_v4, %v4544_v32  ;;  %v3795_v4 = vadd.f32 %v9993_v3, %v3408_v44  ;;  %v9997_v32 = vld [vmem:[#allocation4_spill] sm:$0xff] }
 0x204   : > { %v5299_v33 = vadd.f32 %v5298_v61, %v5268_v30  ;;  %v4456_v39 = vpop.f32.mrf.mxu1  ;;  %v5273_v60 = vmul.f32 %v5044_v54, %v5044_v54  ;;  %v9998_v61 = vld [vmem:[#allocation9_spill] sm:$0xff]  ;;  %v9999_v29 = vld [vmem:[#allocation12_spill] sm:$0xff] }
 0x205   : > { %v5045_v19 = vadd.f32 %v6871_v18, %v4547_v25  ;;  %v4545_v48 = vadd.f32 %v4456_v39, %v3791_v46  ;;  %v5232_v14 = vadd.f32 %v5231_v26, %v5041_v23  ;;  %v5271_v1 = vmul.f32 %v5042_v5, %v5042_v5  ;;  %v10000_v25 = vld [vmem:[#allocation6_spill] sm:$0xff] }
 0x206   : > { %v6874_v50 = vpop.f32.mrf.mxu0  ;;  %v5300_v34 = vadd.f32 %v5299_v33, %v5269_v56  ;;  %v6826_v13 = vpop.f32.mrf.mxu1  ;;  %v3412_v17 = vadd.f32 %v9999_v29, %v9998_v61  ;;  %v3801_v56 = vadd.f32 %v10000_v25, %v3414_v37  ;;  %v10008_v37 = vld [vmem:[#allocation23_spill] sm:$0xff] }
 0x207   : > { %v6183_v59 = vpack.c.bf16 %v5045_v19, %v5044_v54  ;;  %v5043_v10 = vadd.f32 %v4954_v51, %v4545_v48  ;;  %v5233_v12 = vadd.f32 %v5232_v14, %v5042_v5  ;;  %v4550_v35 = vadd.f32 %v6826_v13, %v9616_v15 }
 0x208   : > { %v4967_v41 = vpop.f32.mrf.mxu0  ;;  %v5301_v43 = vadd.f32 %v5300_v34, %v5270_v45  ;;  %v4469_v22 = vpop.f32.mrf.mxu1  ;;  %v5274_v7 = vmul.f32 %v5045_v19, %v5045_v19  ;;  %v3798_v51 = vadd.f32 %v9997_v32, %v3411_v40  ;;  %v10006_v40 = vld [vmem:[#allocation14_spill] sm:$0xff] }
 0x209   : > { %6231 = vst [vmem:[%s9687_s23 + $0x38] sm:$0xff] %v6183_v59   ;;  %v6178_v58 = vpack.c.bf16 %v5043_v10, %v5042_v5  ;;  %v5272_v27 = vmul.f32 %v5043_v10, %v5043_v10  ;;  %v4548_v42 = vadd.f32 %v4469_v22, %v3794_v16  ;;  %v5234_v49 = vadd.f32 %v5233_v12, %v5043_v10  ;;  %v10002_v16 = vld [vmem:[#allocation10_spill] sm:$0xff] }
 0x20a   : > { %v6875_v57 = vpop.f32.mrf.mxu0  ;;  %v5302_v23 = vadd.f32 %v5301_v43, %v5271_v1  ;;  %v6827_v11 = vpop.f32.mrf.mxu1  ;;  %v5048_v6 = vadd.f32 %v6874_v50, %v4550_v35  ;;  %v3799_v44 = vadd.f32 %v10002_v16, %v3412_v17  ;;  %v10003_v59 = vld [vmem:[#allocation18_spill] sm:$0xff]  ;;  %v10011_v17 = vld [vmem:[#allocation21_spill] sm:$0xff] }
 0x20b   : > { %6230 = vst [vmem:[%s9687_s23 + $0x30] sm:$0xff] %v6178_v58   ;;  %v4551_v0 = vadd.f32 %v6827_v11, %v3797_v36  ;;  %v5235_v28 = vadd.f32 %v5234_v49, %v5044_v54  ;;  %v5046_v15 = vadd.f32 %v4967_v41, %v4548_v42  ;;  %v3415_v10 = vadd.f32 %v9644_v31, %v10003_v59  ;;  %v10005_v36 = vld [vmem:[#allocation22_spill] sm:$0xff] }
 0x20c   : > { %v4970_v9 = vpop.f32.mrf.mxu0  ;;  %v5303_v18 = vadd.f32 %v5302_v23, %v5272_v27  ;;  %v4472_v8 = vpop.f32.mrf.mxu1  ;;  %v5277_v22 = vmul.f32 %v5048_v6, %v5048_v6 }
 0x20d   : > { %v5049_v24 = vadd.f32 %v6875_v57, %v4551_v0  ;;  %v4549_v21 = vadd.f32 %v4472_v8, %v3795_v4  ;;  %v5236_v38 = vadd.f32 %v5235_v28, %v5045_v19  ;;  %v5275_v50 = vmul.f32 %v5046_v15, %v5046_v15  ;;  %v10001_v19 = vld [vmem:[#allocation8_spill] sm:$0xff]  ;;  %v10004_v57 = vld [vmem:[#allocation13_spill] sm:$0xff] }
 0x20e   : > { %v6878_v2 = vpop.f32.mrf.mxu0  ;;  %v5304_v30 = vadd.f32 %v5303_v18, %v5273_v60  ;;  %v6830_v55 = vpop.f32.mrf.mxu1  ;;  %v3418_v12 = vadd.f32 %v10005_v36, %v10004_v57  ;;  %v3802_v20 = vadd.f32 %v10006_v40, %v3415_v10  ;;  %v3416_v0 = vadd.f32 %v10008_v37, %v10007_v52  ;;  %v10016_v57 = vld [vmem:[#allocation24_spill] sm:$0xff] }
 0x20f   : > { %v6193_v46 = vpack.c.bf16 %v5049_v24, %v5048_v6  ;;  %v5047_v62 = vadd.f32 %v4970_v9, %v4549_v21  ;;  %v5237_v26 = vadd.f32 %v5236_v38, %v5046_v15  ;;  %v4554_v48 = vadd.f32 %v6830_v55, %v10001_v19 }
 0x210   : > { %v4983_v63 = vpop.f32.mrf.mxu0  ;;  %v5305_v33 = vadd.f32 %v5304_v30, %v5274_v7  ;;  %v4485_v5 = vpop.f32.mrf.mxu1  ;;  %v5278_v3 = vmul.f32 %v5049_v24, %v5049_v24 }
 0x211   : > { %6233 = vst [vmem:[%s9687_s23 + $0x48] sm:$0xff] %v6193_v46   ;;  %v6188_v39 = vpack.c.bf16 %v5047_v62, %v5046_v15  ;;  %v5276_v54 = vmul.f32 %v5047_v62, %v5047_v62  ;;  %v4552_v41 = vadd.f32 %v4485_v5, %v3798_v51  ;;  %v5238_v14 = vadd.f32 %v5237_v26, %v5047_v62  ;;  %v10009_v15 = vld [vmem:[#allocation16_spill] sm:$0xff]  ;;  %v10012_v62 = vld [vmem:[#allocation17_spill] sm:$0xff] }
 0x212   : > { %v6879_v47 = vpop.f32.mrf.mxu0  ;;  %v5306_v34 = vadd.f32 %v5305_v33, %v5275_v50  ;;  %v6831_v13 = vpop.f32.mrf.mxu1  ;;  %v5052_v9 = vadd.f32 %v6878_v2, %v4554_v48  ;;  %v3805_v8 = vadd.f32 %v10009_v15, %v3418_v12  ;;  %v3803_v46 = vadd.f32 %v10011_v17, %v3416_v0  ;;  %v10015_v26 = vld [vmem:[#allocation29_spill] sm:$0xff]  ;;  %v10017_v12 = vld [vmem:[#allocation2_spill] sm:$0xff]  ;;  %v10021_v0 = vld [vmem:[#allocation28_spill] sm:$0xff] }
 0x213   : > { %6232 = vst [vmem:[%s9687_s23 + $0x40] sm:$0xff] %v6188_v39   ;;  %v4555_v1 = vadd.f32 %v6831_v13, %v3801_v56  ;;  %v5239_v58 = vadd.f32 %v5238_v14, %v5048_v6  ;;  %v5050_v35 = vadd.f32 %v4983_v63, %v4552_v41  ;;  %v10014_v56 = vld [vmem:[#allocation20_spill] sm:$0xff] }
 0x214   : > { %v4986_v45 = vpop.f32.mrf.mxu0  ;;  %v5307_v27 = vadd.f32 %v5306_v34, %v5276_v54  ;;  %v4488_v42 = vpop.f32.mrf.mxu1  ;;  %v3422_v50 = vadd.f32 %v10015_v26, %v10014_v56  ;;  %v5281_v39 = vmul.f32 %v5052_v9, %v5052_v9 }
 0x215   : > { %v5053_v23 = vadd.f32 %v6879_v47, %v4555_v1  ;;  %v4553_v49 = vadd.f32 %v4488_v42, %v3799_v44  ;;  %v5240_v53 = vadd.f32 %v5239_v58, %v5049_v24  ;;  %v5279_v2 = vmul.f32 %v5050_v35, %v5050_v35  ;;  %v10010_v24 = vld [vmem:[#allocation19_spill] sm:$0xff]  ;;  %v10013_v47 = vld [vmem:[#allocation26_spill] sm:$0xff] }
 0x216   : > { %v6882_v43 = vpop.f32.mrf.mxu0  ;;  %v5308_v4 = vadd.f32 %v5307_v27, %v5277_v22  ;;  %v6834_v31 = vpop.f32.mrf.mxu1  ;;  %v3419_v25 = vadd.f32 %v10013_v47, %v10012_v62  ;;  %v10018_v1 = vld [vmem:[#allocation30_spill] sm:$0xff] }
 0x217   : > { %v6203_v60 = vpack.c.bf16 %v5053_v23, %v5052_v9  ;;  %v5051_v28 = vadd.f32 %v4986_v45, %v4553_v49  ;;  %v5241_v6 = vadd.f32 %v5240_v53, %v5050_v35  ;;  %v4558_v38 = vadd.f32 %v6834_v31, %v10010_v24 }
 0x218   : > { %v4999_v11 = vpop.f32.mrf.mxu0  ;;  %v5309_v21 = vadd.f32 %v5308_v4, %v5278_v3  ;;  %v4501_v63 = vpop.f32.mrf.mxu1  ;;  %v5282_v13 = vmul.f32 %v5053_v23, %v5053_v23  ;;  %v3806_v36 = vadd.f32 %v10016_v57, %v3419_v25  ;;  %v3420_v22 = vadd.f32 %v10018_v1, %v10017_v12 }
 0x219   : > { %6235 = vst [vmem:[%s9687_s23 + $0x58] sm:$0xff] %v6203_v60   ;;  %v6198_v7 = vpack.c.bf16 %v5051_v28, %v5050_v35  ;;  %v5280_v30 = vmul.f32 %v5051_v28, %v5051_v28  ;;  %v4556_v55 = vadd.f32 %v4501_v63, %v3802_v20  ;;  %v5242_v61 = vadd.f32 %v5241_v6, %v5051_v28  ;;  %v10019_v35 = vld [vmem:[#allocation25_spill] sm:$0xff] }
 0x21a   : > { %v6883_v18 = vpop.f32.mrf.mxu0  ;;  %v5310_v51 = vadd.f32 %v5309_v21, %v5279_v2  ;;  %v6835_v29 = vpop.f32.mrf.mxu1  ;;  %v5056_v45 = vadd.f32 %v6882_v43, %v4558_v38  ;;  %v3809_v42 = vadd.f32 %v10019_v35, %v3422_v50  ;;  %v3807_v60 = vadd.f32 %v10021_v0, %v3420_v22 }
 0x21b   : > { %6234 = vst [vmem:[%s9687_s23 + $0x50] sm:$0xff] %v6198_v7   ;;  %v4559_v33 = vadd.f32 %v6835_v29, %v3805_v8  ;;  %v5243_v54 = vadd.f32 %v5242_v61, %v5052_v9  ;;  %v5054_v48 = vadd.f32 %v4999_v11, %v4556_v55 }
 0x21c   : > { %v5002_v32 = vpop.f32.mrf.mxu0  ;;  %v5311_v19 = vadd.f32 %v5310_v51, %v5280_v30  ;;  %v4504_v41 = vpop.f32.mrf.mxu1 }
 0x21d   : > { %v5057_v34 = vadd.f32 %v6883_v18, %v4559_v33  ;;  %v4557_v14 = vadd.f32 %v4504_v41, %v3803_v46  ;;  %v5244_v44 = vadd.f32 %v5243_v54, %v5053_v23  ;;  %v5283_v43 = vmul.f32 %v5054_v48, %v5054_v48  ;;  %v10020_v23 = vld [vmem:[#allocation27_spill] sm:$0xff] }
 0x21e   : > { %v6886_v5 = vpop.f32.mrf.mxu0  ;;  %v5312_v16 = vadd.f32 %v5311_v19, %v5281_v39  ;;  %v6838_v59 = vpop.f32.mrf.mxu1  ;;  %v5285_v18 = vmul.f32 %v5056_v45, %v5056_v45 }
 0x21f   : > { %v6213_v58 = vpack.c.bf16 %v5057_v34, %v5056_v45  ;;  %v5055_v27 = vadd.f32 %v5002_v32, %v4557_v14  ;;  %v5245_v9 = vadd.f32 %v5244_v44, %v5054_v48  ;;  %v4562_v53 = vadd.f32 %v6838_v59, %v10020_v23 }
 0x220   : > { %v5015_v10 = vpop.f32.mrf.mxu0  ;;  %v5313_v49 = vadd.f32 %v5312_v16, %v5282_v13  ;;  %v4517_v11 = vpop.f32.mrf.mxu1  ;;  %v5286_v30 = vmul.f32 %v5057_v34, %v5057_v34 }
 0x221   : > { %6237 = vst [vmem:[%s9687_s23 + $0x68] sm:$0xff] %v6213_v58   ;;  %v6208_v3 = vpack.c.bf16 %v5055_v27, %v5054_v48  ;;  %v5284_v4 = vmul.f32 %v5055_v27, %v5055_v27  ;;  %v4560_v31 = vadd.f32 %v4517_v11, %v3806_v36  ;;  %v5246_v20 = vadd.f32 %v5245_v9, %v5055_v27 }
 0x222   : > { %v5314_v40 = vadd.f32 %v5313_v49, %v5283_v43  ;;  %v6839_v52 = vpop.f32.mrf.mxu1  ;;  %v6887_v37 = vpop.f32.mrf.mxu0  ;;  %v5060_v21 = vadd.f32 %v6886_v5, %v4562_v53 }
 0x223   : > { %6236 = vst [vmem:[%s9687_s23 + $0x60] sm:$0xff] %v6208_v3   ;;  %v4563_v28 = vadd.f32 %v6839_v52, %v3809_v42  ;;  %v5247_v15 = vadd.f32 %v5246_v20, %v5056_v45  ;;  %v5058_v6 = vadd.f32 %v5015_v10, %v4560_v31 }
 0x224   : > { %v5315_v8 = vadd.f32 %v5314_v40, %v5284_v4  ;;  %v4520_v2 = vpop.f32.mrf.mxu1  ;;  %v5018_v55 = vpop.f32.mrf.mxu0  ;;  %v5289_v56 = vmul.f32 %v5060_v21, %v5060_v21 }
 0x225   : > { %v5061_v63 = vadd.f32 %v6887_v37, %v4563_v28  ;;  %v4561_v7 = vadd.f32 %v4520_v2, %v3807_v60  ;;  %v5248_v38 = vadd.f32 %v5247_v15, %v5057_v34  ;;  %v5287_v29 = vmul.f32 %v5058_v6, %v5058_v6 }
 0x226   : > { %v5316_v24 = vadd.f32 %v5315_v8, %v5285_v18 }
 0x227   : > { %v6223_v32 = vpack.c.bf16 %v5061_v63, %v5060_v21  ;;  %v5059_v51 = vadd.f32 %v5018_v55, %v4561_v7  ;;  %v5249_v61 = vadd.f32 %v5248_v38, %v5058_v6  ;;  %v5290_v33 = vmul.f32 %v5061_v63, %v5061_v63 }
 0x228   : > { %v5317_v17 = vadd.f32 %v5316_v24, %v5286_v30 }
 0x229   : > { %6239 = vst [vmem:[%s9687_s23 + $0x78] sm:$0xff] %v6223_v32   ;;  %v6218_v46 = vpack.c.bf16 %v5059_v51, %v5058_v6  ;;  %v5288_v62 = vmul.f32 %v5059_v51, %v5059_v51  ;;  %v5250_v25 = vadd.f32 %v5249_v61, %v5059_v51 }
 0x22a   : > { %v5318_v47 = vadd.f32 %v5317_v17, %v5287_v29 }
 0x22b   : > { %6238 = vst [vmem:[%s9687_s23 + $0x70] sm:$0xff] %v6218_v46   ;;  %v5251_v26 = vadd.f32 %v5250_v25, %v5060_v21 }
 0x22c   : > { %v5319_v50 = vadd.f32 %v5318_v47, %v5288_v62 }
 0x22d   : > { %v5252_v5 = vadd.f32 %v5251_v26, %v5061_v63 }
 0x22e   : > { %v5320_v39 = vadd.f32 %v5319_v50, %v5289_v56 }
 0x22f   : > { %v5253_v54 = vrot.slane %v5252_v5, 4 }
 0x230   : > { %v5321_v19 = vadd.f32 %v5320_v39, %v5290_v33 }
 0x231   : > { %v5254_v48 = vadd.f32 %v5253_v54, %v5252_v5 }
 0x232   : > { %v5322_v41 = vrot.slane %v5321_v19, 4 }
 0x233   : > { %v5255_v45 = vrot.slane %v5254_v48, 2 }
 0x234   : > { %v5323_v34 = vadd.f32 %v5322_v41, %v5321_v19 }
 0x235   : > { %v5256_v14 = vadd.f32 %v5255_v45, %v5254_v48 }
 0x236   : > { %v5324_v13 = vrot.slane %v5323_v34, 2 }
 0x237   : > { %v5257_v16 = vrot.slane %v5256_v14, 1 }
 0x238   : > { %v5325_v44 = vadd.f32 %v5324_v13, %v5323_v34  ;;  %5331 = sbr.rel (%p6106_p5) target bundleno = 575 (0x23f), region = 32 }
 0x239   : > { %v5258_v59 = vadd.f32 %v5257_v16, %v5256_v14 }
 0x23a   : > { %v5326_v10 = vrot.slane %v5325_v44, 1 }
 0x23c   : > { %v5327_v57 = vadd.f32 %v5326_v10, %v5325_v44 }
 0x23d   : > { %5332 = vst [vmem:[%s9801_s3] sm:$0x1] %v5258_v59 }
 0x23e   : > { %5333 = vst [vmem:[%s9802_s4] sm:$0x1] %v5327_v57 }
 0x23f PF: > { %p6107_p6 = scmp.le.s32.totalorder %s7072_s15, 0 }
 0x241   : > { %5337 = sbr.rel (%p6107_p6) target bundleno = 587 (0x24b), region = 36 }
 0x246   : > { %v5338_v36 = vld [vmem:[%s9801_s3] sm:$0x1] }
 0x247   : > { %v5341_v12 = vld [vmem:[%s9802_s4] sm:$0x1]  ;;  %v5339_v1 = vadd.f32 %v5338_v36, %v5258_v59 }
 0x248   : > { %v5342_v22 = vadd.f32 %v5341_v12, %v5327_v57 }
 0x249   : > { %5340 = vst [vmem:[%s9801_s3] sm:$0x1] %v5339_v1 }
 0x24a   : > { %5343 = vst [vmem:[%s9802_s4] sm:$0x1] %v5342_v22 }
 0x24b PF: > { %s15_s17 = sadd.s32 1, %s7080_s17   ;;  %s10022_s15 = smov %s7076_s16 }
 0x24c   : > { %p12_p7 = scmp.ge.s32.totalorder %s15_s17, 4   ;;  %s10023_s16 = smov %s10025_s18 }
 0x24e   :  { %14 = sbr.rel (!%p12_p7) target bundleno = 2 (0x2), region = 103 }

</bundles_post_ra>
